<compile_context>
chip_gen: v7x
topology: tpu7x:2x2x1
jax: 0.10.0
libtpu: 0.0.40
codegen_flags: <defaults>
</compile_context>

<pallas_src>
import functools
import math

import jax
import jax.numpy as jnp
from jax.experimental import pallas as pl
from jax.experimental.pallas import tpu as pltpu

# ------------------------------------------------------------------ static model config

NUM_BLOCKS = 2
F_REAL = 40      # input feature dim
D_REAL = 80      # model dim
OUT_REAL = 600   # classifier output dim

FP = 128         # padded input feature dim (lane-dense)
DP = 128         # padded model dim
OUTP = 640       # padded classifier output dim (5 * 128)

LN_EPS = 1e-5
BN_EPS = 1e-5

# per-block square (DP, DP) weight slots (pre-transposed to (in, out), pre-composed)
(W_LIN, W_QC, W_KC, W_VC, W_AO, W_PW1A, W_PW1B, W_PW2) = range(8)
NW = 8
# per-block (1, DP) vector slots
(V_LIN_B, V_MHSA_LN_G, V_MHSA_LN_B, V_QC_B, V_KC_B, V_VC_B, V_AO_B,
 V_CONV_LN_G, V_CONV_LN_B, V_PW1A_B, V_PW1B_B,
 V_DW0, V_DW1, V_DW2, V_DW_B, V_PW2_B, V_FLN_G, V_FLN_B) = range(18)
NV = 18


# ------------------------------------------------------------------ fused kernel

def _speaker_classifier_kernel(x_ref, in_w_ref, in_b_ref, bw_ref, bv_ref,
                               fc1_w_ref, fc1_b_ref, fc2_w_ref, fc2_b_ref,
                               o_ref, *, batch, time):
    f32 = jnp.float32
    bt = batch * time
    inv_d = 1.0 / D_REAL
    scale = 1.0 / math.sqrt(D_REAL)

    def mat(blk, i):
        return bw_ref[blk, i]              # (DP, DP)

    def vec(blk, i):
        return bv_ref[blk, i]              # (1, DP)

    def dot(a, b):
        return jnp.dot(a, b, preferred_element_type=f32)

    # ---- block-invariant constants, hoisted (JAX does not CSE broadcasts) ----
    lane = jax.lax.broadcasted_iota(jnp.int32, (1, DP), 1)
    lane_mask = lane < D_REAL                                   # real (non-padded) lanes

    rows = jax.lax.broadcasted_iota(jnp.int32, (bt, bt), 0)
    cols = jax.lax.broadcasted_iota(jnp.int32, (bt, bt), 1)
    diff = rows - cols

    # rows are flattened (b, t) with t minor -> same timestep <=> diff is a multiple of T
    same_t = diff == 0
    for kb in range(1, batch):
        same_t = jnp.logical_or(
            same_t, jnp.logical_or(diff == kb * time, diff == -kb * time))

    # depthwise-conv (k=3, pad=1) time shifts as banded 0/1 matrices: boundary zeros and
    # batch isolation are built in, data stays lane-dense, runs on the MXU.
    t_row = jax.lax.broadcasted_iota(jnp.int32, (bt, 1), 0)
    is_first_t = t_row == 0
    is_last_t = t_row == time - 1
    for kb in range(1, batch):
        is_first_t = jnp.logical_or(is_first_t, t_row == kb * time)
        is_last_t = jnp.logical_or(is_last_t, t_row == (kb + 1) * time - 1)
    shift_prev = jnp.where(jnp.logical_and(diff == 1, jnp.logical_not(is_first_t)),
                           1.0, 0.0)                            # row i <- row i-1
    shift_next = jnp.where(jnp.logical_and(diff == -1, jnp.logical_not(is_last_t)),
                           1.0, 0.0)                            # row i <- row i+1

    # mean-over-time pooling matrix: (batch, bt) with 1/T on each sample's rows
    prow = jax.lax.broadcasted_iota(jnp.int32, (batch, bt), 0)
    pcol = jax.lax.broadcasted_iota(jnp.int32, (batch, bt), 1)
    pool = jnp.where(jnp.logical_and(pcol >= prow * time, pcol < (prow + 1) * time),
                     1.0 / time, 0.0)

    def layer_norm(y, g, b):
        mu = jnp.sum(y, axis=-1, keepdims=True) * inv_d         # padded lanes are zero
        yc = y - mu
        var = jnp.sum(jnp.where(lane_mask, yc * yc, 0.0),
                      axis=-1, keepdims=True) * inv_d
        return yc * jax.lax.rsqrt(var + LN_EPS) * g + b

    # ---- input projection: Linear(40 -> 80), padded to 128 lanes ----
    h = dot(x_ref[...], in_w_ref[...]) + in_b_ref[...]          # (bt, DP)

    # ---- ConformerBlocks (unrolled; all weights VMEM-resident) ----
    for blk in range(NUM_BLOCKS):
        # x = x + 0.5 * linear(x)  (residual + scale folded into the packed weight)
        h = dot(h, mat(blk, W_LIN)) + vec(blk, V_LIN_B)

        # --- MHSA module (single head; torch batch_first=False semantics:
        #     "sequence" axis == batch dim, attention is batched per timestep).
        #     query/key/value_matrix and the MHA in-projection are pre-composed. ---
        hn = layer_norm(h, vec(blk, V_MHSA_LN_G), vec(blk, V_MHSA_LN_B))
        qp = dot(hn, mat(blk, W_QC)) + vec(blk, V_QC_B)
        kp = dot(hn, mat(blk, W_KC)) + vec(blk, V_KC_B)
        vp = dot(hn, mat(blk, W_VC)) + vec(blk, V_VC_B)
        s = jnp.einsum('ae,be->ab', qp * scale, kp,
                       preferred_element_type=f32)              # (bt, bt)
        s = jnp.where(same_t, s, -1e30)
        s = s - jnp.max(s, axis=-1, keepdims=True)
        p = jnp.exp(s)
        p = p * pl.reciprocal(jnp.sum(p, axis=-1, keepdims=True), approx=True)
        ctx = dot(p, vp)                                        # (bt, DP)
        h = h + dot(ctx, mat(blk, W_AO)) + vec(blk, V_AO_B)
        # TODO(synk): Dropout layers are identity here (inference / eval semantics).

        # --- Convolution module ---
        cn = layer_norm(h, vec(blk, V_CONV_LN_G), vec(blk, V_CONV_LN_B))
        a = dot(cn, mat(blk, W_PW1A)) + vec(blk, V_PW1A_B)      # GLU value half
        g = dot(cn, mat(blk, W_PW1B)) + vec(blk, V_PW1B_B)      # GLU gate half
        c = a * jax.nn.sigmoid(g)
        c_prev = dot(shift_prev, c)                             # x[t-1] (0 at t == 0)
        c_next = dot(shift_next, c)                             # x[t+1] (0 at t == T-1)
        # depthwise k=3 taps with BatchNorm1d (eval running stats) pre-folded in
        c = (c_prev * vec(blk, V_DW0) + c * vec(blk, V_DW1)
             + c_next * vec(blk, V_DW2) + vec(blk, V_DW_B))
        c = c * jax.nn.sigmoid(c)                               # SiLU
        h = h + dot(c, mat(blk, W_PW2)) + vec(blk, V_PW2_B)

        # x = x + 0.5 * linear(x)   (shared linear_layer applied again, folded weight)
        h = dot(h, mat(blk, W_LIN)) + vec(blk, V_LIN_B)
        h = layer_norm(h, vec(blk, V_FLN_G), vec(blk, V_FLN_B))

    # ---- mean over time + FC head ----
    m = dot(pool, h)                                            # (batch, DP)
    f = jnp.maximum(dot(m, fc1_w_ref[...]) + fc1_b_ref[...], 0.0)
    o_ref[...] = dot(f, fc2_w_ref[...]) + fc2_b_ref[...]        # (batch, OUTP)


# ------------------------------------------------------------------ wrappers

def speaker_classifier_forward(x, packed):
    B, T, F = x.shape
    xp = jnp.pad(x.reshape(B * T, F).astype(jnp.float32), ((0, 0), (0, FP - F)))
    kernel = functools.partial(_speaker_classifier_kernel, batch=B, time=T)
    vmem = pl.BlockSpec(memory_space=pltpu.MemorySpace.VMEM)
    out = pl.pallas_call(
        kernel,
        out_shape=jax.ShapeDtypeStruct((B, OUTP), jnp.float32),
        in_specs=[vmem] * 9,
        out_specs=vmem,
    )(xp, packed['in_w'], packed['in_b'], packed['blk_w'], packed['blk_v'],
      packed['fc1_w'], packed['fc1_b'], packed['fc2_w'], packed['fc2_b'])
    return out[:, :OUT_REAL]


# ------------------------------------------------------------------ one-time weight prep

def _pad_mat(w_in_out, rows=DP, cols=DP):
    buf = jnp.zeros((rows, cols), jnp.float32)
    return buf.at[:w_in_out.shape[0], :w_in_out.shape[1]].set(w_in_out)


def _pad_vec(v, width=DP):
    buf = jnp.zeros((1, width), jnp.float32)
    return buf.at[0, :v.shape[0]].set(v)


def prepare_params(params):
    """One-time packing: transpose to (in, out), compose consecutive affine maps,
    fold residual scale / BatchNorm, zero-pad to lane-dense shapes, stack."""
    blk_w, blk_v = [], []
    eye = jnp.eye(D_REAL, dtype=jnp.float32)
    for p in params['blocks']:
        w = [None] * NW
        v = [None] * NV

        # x + 0.5*(x W^T + b)  ==  x (I + 0.5 W^T) + 0.5 b
        w[W_LIN] = _pad_mat(eye + 0.5 * p['lin_w'].T)
        v[V_LIN_B] = _pad_vec(0.5 * p['lin_b'])

        v[V_MHSA_LN_G] = _pad_vec(p['mhsa_ln_g'])
        v[V_MHSA_LN_B] = _pad_vec(p['mhsa_ln_b'])

        # compose query/key/value_matrix with the MHA in-projection:
        #   (x Wq^T + bq) Wa^T + ba  ==  x (Wq^T Wa^T) + (bq Wa^T + ba)
        for slot_w, slot_b, wk, bk, awk, abk in (
                (W_QC, V_QC_B, 'q_w', 'q_b', 'attn_wq', 'attn_bq'),
                (W_KC, V_KC_B, 'k_w', 'k_b', 'attn_wk', 'attn_bk'),
                (W_VC, V_VC_B, 'v_w', 'v_b', 'attn_wv', 'attn_bv')):
            w[slot_w] = _pad_mat(p[wk].T @ p[awk].T)
            v[slot_b] = _pad_vec(p[bk] @ p[awk].T + p[abk])

        w[W_AO] = _pad_mat(p['attn_wo'].T)
        v[V_AO_B] = _pad_vec(p['attn_bo'])

        v[V_CONV_LN_G] = _pad_vec(p['conv_ln_g'])
        v[V_CONV_LN_B] = _pad_vec(p['conv_ln_b'])
        pw1_t = p['pw1_w'].T                        # (D, 2D)
        w[W_PW1A] = _pad_mat(pw1_t[:, :D_REAL])     # GLU value half
        w[W_PW1B] = _pad_mat(pw1_t[:, D_REAL:])     # GLU gate half
        v[V_PW1A_B] = _pad_vec(p['pw1_b'][:D_REAL])
        v[V_PW1B_B] = _pad_vec(p['pw1_b'][D_REAL:])

        # fold BatchNorm1d (eval running stats) into the depthwise-conv taps/bias
        s = p['bn_g'] / jnp.sqrt(p['bn_v'] + BN_EPS)
        t0 = p['bn_b'] - p['bn_m'] * s
        v[V_DW0] = _pad_vec(p['dw_w'][:, 0] * s)
        v[V_DW1] = _pad_vec(p['dw_w'][:, 1] * s)
        v[V_DW2] = _pad_vec(p['dw_w'][:, 2] * s)
        v[V_DW_B] = _pad_vec(p['dw_b'] * s + t0)

        w[W_PW2] = _pad_mat(p['pw2_w'].T)
        v[V_PW2_B] = _pad_vec(p['pw2_b'])
        v[V_FLN_G] = _pad_vec(p['final_ln_g'])
        v[V_FLN_B] = _pad_vec(p['final_ln_b'])

        blk_w.append(jnp.stack(w))                  # (NW, DP, DP)
        blk_v.append(jnp.stack(v))                  # (NV, 1, DP)

    return {
        'in_w': _pad_mat(params['in_w'].T, FP, DP),
        'in_b': _pad_vec(params['in_b']),
        'blk_w': jnp.stack(blk_w),                  # (NUM_BLOCKS, NW, DP, DP)
        'blk_v': jnp.stack(blk_v),                  # (NUM_BLOCKS, NV, 1, DP)
        'fc1_w': _pad_mat(params['fc1_w'].T),
        'fc1_b': _pad_vec(params['fc1_b']),
        'fc2_w': _pad_mat(params['fc2_w'].T, DP, OUTP),
        'fc2_b': _pad_vec(params['fc2_b'], OUTP),
    }


# ------------------------------------------------------------------ params

def _w(key, shape, scale=0.1):
    return jax.random.normal(key, shape, dtype=jnp.float32) * scale


def init_block_params(key, dim=80):
    ks = jax.random.split(key, 22)
    ones = jnp.ones((dim,), jnp.float32)
    zeros = jnp.zeros((dim,), jnp.float32)
    return {
        'lin_w': _w(ks[0], (dim, dim)), 'lin_b': _w(ks[1], (dim,)),
        'mhsa_ln_g': ones, 'mhsa_ln_b': zeros,
        'q_w': _w(ks[2], (dim, dim)), 'q_b': _w(ks[3], (dim,)),
        'k_w': _w(ks[4], (dim, dim)), 'k_b': _w(ks[5], (dim,)),
        'v_w': _w(ks[6], (dim, dim)), 'v_b': _w(ks[7], (dim,)),
        'attn_wq': _w(ks[8], (dim, dim)), 'attn_bq': _w(ks[9], (dim,)),
        'attn_wk': _w(ks[10], (dim, dim)), 'attn_bk': _w(ks[11], (dim,)),
        'attn_wv': _w(ks[12], (dim, dim)), 'attn_bv': _w(ks[13], (dim,)),
        'attn_wo': _w(ks[14], (dim, dim)), 'attn_bo': _w(ks[15], (dim,)),
        'conv_ln_g': ones, 'conv_ln_b': zeros,
        'pw1_w': _w(ks[16], (2 * dim, dim)), 'pw1_b': _w(ks[17], (2 * dim,)),
        'dw_w': _w(ks[18], (dim, 3)), 'dw_b': _w(ks[19], (dim,)),
        'bn_g': ones, 'bn_b': zeros, 'bn_m': zeros, 'bn_v': ones,
        'pw2_w': _w(ks[20], (dim, dim)), 'pw2_b': _w(ks[21], (dim,)),
        'final_ln_g': ones, 'final_ln_b': zeros,
    }


def init_params(key):
    k0, k1, k2, k3, k4, k5, k6, k7 = jax.random.split(key, 8)
    return {
        'in_w': _w(k0, (80, 40)), 'in_b': _w(k1, (80,)),
        'blocks': [init_block_params(k2), init_block_params(k3)],
        'fc1_w': _w(k4, (80, 80)), 'fc1_b': _w(k5, (80,)),
        'fc2_w': _w(k6, (600, 80)), 'fc2_b': _w(k7, (600,)),
    }


# ------------------------------------------------------------------ pure-JAX reference

def ref_forward(x, params):
    def ln(x, g, b):
        mu = x.mean(-1, keepdims=True)
        var = ((x - mu) ** 2).mean(-1, keepdims=True)
        return (x - mu) / jnp.sqrt(var + 1e-5) * g + b

    def lin(x, w, b):
        return x @ w.T + b

    h = lin(x, params['in_w'], params['in_b'])
    for p in params['blocks']:
        h = h + lin(h, p['lin_w'], p['lin_b']) * 0.5
        xl = ln(h, p['mhsa_ln_g'], p['mhsa_ln_b'])
        q = lin(xl, p['q_w'], p['q_b'])
        k = lin(xl, p['k_w'], p['k_b'])
        v = lin(xl, p['v_w'], p['v_b'])
        qp = lin(q, p['attn_wq'], p['attn_bq'])
        kp = lin(k, p['attn_wk'], p['attn_bk'])
        vp = lin(v, p['attn_wv'], p['attn_bv'])
        scale = 1.0 / math.sqrt(qp.shape[-1])
        s = jnp.einsum('lne,mne->nlm', qp * scale, kp)
        pmat = jax.nn.softmax(s, axis=-1)
        ctx = jnp.einsum('nlm,mne->lne', pmat, vp)
        h = h + lin(ctx, p['attn_wo'], p['attn_bo'])

        xl = ln(h, p['conv_ln_g'], p['conv_ln_b'])
        y = lin(xl, p['pw1_w'], p['pw1_b'])
        D = h.shape[-1]
        y = y[..., :D] * jax.nn.sigmoid(y[..., D:])
        yprev = jnp.pad(y, ((0, 0), (1, 0), (0, 0)))[:, :-1]
        ynext = jnp.pad(y, ((0, 0), (0, 1), (0, 0)))[:, 1:]
        dw = p['dw_w']
        y = yprev * dw[:, 0] + y * dw[:, 1] + ynext * dw[:, 2] + p['dw_b']
        y = (y - p['bn_m']) / jnp.sqrt(p['bn_v'] + 1e-5) * p['bn_g'] + p['bn_b']
        y = y * jax.nn.sigmoid(y)
        h = h + lin(y, p['pw2_w'], p['pw2_b'])

        h = h + lin(h, p['lin_w'], p['lin_b']) * 0.5
        h = ln(h, p['final_ln_g'], p['final_ln_b'])

    m = h.mean(axis=1)
    f = jnp.maximum(lin(m, params['fc1_w'], params['fc1_b']), 0.0)
    return lin(f, params['fc2_w'], params['fc2_b'])


# ------------------------------------------------------------------ main

if __name__ == "__main__":
    key = jax.random.PRNGKey(0)
    kx, kp = jax.random.split(key)
    B, T, F = 2, 8, 40
    x = jax.random.normal(kx, (B, T, F), dtype=jnp.float32)
    params = init_params(kp)
    packed = prepare_params(params)        # one-time weight packing (outside the hot path)

    fwd = jax.jit(speaker_classifier_forward)
    out = jax.block_until_ready(fwd(x, packed))

    ref = ref_forward(x, params)
    assert out.shape == (B, 600)
    assert jnp.allclose(out, ref, rtol=5e-2, atol=5e-2), \
        float(jnp.max(jnp.abs(out - ref)))
    print("KERNEL_OK")
</pallas_src>

<mosaic_0001>
module attributes {stable_mosaic.version = 11 : i64} {
  func.func @_speaker_classifier_kernel(%arg0: memref<16x128xf32, #tpu.memory_space<vmem>>, %arg1: memref<128x128xf32, #tpu.memory_space<vmem>>, %arg2: memref<1x128xf32, #tpu.memory_space<vmem>>, %arg3: memref<2x8x128x128xf32, #tpu.memory_space<vmem>>, %arg4: memref<2x18x1x128xf32, #tpu.memory_space<vmem>>, %arg5: memref<128x128xf32, #tpu.memory_space<vmem>>, %arg6: memref<1x128xf32, #tpu.memory_space<vmem>>, %arg7: memref<128x640xf32, #tpu.memory_space<vmem>>, %arg8: memref<1x640xf32, #tpu.memory_space<vmem>>, %arg9: memref<2x640xf32, #tpu.memory_space<vmem>>) attributes {dimension_semantics = [], scalar_prefetch = 0 : i64, scratch_operands = 0 : i64, tpu.core_type = #tpu.core_type<tc>} {
    %0 = tpu.iota {dimensions = array<i32: 1>} : vector<1x128xi32>
    %c80_i32 = arith.constant 80 : i32
    %1 = vector.broadcast %c80_i32 : i32 to vector<1x128xi32>
    %2 = arith.cmpi slt, %0, %1 : vector<1x128xi32>
    %3 = tpu.iota {dimensions = array<i32: 0>} : vector<16x16xi32>
    %4 = tpu.iota {dimensions = array<i32: 1>} : vector<16x16xi32>
    %5 = arith.subi %3, %4 : vector<16x16xi32>
    %c0_i32 = arith.constant 0 : i32
    %6 = vector.broadcast %c0_i32 : i32 to vector<16x16xi32>
    %7 = arith.cmpi eq, %5, %6 : vector<16x16xi32>
    %c8_i32 = arith.constant 8 : i32
    %8 = vector.broadcast %c8_i32 : i32 to vector<16x16xi32>
    %9 = arith.cmpi eq, %5, %8 : vector<16x16xi32>
    %c-8_i32 = arith.constant -8 : i32
    %10 = vector.broadcast %c-8_i32 : i32 to vector<16x16xi32>
    %11 = arith.cmpi eq, %5, %10 : vector<16x16xi32>
    %12 = arith.ori %9, %11 : vector<16x16xi1>
    %13 = arith.ori %7, %12 : vector<16x16xi1>
    %14 = tpu.iota {dimensions = array<i32: 0>} : vector<16x1xi32>
    %c0_i32_0 = arith.constant 0 : i32
    %15 = vector.broadcast %c0_i32_0 : i32 to vector<16x1xi32>
    %16 = arith.cmpi eq, %14, %15 : vector<16x1xi32>
    %c7_i32 = arith.constant 7 : i32
    %17 = vector.broadcast %c7_i32 : i32 to vector<16x1xi32>
    %18 = arith.cmpi eq, %14, %17 : vector<16x1xi32>
    %c8_i32_1 = arith.constant 8 : i32
    %19 = vector.broadcast %c8_i32_1 : i32 to vector<16x1xi32>
    %20 = arith.cmpi eq, %14, %19 : vector<16x1xi32>
    %21 = arith.ori %16, %20 : vector<16x1xi1>
    %c15_i32 = arith.constant 15 : i32
    %22 = vector.broadcast %c15_i32 : i32 to vector<16x1xi32>
    %23 = arith.cmpi eq, %14, %22 : vector<16x1xi32>
    %24 = arith.ori %18, %23 : vector<16x1xi1>
    %c1_i32 = arith.constant 1 : i32
    %25 = vector.broadcast %c1_i32 : i32 to vector<16x16xi32>
    %26 = arith.cmpi eq, %5, %25 : vector<16x16xi32>
    %cst = arith.constant dense<true> : vector<16x1xi1>
    %27 = arith.xori %21, %cst : vector<16x1xi1>
    %28 = vector.broadcast %27 : vector<16x1xi1> to vector<16x16xi1>
    %29 = arith.andi %26, %28 : vector<16x16xi1>
    %cst_2 = arith.constant 1.000000e+00 : f32
    %cst_3 = arith.constant 0.000000e+00 : f32
    %30 = vector.broadcast %cst_2 : f32 to vector<16x16xf32>
    %31 = vector.broadcast %cst_3 : f32 to vector<16x16xf32>
    %32 = arith.select %29, %30, %31 : vector<16x16xi1>, vector<16x16xf32>
    %c-1_i32 = arith.constant -1 : i32
    %33 = vector.broadcast %c-1_i32 : i32 to vector<16x16xi32>
    %34 = arith.cmpi eq, %5, %33 : vector<16x16xi32>
    %cst_4 = arith.constant dense<true> : vector<16x1xi1>
    %35 = arith.xori %24, %cst_4 : vector<16x1xi1>
    %36 = vector.broadcast %35 : vector<16x1xi1> to vector<16x16xi1>
    %37 = arith.andi %34, %36 : vector<16x16xi1>
    %cst_5 = arith.constant 1.000000e+00 : f32
    %cst_6 = arith.constant 0.000000e+00 : f32
    %38 = vector.broadcast %cst_5 : f32 to vector<16x16xf32>
    %39 = vector.broadcast %cst_6 : f32 to vector<16x16xf32>
    %40 = arith.select %37, %38, %39 : vector<16x16xi1>, vector<16x16xf32>
    %41 = tpu.iota {dimensions = array<i32: 0>} : vector<2x16xi32>
    %42 = tpu.iota {dimensions = array<i32: 1>} : vector<2x16xi32>
    %c8_i32_7 = arith.constant 8 : i32
    %43 = vector.broadcast %c8_i32_7 : i32 to vector<2x16xi32>
    %44 = arith.muli %41, %43 : vector<2x16xi32>
    %45 = arith.cmpi sge, %42, %44 : vector<2x16xi32>
    %c1_i32_8 = arith.constant 1 : i32
    %46 = vector.broadcast %c1_i32_8 : i32 to vector<2x16xi32>
    %47 = arith.addi %41, %46 : vector<2x16xi32>
    %c8_i32_9 = arith.constant 8 : i32
    %48 = vector.broadcast %c8_i32_9 : i32 to vector<2x16xi32>
    %49 = arith.muli %47, %48 : vector<2x16xi32>
    %50 = arith.cmpi slt, %42, %49 : vector<2x16xi32>
    %51 = arith.andi %45, %50 : vector<2x16xi1>
    %cst_10 = arith.constant 1.250000e-01 : f32
    %cst_11 = arith.constant 0.000000e+00 : f32
    %52 = vector.broadcast %cst_10 : f32 to vector<2x16xf32>
    %53 = vector.broadcast %cst_11 : f32 to vector<2x16xf32>
    %54 = arith.select %51, %52, %53 : vector<2x16xi1>, vector<2x16xf32>
    %c0 = arith.constant 0 : index
    %c0_12 = arith.constant 0 : index
    %55 = vector.load %arg0[%c0, %c0_12] : memref<16x128xf32, #tpu.memory_space<vmem>>, vector<16x128xf32>
    %c0_13 = arith.constant 0 : index
    %c0_14 = arith.constant 0 : index
    %56 = vector.load %arg1[%c0_13, %c0_14] : memref<128x128xf32, #tpu.memory_space<vmem>>, vector<128x128xf32>
    %cst_15 = arith.constant dense<0.000000e+00> : vector<16x128xf32>
    %57 = tpu.matmul %55, %56, %cst_15 {dimension_numbers = #tpu.dot_dimension_numbers<[1], [0], [0], [1], [0, 0, 1, 1], [], []>} : vector<16x128xf32>, vector<128x128xf32>, vector<16x128xf32> -> vector<16x128xf32>
    %c0_16 = arith.constant 0 : index
    %c0_17 = arith.constant 0 : index
    %58 = vector.load %arg2[%c0_16, %c0_17] : memref<1x128xf32, #tpu.memory_space<vmem>>, vector<1x128xf32>
    %59 = vector.broadcast %58 : vector<1x128xf32> to vector<16x128xf32>
    %60 = arith.addf %57, %59 : vector<16x128xf32>
    %c0_18 = arith.constant 0 : index
    %c0_19 = arith.constant 0 : index
    %c0_20 = arith.constant 0 : index
    %c0_21 = arith.constant 0 : index
    %61 = vector.load %arg3[%c0_18, %c0_19, %c0_20, %c0_21] : memref<2x8x128x128xf32, #tpu.memory_space<vmem>>, vector<1x1x128x128xf32>
    %62 = vector.shape_cast %61 : vector<1x1x128x128xf32> to vector<128x128xf32>
    %cst_22 = arith.constant dense<0.000000e+00> : vector<16x128xf32>
    %63 = tpu.matmul %60, %62, %cst_22 {dimension_numbers = #tpu.dot_dimension_numbers<[1], [0], [0], [1], [0, 0, 1, 1], [], []>} : vector<16x128xf32>, vector<128x128xf32>, vector<16x128xf32> -> vector<16x128xf32>
    %c0_23 = arith.constant 0 : index
    %c0_24 = arith.constant 0 : index
    %c0_25 = arith.constant 0 : index
    %c0_26 = arith.constant 0 : index
    %64 = vector.load %arg4[%c0_23, %c0_24, %c0_25, %c0_26] : memref<2x18x1x128xf32, #tpu.memory_space<vmem>>, vector<1x1x1x128xf32>
    %65 = vector.shape_cast %64 : vector<1x1x1x128xf32> to vector<1x128xf32>
    %66 = vector.broadcast %65 : vector<1x128xf32> to vector<16x128xf32>
    %67 = arith.addf %63, %66 : vector<16x128xf32>
    %c0_27 = arith.constant 0 : index
    %c1 = arith.constant 1 : index
    %c0_28 = arith.constant 0 : index
    %c0_29 = arith.constant 0 : index
    %68 = vector.load %arg4[%c0_27, %c1, %c0_28, %c0_29] : memref<2x18x1x128xf32, #tpu.memory_space<vmem>>, vector<1x1x1x128xf32>
    %69 = vector.shape_cast %68 : vector<1x1x1x128xf32> to vector<1x128xf32>
    %c0_30 = arith.constant 0 : index
    %c2 = arith.constant 2 : index
    %c0_31 = arith.constant 0 : index
    %c0_32 = arith.constant 0 : index
    %70 = vector.load %arg4[%c0_30, %c2, %c0_31, %c0_32] : memref<2x18x1x128xf32, #tpu.memory_space<vmem>>, vector<1x1x1x128xf32>
    %71 = vector.shape_cast %70 : vector<1x1x1x128xf32> to vector<1x128xf32>
    %cst_33 = arith.constant dense<0.000000e+00> : vector<16xf32>
    %72 = vector.multi_reduction <add>, %67, %cst_33 [1] : vector<16x128xf32> to vector<16xf32>
    %73 = vector.shape_cast %72 : vector<16xf32> to vector<16x1xf32>
    %cst_34 = arith.constant 1.250000e-02 : f32
    %74 = vector.broadcast %cst_34 : f32 to vector<16x1xf32>
    %75 = arith.mulf %73, %74 : vector<16x1xf32>
    %76 = vector.broadcast %75 : vector<16x1xf32> to vector<16x128xf32>
    %77 = arith.subf %67, %76 : vector<16x128xf32>
    %78 = arith.mulf %77, %77 : vector<16x128xf32>
    %cst_35 = arith.constant 0.000000e+00 : f32
    %79 = vector.shape_cast %2 : vector<1x128xi1> to vector<1x128xi1>
    %80 = vector.broadcast %79 : vector<1x128xi1> to vector<16x128xi1>
    %81 = vector.broadcast %cst_35 : f32 to vector<16x128xf32>
    %82 = arith.select %80, %78, %81 : vector<16x128xi1>, vector<16x128xf32>
    %cst_36 = arith.constant dense<0.000000e+00> : vector<16xf32>
    %83 = vector.multi_reduction <add>, %82, %cst_36 [1] : vector<16x128xf32> to vector<16xf32>
    %84 = vector.shape_cast %83 : vector<16xf32> to vector<16x1xf32>
    %cst_37 = arith.constant 1.250000e-02 : f32
    %85 = vector.broadcast %cst_37 : f32 to vector<16x1xf32>
    %86 = arith.mulf %84, %85 : vector<16x1xf32>
    %cst_38 = arith.constant 9.99999974E-6 : f32
    %87 = vector.broadcast %cst_38 : f32 to vector<16x1xf32>
    %88 = arith.addf %86, %87 : vector<16x1xf32>
    %89 = math.rsqrt %88 : vector<16x1xf32>
    %90 = vector.broadcast %89 : vector<16x1xf32> to vector<16x128xf32>
    %91 = arith.mulf %77, %90 : vector<16x128xf32>
    %92 = vector.broadcast %69 : vector<1x128xf32> to vector<16x128xf32>
    %93 = arith.mulf %91, %92 : vector<16x128xf32>
    %94 = vector.broadcast %71 : vector<1x128xf32> to vector<16x128xf32>
    %95 = arith.addf %93, %94 : vector<16x128xf32>
    %c0_39 = arith.constant 0 : index
    %c1_40 = arith.constant 1 : index
    %c0_41 = arith.constant 0 : index
    %c0_42 = arith.constant 0 : index
    %96 = vector.load %arg3[%c0_39, %c1_40, %c0_41, %c0_42] : memref<2x8x128x128xf32, #tpu.memory_space<vmem>>, vector<1x1x128x128xf32>
    %97 = vector.shape_cast %96 : vector<1x1x128x128xf32> to vector<128x128xf32>
    %cst_43 = arith.constant dense<0.000000e+00> : vector<16x128xf32>
    %98 = tpu.matmul %95, %97, %cst_43 {dimension_numbers = #tpu.dot_dimension_numbers<[1], [0], [0], [1], [0, 0, 1, 1], [], []>} : vector<16x128xf32>, vector<128x128xf32>, vector<16x128xf32> -> vector<16x128xf32>
    %c0_44 = arith.constant 0 : index
    %c3 = arith.constant 3 : index
    %c0_45 = arith.constant 0 : index
    %c0_46 = arith.constant 0 : index
    %99 = vector.load %arg4[%c0_44, %c3, %c0_45, %c0_46] : memref<2x18x1x128xf32, #tpu.memory_space<vmem>>, vector<1x1x1x128xf32>
    %100 = vector.shape_cast %99 : vector<1x1x1x128xf32> to vector<1x128xf32>
    %101 = vector.broadcast %100 : vector<1x128xf32> to vector<16x128xf32>
    %102 = arith.addf %98, %101 : vector<16x128xf32>
    %c0_47 = arith.constant 0 : index
    %c2_48 = arith.constant 2 : index
    %c0_49 = arith.constant 0 : index
    %c0_50 = arith.constant 0 : index
    %103 = vector.load %arg3[%c0_47, %c2_48, %c0_49, %c0_50] : memref<2x8x128x128xf32, #tpu.memory_space<vmem>>, vector<1x1x128x128xf32>
    %104 = vector.shape_cast %103 : vector<1x1x128x128xf32> to vector<128x128xf32>
    %cst_51 = arith.constant dense<0.000000e+00> : vector<16x128xf32>
    %105 = tpu.matmul %95, %104, %cst_51 {dimension_numbers = #tpu.dot_dimension_numbers<[1], [0], [0], [1], [0, 0, 1, 1], [], []>} : vector<16x128xf32>, vector<128x128xf32>, vector<16x128xf32> -> vector<16x128xf32>
    %c0_52 = arith.constant 0 : index
    %c4 = arith.constant 4 : index
    %c0_53 = arith.constant 0 : index
    %c0_54 = arith.constant 0 : index
    %106 = vector.load %arg4[%c0_52, %c4, %c0_53, %c0_54] : memref<2x18x1x128xf32, #tpu.memory_space<vmem>>, vector<1x1x1x128xf32>
    %107 = vector.shape_cast %106 : vector<1x1x1x128xf32> to vector<1x128xf32>
    %108 = vector.broadcast %107 : vector<1x128xf32> to vector<16x128xf32>
    %109 = arith.addf %105, %108 : vector<16x128xf32>
    %c0_55 = arith.constant 0 : index
    %c3_56 = arith.constant 3 : index
    %c0_57 = arith.constant 0 : index
    %c0_58 = arith.constant 0 : index
    %110 = vector.load %arg3[%c0_55, %c3_56, %c0_57, %c0_58] : memref<2x8x128x128xf32, #tpu.memory_space<vmem>>, vector<1x1x128x128xf32>
    %111 = vector.shape_cast %110 : vector<1x1x128x128xf32> to vector<128x128xf32>
    %cst_59 = arith.constant dense<0.000000e+00> : vector<16x128xf32>
    %112 = tpu.matmul %95, %111, %cst_59 {dimension_numbers = #tpu.dot_dimension_numbers<[1], [0], [0], [1], [0, 0, 1, 1], [], []>} : vector<16x128xf32>, vector<128x128xf32>, vector<16x128xf32> -> vector<16x128xf32>
    %c0_60 = arith.constant 0 : index
    %c5 = arith.constant 5 : index
    %c0_61 = arith.constant 0 : index
    %c0_62 = arith.constant 0 : index
    %113 = vector.load %arg4[%c0_60, %c5, %c0_61, %c0_62] : memref<2x18x1x128xf32, #tpu.memory_space<vmem>>, vector<1x1x1x128xf32>
    %114 = vector.shape_cast %113 : vector<1x1x1x128xf32> to vector<1x128xf32>
    %115 = vector.broadcast %114 : vector<1x128xf32> to vector<16x128xf32>
    %116 = arith.addf %112, %115 : vector<16x128xf32>
    %cst_63 = arith.constant 0.111803398 : f32
    %117 = vector.broadcast %cst_63 : f32 to vector<16x128xf32>
    %118 = arith.mulf %102, %117 : vector<16x128xf32>
    "tpu.trace_start"() <{level = 10 : i32, message = "ae,be->ab"}> : () -> ()
    %cst_64 = arith.constant dense<0.000000e+00> : vector<16x16xf32>
    %119 = tpu.matmul %118, %109, %cst_64 {dimension_numbers = #tpu.dot_dimension_numbers<[1], [1], [0], [0], [0, 0, 1, 0], [], []>} : vector<16x128xf32>, vector<16x128xf32>, vector<16x16xf32> -> vector<16x16xf32>
    %cst_65 = arith.constant -1.000000e+30 : f32
    "tpu.trace_stop"() : () -> ()
    %120 = vector.broadcast %cst_65 : f32 to vector<16x16xf32>
    %121 = arith.select %13, %119, %120 : vector<16x16xi1>, vector<16x16xf32>
    %cst_66 = arith.constant dense<0xFF800000> : vector<16xf32>
    %122 = vector.multi_reduction <maximumf>, %121, %cst_66 [1] : vector<16x16xf32> to vector<16xf32>
    %123 = vector.shape_cast %122 : vector<16xf32> to vector<16x1xf32>
    %124 = vector.broadcast %123 : vector<16x1xf32> to vector<16x16xf32>
    %125 = arith.subf %121, %124 : vector<16x16xf32>
    %126 = math.exp %125 : vector<16x16xf32>
    %cst_67 = arith.constant dense<0.000000e+00> : vector<16xf32>
    %127 = vector.multi_reduction <add>, %126, %cst_67 [1] : vector<16x16xf32> to vector<16xf32>
    %128 = vector.shape_cast %127 : vector<16xf32> to vector<16x1xf32>
    %129 = tpu.reciprocal %128 {approx = true} : vector<16x1xf32> -> vector<16x1xf32>
    %130 = vector.broadcast %129 : vector<16x1xf32> to vector<16x16xf32>
    %131 = arith.mulf %126, %130 : vector<16x16xf32>
    %cst_68 = arith.constant dense<0.000000e+00> : vector<16x128xf32>
    %132 = tpu.matmul %131, %116, %cst_68 {dimension_numbers = #tpu.dot_dimension_numbers<[1], [0], [0], [1], [0, 0, 1, 1], [], []>} : vector<16x16xf32>, vector<16x128xf32>, vector<16x128xf32> -> vector<16x128xf32>
    %c0_69 = arith.constant 0 : index
    %c4_70 = arith.constant 4 : index
    %c0_71 = arith.constant 0 : index
    %c0_72 = arith.constant 0 : index
    %133 = vector.load %arg3[%c0_69, %c4_70, %c0_71, %c0_72] : memref<2x8x128x128xf32, #tpu.memory_space<vmem>>, vector<1x1x128x128xf32>
    %134 = vector.shape_cast %133 : vector<1x1x128x128xf32> to vector<128x128xf32>
    %cst_73 = arith.constant dense<0.000000e+00> : vector<16x128xf32>
    %135 = tpu.matmul %132, %134, %cst_73 {dimension_numbers = #tpu.dot_dimension_numbers<[1], [0], [0], [1], [0, 0, 1, 1], [], []>} : vector<16x128xf32>, vector<128x128xf32>, vector<16x128xf32> -> vector<16x128xf32>
    %136 = arith.addf %67, %135 : vector<16x128xf32>
    %c0_74 = arith.constant 0 : index
    %c6 = arith.constant 6 : index
    %c0_75 = arith.constant 0 : index
    %c0_76 = arith.constant 0 : index
    %137 = vector.load %arg4[%c0_74, %c6, %c0_75, %c0_76] : memref<2x18x1x128xf32, #tpu.memory_space<vmem>>, vector<1x1x1x128xf32>
    %138 = vector.shape_cast %137 : vector<1x1x1x128xf32> to vector<1x128xf32>
    %139 = vector.broadcast %138 : vector<1x128xf32> to vector<16x128xf32>
    %140 = arith.addf %136, %139 : vector<16x128xf32>
    %c0_77 = arith.constant 0 : index
    %c7 = arith.constant 7 : index
    %c0_78 = arith.constant 0 : index
    %c0_79 = arith.constant 0 : index
    %141 = vector.load %arg4[%c0_77, %c7, %c0_78, %c0_79] : memref<2x18x1x128xf32, #tpu.memory_space<vmem>>, vector<1x1x1x128xf32>
    %142 = vector.shape_cast %141 : vector<1x1x1x128xf32> to vector<1x128xf32>
    %c0_80 = arith.constant 0 : index
    %c8 = arith.constant 8 : index
    %c0_81 = arith.constant 0 : index
    %c0_82 = arith.constant 0 : index
    %143 = vector.load %arg4[%c0_80, %c8, %c0_81, %c0_82] : memref<2x18x1x128xf32, #tpu.memory_space<vmem>>, vector<1x1x1x128xf32>
    %144 = vector.shape_cast %143 : vector<1x1x1x128xf32> to vector<1x128xf32>
    %cst_83 = arith.constant dense<0.000000e+00> : vector<16xf32>
    %145 = vector.multi_reduction <add>, %140, %cst_83 [1] : vector<16x128xf32> to vector<16xf32>
    %146 = vector.shape_cast %145 : vector<16xf32> to vector<16x1xf32>
    %cst_84 = arith.constant 1.250000e-02 : f32
    %147 = vector.broadcast %cst_84 : f32 to vector<16x1xf32>
    %148 = arith.mulf %146, %147 : vector<16x1xf32>
    %149 = vector.broadcast %148 : vector<16x1xf32> to vector<16x128xf32>
    %150 = arith.subf %140, %149 : vector<16x128xf32>
    %151 = arith.mulf %150, %150 : vector<16x128xf32>
    %cst_85 = arith.constant 0.000000e+00 : f32
    %152 = vector.shape_cast %2 : vector<1x128xi1> to vector<1x128xi1>
    %153 = vector.broadcast %152 : vector<1x128xi1> to vector<16x128xi1>
    %154 = vector.broadcast %cst_85 : f32 to vector<16x128xf32>
    %155 = arith.select %153, %151, %154 : vector<16x128xi1>, vector<16x128xf32>
    %cst_86 = arith.constant dense<0.000000e+00> : vector<16xf32>
    %156 = vector.multi_reduction <add>, %155, %cst_86 [1] : vector<16x128xf32> to vector<16xf32>
    %157 = vector.shape_cast %156 : vector<16xf32> to vector<16x1xf32>
    %cst_87 = arith.constant 1.250000e-02 : f32
    %158 = vector.broadcast %cst_87 : f32 to vector<16x1xf32>
    %159 = arith.mulf %157, %158 : vector<16x1xf32>
    %cst_88 = arith.constant 9.99999974E-6 : f32
    %160 = vector.broadcast %cst_88 : f32 to vector<16x1xf32>
    %161 = arith.addf %159, %160 : vector<16x1xf32>
    %162 = math.rsqrt %161 : vector<16x1xf32>
    %163 = vector.broadcast %162 : vector<16x1xf32> to vector<16x128xf32>
    %164 = arith.mulf %150, %163 : vector<16x128xf32>
    %165 = vector.broadcast %142 : vector<1x128xf32> to vector<16x128xf32>
    %166 = arith.mulf %164, %165 : vector<16x128xf32>
    %167 = vector.broadcast %144 : vector<1x128xf32> to vector<16x128xf32>
    %168 = arith.addf %166, %167 : vector<16x128xf32>
    %c0_89 = arith.constant 0 : index
    %c5_90 = arith.constant 5 : index
    %c0_91 = arith.constant 0 : index
    %c0_92 = arith.constant 0 : index
    %169 = vector.load %arg3[%c0_89, %c5_90, %c0_91, %c0_92] : memref<2x8x128x128xf32, #tpu.memory_space<vmem>>, vector<1x1x128x128xf32>
    %170 = vector.shape_cast %169 : vector<1x1x128x128xf32> to vector<128x128xf32>
    %cst_93 = arith.constant dense<0.000000e+00> : vector<16x128xf32>
    %171 = tpu.matmul %168, %170, %cst_93 {dimension_numbers = #tpu.dot_dimension_numbers<[1], [0], [0], [1], [0, 0, 1, 1], [], []>} : vector<16x128xf32>, vector<128x128xf32>, vector<16x128xf32> -> vector<16x128xf32>
    %c0_94 = arith.constant 0 : index
    %c9 = arith.constant 9 : index
    %c0_95 = arith.constant 0 : index
    %c0_96 = arith.constant 0 : index
    %172 = vector.load %arg4[%c0_94, %c9, %c0_95, %c0_96] : memref<2x18x1x128xf32, #tpu.memory_space<vmem>>, vector<1x1x1x128xf32>
    %173 = vector.shape_cast %172 : vector<1x1x1x128xf32> to vector<1x128xf32>
    %174 = vector.broadcast %173 : vector<1x128xf32> to vector<16x128xf32>
    %175 = arith.addf %171, %174 : vector<16x128xf32>
    %c0_97 = arith.constant 0 : index
    %c6_98 = arith.constant 6 : index
    %c0_99 = arith.constant 0 : index
    %c0_100 = arith.constant 0 : index
    %176 = vector.load %arg3[%c0_97, %c6_98, %c0_99, %c0_100] : memref<2x8x128x128xf32, #tpu.memory_space<vmem>>, vector<1x1x128x128xf32>
    %177 = vector.shape_cast %176 : vector<1x1x128x128xf32> to vector<128x128xf32>
    %cst_101 = arith.constant dense<0.000000e+00> : vector<16x128xf32>
    %178 = tpu.matmul %168, %177, %cst_101 {dimension_numbers = #tpu.dot_dimension_numbers<[1], [0], [0], [1], [0, 0, 1, 1], [], []>} : vector<16x128xf32>, vector<128x128xf32>, vector<16x128xf32> -> vector<16x128xf32>
    %c0_102 = arith.constant 0 : index
    %c10 = arith.constant 10 : index
    %c0_103 = arith.constant 0 : index
    %c0_104 = arith.constant 0 : index
    %179 = vector.load %arg4[%c0_102, %c10, %c0_103, %c0_104] : memref<2x18x1x128xf32, #tpu.memory_space<vmem>>, vector<1x1x1x128xf32>
    %180 = vector.shape_cast %179 : vector<1x1x1x128xf32> to vector<1x128xf32>
    %181 = vector.broadcast %180 : vector<1x128xf32> to vector<16x128xf32>
    %182 = arith.addf %178, %181 : vector<16x128xf32>
    %183 = arith.negf %182 : vector<16x128xf32>
    %184 = math.exp %183 : vector<16x128xf32>
    %cst_105 = arith.constant 1.000000e+00 : f32
    %185 = vector.broadcast %cst_105 : f32 to vector<16x128xf32>
    %186 = arith.addf %185, %184 : vector<16x128xf32>
    %187 = arith.divf %185, %186 : vector<16x128xf32>
    %188 = arith.mulf %175, %187 : vector<16x128xf32>
    %cst_106 = arith.constant dense<0.000000e+00> : vector<16x128xf32>
    %189 = tpu.matmul %32, %188, %cst_106 {dimension_numbers = #tpu.dot_dimension_numbers<[1], [0], [0], [1], [0, 0, 1, 1], [], []>} : vector<16x16xf32>, vector<16x128xf32>, vector<16x128xf32> -> vector<16x128xf32>
    %cst_107 = arith.constant dense<0.000000e+00> : vector<16x128xf32>
    %190 = tpu.matmul %40, %188, %cst_107 {dimension_numbers = #tpu.dot_dimension_numbers<[1], [0], [0], [1], [0, 0, 1, 1], [], []>} : vector<16x16xf32>, vector<16x128xf32>, vector<16x128xf32> -> vector<16x128xf32>
    %c0_108 = arith.constant 0 : index
    %c11 = arith.constant 11 : index
    %c0_109 = arith.constant 0 : index
    %c0_110 = arith.constant 0 : index
    %191 = vector.load %arg4[%c0_108, %c11, %c0_109, %c0_110] : memref<2x18x1x128xf32, #tpu.memory_space<vmem>>, vector<1x1x1x128xf32>
    %192 = vector.shape_cast %191 : vector<1x1x1x128xf32> to vector<1x128xf32>
    %193 = vector.broadcast %192 : vector<1x128xf32> to vector<16x128xf32>
    %194 = arith.mulf %189, %193 : vector<16x128xf32>
    %c0_111 = arith.constant 0 : index
    %c12 = arith.constant 12 : index
    %c0_112 = arith.constant 0 : index
    %c0_113 = arith.constant 0 : index
    %195 = vector.load %arg4[%c0_111, %c12, %c0_112, %c0_113] : memref<2x18x1x128xf32, #tpu.memory_space<vmem>>, vector<1x1x1x128xf32>
    %196 = vector.shape_cast %195 : vector<1x1x1x128xf32> to vector<1x128xf32>
    %197 = vector.broadcast %196 : vector<1x128xf32> to vector<16x128xf32>
    %198 = arith.mulf %188, %197 : vector<16x128xf32>
    %199 = arith.addf %194, %198 : vector<16x128xf32>
    %c0_114 = arith.constant 0 : index
    %c13 = arith.constant 13 : index
    %c0_115 = arith.constant 0 : index
    %c0_116 = arith.constant 0 : index
    %200 = vector.load %arg4[%c0_114, %c13, %c0_115, %c0_116] : memref<2x18x1x128xf32, #tpu.memory_space<vmem>>, vector<1x1x1x128xf32>
    %201 = vector.shape_cast %200 : vector<1x1x1x128xf32> to vector<1x128xf32>
    %202 = vector.broadcast %201 : vector<1x128xf32> to vector<16x128xf32>
    %203 = arith.mulf %190, %202 : vector<16x128xf32>
    %204 = arith.addf %199, %203 : vector<16x128xf32>
    %c0_117 = arith.constant 0 : index
    %c14 = arith.constant 14 : index
    %c0_118 = arith.constant 0 : index
    %c0_119 = arith.constant 0 : index
    %205 = vector.load %arg4[%c0_117, %c14, %c0_118, %c0_119] : memref<2x18x1x128xf32, #tpu.memory_space<vmem>>, vector<1x1x1x128xf32>
    %206 = vector.shape_cast %205 : vector<1x1x1x128xf32> to vector<1x128xf32>
    %207 = vector.broadcast %206 : vector<1x128xf32> to vector<16x128xf32>
    %208 = arith.addf %204, %207 : vector<16x128xf32>
    %209 = arith.negf %208 : vector<16x128xf32>
    %210 = math.exp %209 : vector<16x128xf32>
    %cst_120 = arith.constant 1.000000e+00 : f32
    %211 = vector.broadcast %cst_120 : f32 to vector<16x128xf32>
    %212 = arith.addf %211, %210 : vector<16x128xf32>
    %213 = arith.divf %211, %212 : vector<16x128xf32>
    %214 = arith.mulf %208, %213 : vector<16x128xf32>
    %c0_121 = arith.constant 0 : index
    %c7_122 = arith.constant 7 : index
    %c0_123 = arith.constant 0 : index
    %c0_124 = arith.constant 0 : index
    %215 = vector.load %arg3[%c0_121, %c7_122, %c0_123, %c0_124] : memref<2x8x128x128xf32, #tpu.memory_space<vmem>>, vector<1x1x128x128xf32>
    %216 = vector.shape_cast %215 : vector<1x1x128x128xf32> to vector<128x128xf32>
    %cst_125 = arith.constant dense<0.000000e+00> : vector<16x128xf32>
    %217 = tpu.matmul %214, %216, %cst_125 {dimension_numbers = #tpu.dot_dimension_numbers<[1], [0], [0], [1], [0, 0, 1, 1], [], []>} : vector<16x128xf32>, vector<128x128xf32>, vector<16x128xf32> -> vector<16x128xf32>
    %218 = arith.addf %140, %217 : vector<16x128xf32>
    %c0_126 = arith.constant 0 : index
    %c15 = arith.constant 15 : index
    %c0_127 = arith.constant 0 : index
    %c0_128 = arith.constant 0 : index
    %219 = vector.load %arg4[%c0_126, %c15, %c0_127, %c0_128] : memref<2x18x1x128xf32, #tpu.memory_space<vmem>>, vector<1x1x1x128xf32>
    %220 = vector.shape_cast %219 : vector<1x1x1x128xf32> to vector<1x128xf32>
    %221 = vector.broadcast %220 : vector<1x128xf32> to vector<16x128xf32>
    %222 = arith.addf %218, %221 : vector<16x128xf32>
    %c0_129 = arith.constant 0 : index
    %c0_130 = arith.constant 0 : index
    %c0_131 = arith.constant 0 : index
    %c0_132 = arith.constant 0 : index
    %223 = vector.load %arg3[%c0_129, %c0_130, %c0_131, %c0_132] : memref<2x8x128x128xf32, #tpu.memory_space<vmem>>, vector<1x1x128x128xf32>
    %224 = vector.shape_cast %223 : vector<1x1x128x128xf32> to vector<128x128xf32>
    %cst_133 = arith.constant dense<0.000000e+00> : vector<16x128xf32>
    %225 = tpu.matmul %222, %224, %cst_133 {dimension_numbers = #tpu.dot_dimension_numbers<[1], [0], [0], [1], [0, 0, 1, 1], [], []>} : vector<16x128xf32>, vector<128x128xf32>, vector<16x128xf32> -> vector<16x128xf32>
    %c0_134 = arith.constant 0 : index
    %c0_135 = arith.constant 0 : index
    %c0_136 = arith.constant 0 : index
    %c0_137 = arith.constant 0 : index
    %226 = vector.load %arg4[%c0_134, %c0_135, %c0_136, %c0_137] : memref<2x18x1x128xf32, #tpu.memory_space<vmem>>, vector<1x1x1x128xf32>
    %227 = vector.shape_cast %226 : vector<1x1x1x128xf32> to vector<1x128xf32>
    %228 = vector.broadcast %227 : vector<1x128xf32> to vector<16x128xf32>
    %229 = arith.addf %225, %228 : vector<16x128xf32>
    %c0_138 = arith.constant 0 : index
    %c16 = arith.constant 16 : index
    %c0_139 = arith.constant 0 : index
    %c0_140 = arith.constant 0 : index
    %230 = vector.load %arg4[%c0_138, %c16, %c0_139, %c0_140] : memref<2x18x1x128xf32, #tpu.memory_space<vmem>>, vector<1x1x1x128xf32>
    %231 = vector.shape_cast %230 : vector<1x1x1x128xf32> to vector<1x128xf32>
    %c0_141 = arith.constant 0 : index
    %c17 = arith.constant 17 : index
    %c0_142 = arith.constant 0 : index
    %c0_143 = arith.constant 0 : index
    %232 = vector.load %arg4[%c0_141, %c17, %c0_142, %c0_143] : memref<2x18x1x128xf32, #tpu.memory_space<vmem>>, vector<1x1x1x128xf32>
    %233 = vector.shape_cast %232 : vector<1x1x1x128xf32> to vector<1x128xf32>
    %cst_144 = arith.constant dense<0.000000e+00> : vector<16xf32>
    %234 = vector.multi_reduction <add>, %229, %cst_144 [1] : vector<16x128xf32> to vector<16xf32>
    %235 = vector.shape_cast %234 : vector<16xf32> to vector<16x1xf32>
    %cst_145 = arith.constant 1.250000e-02 : f32
    %236 = vector.broadcast %cst_145 : f32 to vector<16x1xf32>
    %237 = arith.mulf %235, %236 : vector<16x1xf32>
    %238 = vector.broadcast %237 : vector<16x1xf32> to vector<16x128xf32>
    %239 = arith.subf %229, %238 : vector<16x128xf32>
    %240 = arith.mulf %239, %239 : vector<16x128xf32>
    %cst_146 = arith.constant 0.000000e+00 : f32
    %241 = vector.shape_cast %2 : vector<1x128xi1> to vector<1x128xi1>
    %242 = vector.broadcast %241 : vector<1x128xi1> to vector<16x128xi1>
    %243 = vector.broadcast %cst_146 : f32 to vector<16x128xf32>
    %244 = arith.select %242, %240, %243 : vector<16x128xi1>, vector<16x128xf32>
    %cst_147 = arith.constant dense<0.000000e+00> : vector<16xf32>
    %245 = vector.multi_reduction <add>, %244, %cst_147 [1] : vector<16x128xf32> to vector<16xf32>
    %246 = vector.shape_cast %245 : vector<16xf32> to vector<16x1xf32>
    %cst_148 = arith.constant 1.250000e-02 : f32
    %247 = vector.broadcast %cst_148 : f32 to vector<16x1xf32>
    %248 = arith.mulf %246, %247 : vector<16x1xf32>
    %cst_149 = arith.constant 9.99999974E-6 : f32
    %249 = vector.broadcast %cst_149 : f32 to vector<16x1xf32>
    %250 = arith.addf %248, %249 : vector<16x1xf32>
    %251 = math.rsqrt %250 : vector<16x1xf32>
    %252 = vector.broadcast %251 : vector<16x1xf32> to vector<16x128xf32>
    %253 = arith.mulf %239, %252 : vector<16x128xf32>
    %254 = vector.broadcast %231 : vector<1x128xf32> to vector<16x128xf32>
    %255 = arith.mulf %253, %254 : vector<16x128xf32>
    %256 = vector.broadcast %233 : vector<1x128xf32> to vector<16x128xf32>
    %257 = arith.addf %255, %256 : vector<16x128xf32>
    %c1_150 = arith.constant 1 : index
    %c0_151 = arith.constant 0 : index
    %c0_152 = arith.constant 0 : index
    %c0_153 = arith.constant 0 : index
    %258 = vector.load %arg3[%c1_150, %c0_151, %c0_152, %c0_153] : memref<2x8x128x128xf32, #tpu.memory_space<vmem>>, vector<1x1x128x128xf32>
    %259 = vector.shape_cast %258 : vector<1x1x128x128xf32> to vector<128x128xf32>
    %cst_154 = arith.constant dense<0.000000e+00> : vector<16x128xf32>
    %260 = tpu.matmul %257, %259, %cst_154 {dimension_numbers = #tpu.dot_dimension_numbers<[1], [0], [0], [1], [0, 0, 1, 1], [], []>} : vector<16x128xf32>, vector<128x128xf32>, vector<16x128xf32> -> vector<16x128xf32>
    %c1_155 = arith.constant 1 : index
    %c0_156 = arith.constant 0 : index
    %c0_157 = arith.constant 0 : index
    %c0_158 = arith.constant 0 : index
    %261 = vector.load %arg4[%c1_155, %c0_156, %c0_157, %c0_158] : memref<2x18x1x128xf32, #tpu.memory_space<vmem>>, vector<1x1x1x128xf32>
    %262 = vector.shape_cast %261 : vector<1x1x1x128xf32> to vector<1x128xf32>
    %263 = vector.broadcast %262 : vector<1x128xf32> to vector<16x128xf32>
    %264 = arith.addf %260, %263 : vector<16x128xf32>
    %c1_159 = arith.constant 1 : index
    %c1_160 = arith.constant 1 : index
    %c0_161 = arith.constant 0 : index
    %c0_162 = arith.constant 0 : index
    %265 = vector.load %arg4[%c1_159, %c1_160, %c0_161, %c0_162] : memref<2x18x1x128xf32, #tpu.memory_space<vmem>>, vector<1x1x1x128xf32>
    %266 = vector.shape_cast %265 : vector<1x1x1x128xf32> to vector<1x128xf32>
    %c1_163 = arith.constant 1 : index
    %c2_164 = arith.constant 2 : index
    %c0_165 = arith.constant 0 : index
    %c0_166 = arith.constant 0 : index
    %267 = vector.load %arg4[%c1_163, %c2_164, %c0_165, %c0_166] : memref<2x18x1x128xf32, #tpu.memory_space<vmem>>, vector<1x1x1x128xf32>
    %268 = vector.shape_cast %267 : vector<1x1x1x128xf32> to vector<1x128xf32>
    %cst_167 = arith.constant dense<0.000000e+00> : vector<16xf32>
    %269 = vector.multi_reduction <add>, %264, %cst_167 [1] : vector<16x128xf32> to vector<16xf32>
    %270 = vector.shape_cast %269 : vector<16xf32> to vector<16x1xf32>
    %cst_168 = arith.constant 1.250000e-02 : f32
    %271 = vector.broadcast %cst_168 : f32 to vector<16x1xf32>
    %272 = arith.mulf %270, %271 : vector<16x1xf32>
    %273 = vector.broadcast %272 : vector<16x1xf32> to vector<16x128xf32>
    %274 = arith.subf %264, %273 : vector<16x128xf32>
    %275 = arith.mulf %274, %274 : vector<16x128xf32>
    %cst_169 = arith.constant 0.000000e+00 : f32
    %276 = vector.shape_cast %2 : vector<1x128xi1> to vector<1x128xi1>
    %277 = vector.broadcast %276 : vector<1x128xi1> to vector<16x128xi1>
    %278 = vector.broadcast %cst_169 : f32 to vector<16x128xf32>
    %279 = arith.select %277, %275, %278 : vector<16x128xi1>, vector<16x128xf32>
    %cst_170 = arith.constant dense<0.000000e+00> : vector<16xf32>
    %280 = vector.multi_reduction <add>, %279, %cst_170 [1] : vector<16x128xf32> to vector<16xf32>
    %281 = vector.shape_cast %280 : vector<16xf32> to vector<16x1xf32>
    %cst_171 = arith.constant 1.250000e-02 : f32
    %282 = vector.broadcast %cst_171 : f32 to vector<16x1xf32>
    %283 = arith.mulf %281, %282 : vector<16x1xf32>
    %cst_172 = arith.constant 9.99999974E-6 : f32
    %284 = vector.broadcast %cst_172 : f32 to vector<16x1xf32>
    %285 = arith.addf %283, %284 : vector<16x1xf32>
    %286 = math.rsqrt %285 : vector<16x1xf32>
    %287 = vector.broadcast %286 : vector<16x1xf32> to vector<16x128xf32>
    %288 = arith.mulf %274, %287 : vector<16x128xf32>
    %289 = vector.broadcast %266 : vector<1x128xf32> to vector<16x128xf32>
    %290 = arith.mulf %288, %289 : vector<16x128xf32>
    %291 = vector.broadcast %268 : vector<1x128xf32> to vector<16x128xf32>
    %292 = arith.addf %290, %291 : vector<16x128xf32>
    %c1_173 = arith.constant 1 : index
    %c1_174 = arith.constant 1 : index
    %c0_175 = arith.constant 0 : index
    %c0_176 = arith.constant 0 : index
    %293 = vector.load %arg3[%c1_173, %c1_174, %c0_175, %c0_176] : memref<2x8x128x128xf32, #tpu.memory_space<vmem>>, vector<1x1x128x128xf32>
    %294 = vector.shape_cast %293 : vector<1x1x128x128xf32> to vector<128x128xf32>
    %cst_177 = arith.constant dense<0.000000e+00> : vector<16x128xf32>
    %295 = tpu.matmul %292, %294, %cst_177 {dimension_numbers = #tpu.dot_dimension_numbers<[1], [0], [0], [1], [0, 0, 1, 1], [], []>} : vector<16x128xf32>, vector<128x128xf32>, vector<16x128xf32> -> vector<16x128xf32>
    %c1_178 = arith.constant 1 : index
    %c3_179 = arith.constant 3 : index
    %c0_180 = arith.constant 0 : index
    %c0_181 = arith.constant 0 : index
    %296 = vector.load %arg4[%c1_178, %c3_179, %c0_180, %c0_181] : memref<2x18x1x128xf32, #tpu.memory_space<vmem>>, vector<1x1x1x128xf32>
    %297 = vector.shape_cast %296 : vector<1x1x1x128xf32> to vector<1x128xf32>
    %298 = vector.broadcast %297 : vector<1x128xf32> to vector<16x128xf32>
    %299 = arith.addf %295, %298 : vector<16x128xf32>
    %c1_182 = arith.constant 1 : index
    %c2_183 = arith.constant 2 : index
    %c0_184 = arith.constant 0 : index
    %c0_185 = arith.constant 0 : index
    %300 = vector.load %arg3[%c1_182, %c2_183, %c0_184, %c0_185] : memref<2x8x128x128xf32, #tpu.memory_space<vmem>>, vector<1x1x128x128xf32>
    %301 = vector.shape_cast %300 : vector<1x1x128x128xf32> to vector<128x128xf32>
    %cst_186 = arith.constant dense<0.000000e+00> : vector<16x128xf32>
    %302 = tpu.matmul %292, %301, %cst_186 {dimension_numbers = #tpu.dot_dimension_numbers<[1], [0], [0], [1], [0, 0, 1, 1], [], []>} : vector<16x128xf32>, vector<128x128xf32>, vector<16x128xf32> -> vector<16x128xf32>
    %c1_187 = arith.constant 1 : index
    %c4_188 = arith.constant 4 : index
    %c0_189 = arith.constant 0 : index
    %c0_190 = arith.constant 0 : index
    %303 = vector.load %arg4[%c1_187, %c4_188, %c0_189, %c0_190] : memref<2x18x1x128xf32, #tpu.memory_space<vmem>>, vector<1x1x1x128xf32>
    %304 = vector.shape_cast %303 : vector<1x1x1x128xf32> to vector<1x128xf32>
    %305 = vector.broadcast %304 : vector<1x128xf32> to vector<16x128xf32>
    %306 = arith.addf %302, %305 : vector<16x128xf32>
    %c1_191 = arith.constant 1 : index
    %c3_192 = arith.constant 3 : index
    %c0_193 = arith.constant 0 : index
    %c0_194 = arith.constant 0 : index
    %307 = vector.load %arg3[%c1_191, %c3_192, %c0_193, %c0_194] : memref<2x8x128x128xf32, #tpu.memory_space<vmem>>, vector<1x1x128x128xf32>
    %308 = vector.shape_cast %307 : vector<1x1x128x128xf32> to vector<128x128xf32>
    %cst_195 = arith.constant dense<0.000000e+00> : vector<16x128xf32>
    %309 = tpu.matmul %292, %308, %cst_195 {dimension_numbers = #tpu.dot_dimension_numbers<[1], [0], [0], [1], [0, 0, 1, 1], [], []>} : vector<16x128xf32>, vector<128x128xf32>, vector<16x128xf32> -> vector<16x128xf32>
    %c1_196 = arith.constant 1 : index
    %c5_197 = arith.constant 5 : index
    %c0_198 = arith.constant 0 : index
    %c0_199 = arith.constant 0 : index
    %310 = vector.load %arg4[%c1_196, %c5_197, %c0_198, %c0_199] : memref<2x18x1x128xf32, #tpu.memory_space<vmem>>, vector<1x1x1x128xf32>
    %311 = vector.shape_cast %310 : vector<1x1x1x128xf32> to vector<1x128xf32>
    %312 = vector.broadcast %311 : vector<1x128xf32> to vector<16x128xf32>
    %313 = arith.addf %309, %312 : vector<16x128xf32>
    %cst_200 = arith.constant 0.111803398 : f32
    %314 = vector.broadcast %cst_200 : f32 to vector<16x128xf32>
    %315 = arith.mulf %299, %314 : vector<16x128xf32>
    "tpu.trace_start"() <{level = 10 : i32, message = "ae,be->ab"}> : () -> ()
    %cst_201 = arith.constant dense<0.000000e+00> : vector<16x16xf32>
    %316 = tpu.matmul %315, %306, %cst_201 {dimension_numbers = #tpu.dot_dimension_numbers<[1], [1], [0], [0], [0, 0, 1, 0], [], []>} : vector<16x128xf32>, vector<16x128xf32>, vector<16x16xf32> -> vector<16x16xf32>
    %cst_202 = arith.constant -1.000000e+30 : f32
    "tpu.trace_stop"() : () -> ()
    %317 = vector.broadcast %cst_202 : f32 to vector<16x16xf32>
    %318 = arith.select %13, %316, %317 : vector<16x16xi1>, vector<16x16xf32>
    %cst_203 = arith.constant dense<0xFF800000> : vector<16xf32>
    %319 = vector.multi_reduction <maximumf>, %318, %cst_203 [1] : vector<16x16xf32> to vector<16xf32>
    %320 = vector.shape_cast %319 : vector<16xf32> to vector<16x1xf32>
    %321 = vector.broadcast %320 : vector<16x1xf32> to vector<16x16xf32>
    %322 = arith.subf %318, %321 : vector<16x16xf32>
    %323 = math.exp %322 : vector<16x16xf32>
    %cst_204 = arith.constant dense<0.000000e+00> : vector<16xf32>
    %324 = vector.multi_reduction <add>, %323, %cst_204 [1] : vector<16x16xf32> to vector<16xf32>
    %325 = vector.shape_cast %324 : vector<16xf32> to vector<16x1xf32>
    %326 = tpu.reciprocal %325 {approx = true} : vector<16x1xf32> -> vector<16x1xf32>
    %327 = vector.broadcast %326 : vector<16x1xf32> to vector<16x16xf32>
    %328 = arith.mulf %323, %327 : vector<16x16xf32>
    %cst_205 = arith.constant dense<0.000000e+00> : vector<16x128xf32>
    %329 = tpu.matmul %328, %313, %cst_205 {dimension_numbers = #tpu.dot_dimension_numbers<[1], [0], [0], [1], [0, 0, 1, 1], [], []>} : vector<16x16xf32>, vector<16x128xf32>, vector<16x128xf32> -> vector<16x128xf32>
    %c1_206 = arith.constant 1 : index
    %c4_207 = arith.constant 4 : index
    %c0_208 = arith.constant 0 : index
    %c0_209 = arith.constant 0 : index
    %330 = vector.load %arg3[%c1_206, %c4_207, %c0_208, %c0_209] : memref<2x8x128x128xf32, #tpu.memory_space<vmem>>, vector<1x1x128x128xf32>
    %331 = vector.shape_cast %330 : vector<1x1x128x128xf32> to vector<128x128xf32>
    %cst_210 = arith.constant dense<0.000000e+00> : vector<16x128xf32>
    %332 = tpu.matmul %329, %331, %cst_210 {dimension_numbers = #tpu.dot_dimension_numbers<[1], [0], [0], [1], [0, 0, 1, 1], [], []>} : vector<16x128xf32>, vector<128x128xf32>, vector<16x128xf32> -> vector<16x128xf32>
    %333 = arith.addf %264, %332 : vector<16x128xf32>
    %c1_211 = arith.constant 1 : index
    %c6_212 = arith.constant 6 : index
    %c0_213 = arith.constant 0 : index
    %c0_214 = arith.constant 0 : index
    %334 = vector.load %arg4[%c1_211, %c6_212, %c0_213, %c0_214] : memref<2x18x1x128xf32, #tpu.memory_space<vmem>>, vector<1x1x1x128xf32>
    %335 = vector.shape_cast %334 : vector<1x1x1x128xf32> to vector<1x128xf32>
    %336 = vector.broadcast %335 : vector<1x128xf32> to vector<16x128xf32>
    %337 = arith.addf %333, %336 : vector<16x128xf32>
    %c1_215 = arith.constant 1 : index
    %c7_216 = arith.constant 7 : index
    %c0_217 = arith.constant 0 : index
    %c0_218 = arith.constant 0 : index
    %338 = vector.load %arg4[%c1_215, %c7_216, %c0_217, %c0_218] : memref<2x18x1x128xf32, #tpu.memory_space<vmem>>, vector<1x1x1x128xf32>
    %339 = vector.shape_cast %338 : vector<1x1x1x128xf32> to vector<1x128xf32>
    %c1_219 = arith.constant 1 : index
    %c8_220 = arith.constant 8 : index
    %c0_221 = arith.constant 0 : index
    %c0_222 = arith.constant 0 : index
    %340 = vector.load %arg4[%c1_219, %c8_220, %c0_221, %c0_222] : memref<2x18x1x128xf32, #tpu.memory_space<vmem>>, vector<1x1x1x128xf32>
    %341 = vector.shape_cast %340 : vector<1x1x1x128xf32> to vector<1x128xf32>
    %cst_223 = arith.constant dense<0.000000e+00> : vector<16xf32>
    %342 = vector.multi_reduction <add>, %337, %cst_223 [1] : vector<16x128xf32> to vector<16xf32>
    %343 = vector.shape_cast %342 : vector<16xf32> to vector<16x1xf32>
    %cst_224 = arith.constant 1.250000e-02 : f32
    %344 = vector.broadcast %cst_224 : f32 to vector<16x1xf32>
    %345 = arith.mulf %343, %344 : vector<16x1xf32>
    %346 = vector.broadcast %345 : vector<16x1xf32> to vector<16x128xf32>
    %347 = arith.subf %337, %346 : vector<16x128xf32>
    %348 = arith.mulf %347, %347 : vector<16x128xf32>
    %cst_225 = arith.constant 0.000000e+00 : f32
    %349 = vector.shape_cast %2 : vector<1x128xi1> to vector<1x128xi1>
    %350 = vector.broadcast %349 : vector<1x128xi1> to vector<16x128xi1>
    %351 = vector.broadcast %cst_225 : f32 to vector<16x128xf32>
    %352 = arith.select %350, %348, %351 : vector<16x128xi1>, vector<16x128xf32>
    %cst_226 = arith.constant dense<0.000000e+00> : vector<16xf32>
    %353 = vector.multi_reduction <add>, %352, %cst_226 [1] : vector<16x128xf32> to vector<16xf32>
    %354 = vector.shape_cast %353 : vector<16xf32> to vector<16x1xf32>
    %cst_227 = arith.constant 1.250000e-02 : f32
    %355 = vector.broadcast %cst_227 : f32 to vector<16x1xf32>
    %356 = arith.mulf %354, %355 : vector<16x1xf32>
    %cst_228 = arith.constant 9.99999974E-6 : f32
    %357 = vector.broadcast %cst_228 : f32 to vector<16x1xf32>
    %358 = arith.addf %356, %357 : vector<16x1xf32>
    %359 = math.rsqrt %358 : vector<16x1xf32>
    %360 = vector.broadcast %359 : vector<16x1xf32> to vector<16x128xf32>
    %361 = arith.mulf %347, %360 : vector<16x128xf32>
    %362 = vector.broadcast %339 : vector<1x128xf32> to vector<16x128xf32>
    %363 = arith.mulf %361, %362 : vector<16x128xf32>
    %364 = vector.broadcast %341 : vector<1x128xf32> to vector<16x128xf32>
    %365 = arith.addf %363, %364 : vector<16x128xf32>
    %c1_229 = arith.constant 1 : index
    %c5_230 = arith.constant 5 : index
    %c0_231 = arith.constant 0 : index
    %c0_232 = arith.constant 0 : index
    %366 = vector.load %arg3[%c1_229, %c5_230, %c0_231, %c0_232] : memref<2x8x128x128xf32, #tpu.memory_space<vmem>>, vector<1x1x128x128xf32>
    %367 = vector.shape_cast %366 : vector<1x1x128x128xf32> to vector<128x128xf32>
    %cst_233 = arith.constant dense<0.000000e+00> : vector<16x128xf32>
    %368 = tpu.matmul %365, %367, %cst_233 {dimension_numbers = #tpu.dot_dimension_numbers<[1], [0], [0], [1], [0, 0, 1, 1], [], []>} : vector<16x128xf32>, vector<128x128xf32>, vector<16x128xf32> -> vector<16x128xf32>
    %c1_234 = arith.constant 1 : index
    %c9_235 = arith.constant 9 : index
    %c0_236 = arith.constant 0 : index
    %c0_237 = arith.constant 0 : index
    %369 = vector.load %arg4[%c1_234, %c9_235, %c0_236, %c0_237] : memref<2x18x1x128xf32, #tpu.memory_space<vmem>>, vector<1x1x1x128xf32>
    %370 = vector.shape_cast %369 : vector<1x1x1x128xf32> to vector<1x128xf32>
    %371 = vector.broadcast %370 : vector<1x128xf32> to vector<16x128xf32>
    %372 = arith.addf %368, %371 : vector<16x128xf32>
    %c1_238 = arith.constant 1 : index
    %c6_239 = arith.constant 6 : index
    %c0_240 = arith.constant 0 : index
    %c0_241 = arith.constant 0 : index
    %373 = vector.load %arg3[%c1_238, %c6_239, %c0_240, %c0_241] : memref<2x8x128x128xf32, #tpu.memory_space<vmem>>, vector<1x1x128x128xf32>
    %374 = vector.shape_cast %373 : vector<1x1x128x128xf32> to vector<128x128xf32>
    %cst_242 = arith.constant dense<0.000000e+00> : vector<16x128xf32>
    %375 = tpu.matmul %365, %374, %cst_242 {dimension_numbers = #tpu.dot_dimension_numbers<[1], [0], [0], [1], [0, 0, 1, 1], [], []>} : vector<16x128xf32>, vector<128x128xf32>, vector<16x128xf32> -> vector<16x128xf32>
    %c1_243 = arith.constant 1 : index
    %c10_244 = arith.constant 10 : index
    %c0_245 = arith.constant 0 : index
    %c0_246 = arith.constant 0 : index
    %376 = vector.load %arg4[%c1_243, %c10_244, %c0_245, %c0_246] : memref<2x18x1x128xf32, #tpu.memory_space<vmem>>, vector<1x1x1x128xf32>
    %377 = vector.shape_cast %376 : vector<1x1x1x128xf32> to vector<1x128xf32>
    %378 = vector.broadcast %377 : vector<1x128xf32> to vector<16x128xf32>
    %379 = arith.addf %375, %378 : vector<16x128xf32>
    %380 = arith.negf %379 : vector<16x128xf32>
    %381 = math.exp %380 : vector<16x128xf32>
    %cst_247 = arith.constant 1.000000e+00 : f32
    %382 = vector.broadcast %cst_247 : f32 to vector<16x128xf32>
    %383 = arith.addf %382, %381 : vector<16x128xf32>
    %384 = arith.divf %382, %383 : vector<16x128xf32>
    %385 = arith.mulf %372, %384 : vector<16x128xf32>
    %cst_248 = arith.constant dense<0.000000e+00> : vector<16x128xf32>
    %386 = tpu.matmul %32, %385, %cst_248 {dimension_numbers = #tpu.dot_dimension_numbers<[1], [0], [0], [1], [0, 0, 1, 1], [], []>} : vector<16x16xf32>, vector<16x128xf32>, vector<16x128xf32> -> vector<16x128xf32>
    %cst_249 = arith.constant dense<0.000000e+00> : vector<16x128xf32>
    %387 = tpu.matmul %40, %385, %cst_249 {dimension_numbers = #tpu.dot_dimension_numbers<[1], [0], [0], [1], [0, 0, 1, 1], [], []>} : vector<16x16xf32>, vector<16x128xf32>, vector<16x128xf32> -> vector<16x128xf32>
    %c1_250 = arith.constant 1 : index
    %c11_251 = arith.constant 11 : index
    %c0_252 = arith.constant 0 : index
    %c0_253 = arith.constant 0 : index
    %388 = vector.load %arg4[%c1_250, %c11_251, %c0_252, %c0_253] : memref<2x18x1x128xf32, #tpu.memory_space<vmem>>, vector<1x1x1x128xf32>
    %389 = vector.shape_cast %388 : vector<1x1x1x128xf32> to vector<1x128xf32>
    %390 = vector.broadcast %389 : vector<1x128xf32> to vector<16x128xf32>
    %391 = arith.mulf %386, %390 : vector<16x128xf32>
    %c1_254 = arith.constant 1 : index
    %c12_255 = arith.constant 12 : index
    %c0_256 = arith.constant 0 : index
    %c0_257 = arith.constant 0 : index
    %392 = vector.load %arg4[%c1_254, %c12_255, %c0_256, %c0_257] : memref<2x18x1x128xf32, #tpu.memory_space<vmem>>, vector<1x1x1x128xf32>
    %393 = vector.shape_cast %392 : vector<1x1x1x128xf32> to vector<1x128xf32>
    %394 = vector.broadcast %393 : vector<1x128xf32> to vector<16x128xf32>
    %395 = arith.mulf %385, %394 : vector<16x128xf32>
    %396 = arith.addf %391, %395 : vector<16x128xf32>
    %c1_258 = arith.constant 1 : index
    %c13_259 = arith.constant 13 : index
    %c0_260 = arith.constant 0 : index
    %c0_261 = arith.constant 0 : index
    %397 = vector.load %arg4[%c1_258, %c13_259, %c0_260, %c0_261] : memref<2x18x1x128xf32, #tpu.memory_space<vmem>>, vector<1x1x1x128xf32>
    %398 = vector.shape_cast %397 : vector<1x1x1x128xf32> to vector<1x128xf32>
    %399 = vector.broadcast %398 : vector<1x128xf32> to vector<16x128xf32>
    %400 = arith.mulf %387, %399 : vector<16x128xf32>
    %401 = arith.addf %396, %400 : vector<16x128xf32>
    %c1_262 = arith.constant 1 : index
    %c14_263 = arith.constant 14 : index
    %c0_264 = arith.constant 0 : index
    %c0_265 = arith.constant 0 : index
    %402 = vector.load %arg4[%c1_262, %c14_263, %c0_264, %c0_265] : memref<2x18x1x128xf32, #tpu.memory_space<vmem>>, vector<1x1x1x128xf32>
    %403 = vector.shape_cast %402 : vector<1x1x1x128xf32> to vector<1x128xf32>
    %404 = vector.broadcast %403 : vector<1x128xf32> to vector<16x128xf32>
    %405 = arith.addf %401, %404 : vector<16x128xf32>
    %406 = arith.negf %405 : vector<16x128xf32>
    %407 = math.exp %406 : vector<16x128xf32>
    %cst_266 = arith.constant 1.000000e+00 : f32
    %408 = vector.broadcast %cst_266 : f32 to vector<16x128xf32>
    %409 = arith.addf %408, %407 : vector<16x128xf32>
    %410 = arith.divf %408, %409 : vector<16x128xf32>
    %411 = arith.mulf %405, %410 : vector<16x128xf32>
    %c1_267 = arith.constant 1 : index
    %c7_268 = arith.constant 7 : index
    %c0_269 = arith.constant 0 : index
    %c0_270 = arith.constant 0 : index
    %412 = vector.load %arg3[%c1_267, %c7_268, %c0_269, %c0_270] : memref<2x8x128x128xf32, #tpu.memory_space<vmem>>, vector<1x1x128x128xf32>
    %413 = vector.shape_cast %412 : vector<1x1x128x128xf32> to vector<128x128xf32>
    %cst_271 = arith.constant dense<0.000000e+00> : vector<16x128xf32>
    %414 = tpu.matmul %411, %413, %cst_271 {dimension_numbers = #tpu.dot_dimension_numbers<[1], [0], [0], [1], [0, 0, 1, 1], [], []>} : vector<16x128xf32>, vector<128x128xf32>, vector<16x128xf32> -> vector<16x128xf32>
    %415 = arith.addf %337, %414 : vector<16x128xf32>
    %c1_272 = arith.constant 1 : index
    %c15_273 = arith.constant 15 : index
    %c0_274 = arith.constant 0 : index
    %c0_275 = arith.constant 0 : index
    %416 = vector.load %arg4[%c1_272, %c15_273, %c0_274, %c0_275] : memref<2x18x1x128xf32, #tpu.memory_space<vmem>>, vector<1x1x1x128xf32>
    %417 = vector.shape_cast %416 : vector<1x1x1x128xf32> to vector<1x128xf32>
    %418 = vector.broadcast %417 : vector<1x128xf32> to vector<16x128xf32>
    %419 = arith.addf %415, %418 : vector<16x128xf32>
    %c1_276 = arith.constant 1 : index
    %c0_277 = arith.constant 0 : index
    %c0_278 = arith.constant 0 : index
    %c0_279 = arith.constant 0 : index
    %420 = vector.load %arg3[%c1_276, %c0_277, %c0_278, %c0_279] : memref<2x8x128x128xf32, #tpu.memory_space<vmem>>, vector<1x1x128x128xf32>
    %421 = vector.shape_cast %420 : vector<1x1x128x128xf32> to vector<128x128xf32>
    %cst_280 = arith.constant dense<0.000000e+00> : vector<16x128xf32>
    %422 = tpu.matmul %419, %421, %cst_280 {dimension_numbers = #tpu.dot_dimension_numbers<[1], [0], [0], [1], [0, 0, 1, 1], [], []>} : vector<16x128xf32>, vector<128x128xf32>, vector<16x128xf32> -> vector<16x128xf32>
    %c1_281 = arith.constant 1 : index
    %c0_282 = arith.constant 0 : index
    %c0_283 = arith.constant 0 : index
    %c0_284 = arith.constant 0 : index
    %423 = vector.load %arg4[%c1_281, %c0_282, %c0_283, %c0_284] : memref<2x18x1x128xf32, #tpu.memory_space<vmem>>, vector<1x1x1x128xf32>
    %424 = vector.shape_cast %423 : vector<1x1x1x128xf32> to vector<1x128xf32>
    %425 = vector.broadcast %424 : vector<1x128xf32> to vector<16x128xf32>
    %426 = arith.addf %422, %425 : vector<16x128xf32>
    %c1_285 = arith.constant 1 : index
    %c16_286 = arith.constant 16 : index
    %c0_287 = arith.constant 0 : index
    %c0_288 = arith.constant 0 : index
    %427 = vector.load %arg4[%c1_285, %c16_286, %c0_287, %c0_288] : memref<2x18x1x128xf32, #tpu.memory_space<vmem>>, vector<1x1x1x128xf32>
    %428 = vector.shape_cast %427 : vector<1x1x1x128xf32> to vector<1x128xf32>
    %c1_289 = arith.constant 1 : index
    %c17_290 = arith.constant 17 : index
    %c0_291 = arith.constant 0 : index
    %c0_292 = arith.constant 0 : index
    %429 = vector.load %arg4[%c1_289, %c17_290, %c0_291, %c0_292] : memref<2x18x1x128xf32, #tpu.memory_space<vmem>>, vector<1x1x1x128xf32>
    %430 = vector.shape_cast %429 : vector<1x1x1x128xf32> to vector<1x128xf32>
    %cst_293 = arith.constant dense<0.000000e+00> : vector<16xf32>
    %431 = vector.multi_reduction <add>, %426, %cst_293 [1] : vector<16x128xf32> to vector<16xf32>
    %432 = vector.shape_cast %431 : vector<16xf32> to vector<16x1xf32>
    %cst_294 = arith.constant 1.250000e-02 : f32
    %433 = vector.broadcast %cst_294 : f32 to vector<16x1xf32>
    %434 = arith.mulf %432, %433 : vector<16x1xf32>
    %435 = vector.broadcast %434 : vector<16x1xf32> to vector<16x128xf32>
    %436 = arith.subf %426, %435 : vector<16x128xf32>
    %437 = arith.mulf %436, %436 : vector<16x128xf32>
    %cst_295 = arith.constant 0.000000e+00 : f32
    %438 = vector.shape_cast %2 : vector<1x128xi1> to vector<1x128xi1>
    %439 = vector.broadcast %438 : vector<1x128xi1> to vector<16x128xi1>
    %440 = vector.broadcast %cst_295 : f32 to vector<16x128xf32>
    %441 = arith.select %439, %437, %440 : vector<16x128xi1>, vector<16x128xf32>
    %cst_296 = arith.constant dense<0.000000e+00> : vector<16xf32>
    %442 = vector.multi_reduction <add>, %441, %cst_296 [1] : vector<16x128xf32> to vector<16xf32>
    %443 = vector.shape_cast %442 : vector<16xf32> to vector<16x1xf32>
    %cst_297 = arith.constant 1.250000e-02 : f32
    %444 = vector.broadcast %cst_297 : f32 to vector<16x1xf32>
    %445 = arith.mulf %443, %444 : vector<16x1xf32>
    %cst_298 = arith.constant 9.99999974E-6 : f32
    %446 = vector.broadcast %cst_298 : f32 to vector<16x1xf32>
    %447 = arith.addf %445, %446 : vector<16x1xf32>
    %448 = math.rsqrt %447 : vector<16x1xf32>
    %449 = vector.broadcast %448 : vector<16x1xf32> to vector<16x128xf32>
    %450 = arith.mulf %436, %449 : vector<16x128xf32>
    %451 = vector.broadcast %428 : vector<1x128xf32> to vector<16x128xf32>
    %452 = arith.mulf %450, %451 : vector<16x128xf32>
    %453 = vector.broadcast %430 : vector<1x128xf32> to vector<16x128xf32>
    %454 = arith.addf %452, %453 : vector<16x128xf32>
    %cst_299 = arith.constant dense<0.000000e+00> : vector<2x128xf32>
    %455 = tpu.matmul %54, %454, %cst_299 {dimension_numbers = #tpu.dot_dimension_numbers<[1], [0], [0], [1], [0, 0, 1, 1], [], []>} : vector<2x16xf32>, vector<16x128xf32>, vector<2x128xf32> -> vector<2x128xf32>
    %c0_300 = arith.constant 0 : index
    %c0_301 = arith.constant 0 : index
    %456 = vector.load %arg5[%c0_300, %c0_301] : memref<128x128xf32, #tpu.memory_space<vmem>>, vector<128x128xf32>
    %cst_302 = arith.constant dense<0.000000e+00> : vector<2x128xf32>
    %457 = tpu.matmul %455, %456, %cst_302 {dimension_numbers = #tpu.dot_dimension_numbers<[1], [0], [0], [1], [0, 0, 1, 1], [], []>} : vector<2x128xf32>, vector<128x128xf32>, vector<2x128xf32> -> vector<2x128xf32>
    %c0_303 = arith.constant 0 : index
    %c0_304 = arith.constant 0 : index
    %458 = vector.load %arg6[%c0_303, %c0_304] : memref<1x128xf32, #tpu.memory_space<vmem>>, vector<1x128xf32>
    %459 = vector.broadcast %458 : vector<1x128xf32> to vector<2x128xf32>
    %460 = arith.addf %457, %459 : vector<2x128xf32>
    %cst_305 = arith.constant 0.000000e+00 : f32
    %461 = vector.broadcast %cst_305 : f32 to vector<2x128xf32>
    %462 = arith.maximumf %460, %461 : vector<2x128xf32>
    %c0_306 = arith.constant 0 : index
    %c0_307 = arith.constant 0 : index
    %463 = vector.load %arg7[%c0_306, %c0_307] : memref<128x640xf32, #tpu.memory_space<vmem>>, vector<128x640xf32>
    %cst_308 = arith.constant dense<0.000000e+00> : vector<2x640xf32>
    %464 = tpu.matmul %462, %463, %cst_308 {dimension_numbers = #tpu.dot_dimension_numbers<[1], [0], [0], [1], [0, 0, 1, 1], [], []>} : vector<2x128xf32>, vector<128x640xf32>, vector<2x640xf32> -> vector<2x640xf32>
    %c0_309 = arith.constant 0 : index
    %c0_310 = arith.constant 0 : index
    %465 = vector.load %arg8[%c0_309, %c0_310] : memref<1x640xf32, #tpu.memory_space<vmem>>, vector<1x640xf32>
    %466 = vector.broadcast %465 : vector<1x640xf32> to vector<2x640xf32>
    %467 = arith.addf %464, %466 : vector<2x640xf32>
    %c0_311 = arith.constant 0 : index
    %c0_312 = arith.constant 0 : index
    %468 = vector.load %arg9[%c0_311, %c0_312] : memref<2x640xf32, #tpu.memory_space<vmem>>, vector<2x640xf32>
    tpu.vector_store %arg9[%c0_311, %c0_312], %467 {strides = array<i32>} : memref<2x640xf32, #tpu.memory_space<vmem>>, vector<2x640xf32>,
    return
  }
}

</mosaic_0001>

<bundles_post_ra>
// kernel: speaker_classifier_forward.1
= control target key start
LH: loop header
LB: loop body
LE: loop exit
PB: predicated region body
PF: predicated region fallthrough
CT: control target
= control target key end

     0   :  { %14 = vsyncpa [#allocation3], 0  ;;  %s6472_s0 = inlined_call_operand.vmem [shape: f32[16,128], index: 0, kind: input, shape index: {}]   ;;  %s6473_s1 = inlined_call_operand.hbm [shape: f32[128,128], index: 1, kind: input, shape index: {}]   ;;  %s6474_s2 = inlined_call_operand.vmem [shape: f32[1,128], index: 2, kind: input, shape index: {}]   ;;  %s6475_s3 = inlined_call_operand.hbm [shape: f32[2,8,128,128], index: 3, kind: input, shape index: {}]   ;;  %s6476_s4 = inlined_call_operand.vmem [shape: f32[2,18,1,128], index: 4, kind: input, shape index: {}]   ;;  %s6477_s5 = inlined_call_operand.hbm [shape: f32[128,128], index: 5, kind: input, shape index: {}]   ;;  %s6478_s6 = inlined_call_operand.vmem [shape: f32[1,128], index: 6, kind: input, shape index: {}]   ;;  %s6479_s7 = inlined_call_operand.hbm [shape: f32[128,640], index: 7, kind: input, shape index: {}]   ;;  %s6480_s8 = inlined_call_operand.vmem [shape: f32[1,640], index: 8, kind: input, shape index: {}]   ;;  %s6481_s9 = inlined_call_operand.hbm [shape: f32[2,640], index: 9, kind: output, shape index: {}]  }
   0x1   :  { %15 = vsyncpa [#allocation6], 0 }
   0x2   :  { %16 = vsyncpa [#allocation9], 0 }
   0x3   :  { %17 = vsyncpa [#allocation4], 0  ;;  %s5948_s30 = smov [#allocation5]   ;;  %s5949_s11 = smov [#allocation2]  }
   0x4   :  { %s39_s10 = sshll.u32 %s5948_s30, 4  ;;  %s25_s12 = sshll.u32 %s5949_s11, 4  ;;  %s40_s10 = int_to_ptr.vmem [resolvable:$true] %s39_s10  ;;  %s6012_s12 = int_to_ptr.vmem [resolvable:$true] %s25_s12 }
   0x5   :  { %s5830_s15 = scalar_lea.hbm %s6475_s3, 32768 }
   0x6   :  { %p5831_p0 = scmp.ne.s32.totalorder %s6475_s3, %s5830_s15  ;;  %p5834_p1 = scmp.lt.u32.totalorder %s5830_s15, %s6475_s3 }
   0x8   :  { %p5836_p2 = pnand %p5834_p1, %p5831_p0 }
   0xa   :  { %5839 = shalt.err (!%p5836_p2)
}
   0xb   :  { %s5840_s20 = scalar_lea.vmem %s40_s10, 32768  ;;  %p5845_p4 = scmp.lt.s32.totalorder %s40_s10, %s40_s10 }
   0xc   :  { %p5841_p3 = scmp.ne.s32.totalorder %s40_s10, %s5840_s20  ;;  %p5846_p5 = scmp.lt.s32.totalorder %s5840_s20, %s5840_s20 }
   0xe   :  { %p5847_p6 = por %p5846_p5, %p5845_p4 }
  0x10   :  { %p5848_p7 = pnand %p5847_p6, %p5841_p3 }
  0x12   :  { %5851 = shalt.err (!%p5848_p7)
}
  0x13   :  { %s5950_s21 = smov 128   ;;  %s5951_s22 = smov 8  }
  0x14   :  { %45 = dma.hbm_to_vmem [thread:$0]  %s6475_s3, 32768, %s40_s10, [#allocation6], %s5950_s21, %s5950_s21, %s5951_s22  }
  0x15   :  { %s5852_s27 = scalar_lea.hbm %s6473_s1, 2048 }
  0x16   :  { %p5853_p8 = scmp.ne.s32.totalorder %s6473_s1, %s5852_s27  ;;  %p5856_p9 = scmp.lt.u32.totalorder %s5852_s27, %s6473_s1 }
  0x18   :  { %p5858_p10 = pnand %p5856_p9, %p5853_p8 }
  0x1a   :  { %5861 = shalt.err (!%p5858_p10)
}
  0x1b   :  { %s5862_s13 = scalar_lea.vmem %s6012_s12, 2048  ;;  %p5867_p12 = scmp.lt.s32.totalorder %s6012_s12, %s6012_s12 }
  0x1c   :  { %p5863_p11 = scmp.ne.s32.totalorder %s6012_s12, %s5862_s13  ;;  %p5868_p13 = scmp.lt.s32.totalorder %s5862_s13, %s5862_s13 }
  0x1e   :  { %p5869_p0 = por %p5868_p13, %p5867_p12 }
  0x20   :  { %p5870_p1 = pnand %p5869_p0, %p5863_p11 }
  0x22   :  { %5873 = shalt.err (!%p5870_p1)
}
  0x23   :  { %31 = dma.hbm_to_vmem [thread:$0]  %s6473_s1, 2048, %s6012_s12, [#allocation3], %s5950_s21, %s5950_s21, %s5951_s22  }
  0x24   :  { %s5952_s14 = smov [#allocation7]   ;;  %s5953_s16 = smov [#allocation8]  }
  0x25   :  { %s53_s15 = sshll.u32 %s5952_s14, 4  ;;  %s67_s17 = sshll.u32 %s5953_s16, 4  ;;  %s54_s15 = int_to_ptr.vmem [resolvable:$true] %s53_s15  ;;  %s6049_s17 = int_to_ptr.vmem [resolvable:$true] %s67_s17 }
  0x26   :  { %s5874_s20 = scalar_lea.hbm %s6477_s5, 2048 }
  0x27   :  { %p5875_p2 = scmp.ne.s32.totalorder %s6477_s5, %s5874_s20  ;;  %p5878_p3 = scmp.lt.u32.totalorder %s5874_s20, %s6477_s5 }
  0x29   :  { %p5880_p4 = pnand %p5878_p3, %p5875_p2 }
  0x2b   :  { %5883 = shalt.err (!%p5880_p4)
}
  0x2c   :  { %s5884_s1 = scalar_lea.vmem %s54_s15, 2048  ;;  %p5889_p6 = scmp.lt.s32.totalorder %s54_s15, %s54_s15 }
  0x2d   :  { %p5885_p5 = scmp.ne.s32.totalorder %s54_s15, %s5884_s1  ;;  %p5890_p7 = scmp.lt.s32.totalorder %s5884_s1, %s5884_s1 }
  0x2f   :  { %p5891_p8 = por %p5890_p7, %p5889_p6 }
  0x31   :  { %p5892_p9 = pnand %p5891_p8, %p5885_p5 }
  0x33   :  { %5895 = shalt.err (!%p5892_p9)
}
  0x34   :  { %59 = dma.hbm_to_vmem [thread:$0]  %s6477_s5, 2048, %s54_s15, [#allocation6], %s5950_s21, %s5950_s21, %s5951_s22  }
  0x35   :  { %s5896_s30 = scalar_lea.hbm %s6479_s7, 10240 }
  0x36   :  { %p5897_p10 = scmp.ne.s32.totalorder %s6479_s7, %s5896_s30  ;;  %p5900_p11 = scmp.lt.u32.totalorder %s5896_s30, %s6479_s7 }
  0x38   :  { %p5902_p12 = pnand %p5900_p11, %p5897_p10 }
  0x3a   :  { %5905 = shalt.err (!%p5902_p12)
}
  0x3b   :  { %s5906_s14 = scalar_lea.vmem %s6049_s17, 10240  ;;  %p5911_p0 = scmp.lt.s32.totalorder %s6049_s17, %s6049_s17 }
  0x3c   :  { %p5907_p13 = scmp.ne.s32.totalorder %s6049_s17, %s5906_s14  ;;  %p5912_p1 = scmp.lt.s32.totalorder %s5906_s14, %s5906_s14 }
  0x3e   :  { %p5913_p2 = por %p5912_p1, %p5911_p0 }
  0x40   :  { %p5914_p3 = pnand %p5913_p2, %p5907_p13 }
  0x42   :  { %5917 = shalt.err (!%p5914_p3)
}
  0x43   :  { %s5954_s5 = smov 640   ;;  %s5955_s21 = smov 40  }
  0x44   :  { %73 = dma.hbm_to_vmem [thread:$0]  %s6479_s7, 10240, %s6049_s17, [#allocation9], %s5954_s5, %s5954_s5, %s5955_s21  }
  0x45   :  { %5940 = dma.done.wait [#allocation3], 2048  }
  0x46   :  { %5941 = vsyncadd [#allocation3], 4294965248 }
  0x47   :  { %5942 = dma.done.wait [#allocation6], 34816  }
  0x48   :  { %5943 = vsyncadd [#allocation6], 4294932480 }
  0x49   :  { %5944 = dma.done.wait [#allocation9], 10240  }
  0x4a   :  { %5945 = vsyncadd [#allocation9], 4294957056  ;;  %v151_v0 = vld [vmem:[#allocation2] sm:$0xff]  ;;  %v152_v1 = vld [vmem:[#allocation2 + $0x8] sm:$0xff]  ;;  %vm772_vm9 = vcmask 130048   ;;  %vm5956_vm12 = vmmov 1  }
  0x4b   :  { %v153_v2 = vld [vmem:[#allocation2 + $0x10] sm:$0xff]  ;;  %v4989_v3 = vpack.c.bf16 %v152_v1, %v151_v0  ;;  %v154_v4 = vld [vmem:[#allocation2 + $0x18] sm:$0xff]  ;;  %v155_v6 = vld [vmem:[#allocation2 + $0x20] sm:$0xff] }
  0x4c   :  { %v4993_v5 = vpack.c.bf16 %v154_v4, %v153_v2  ;;  %v156_v7 = vld [vmem:[#allocation2 + $0x28] sm:$0xff]  ;;  %v157_v9 = vld [vmem:[#allocation2 + $0x30] sm:$0xff]  ;;  %v158_v10 = vld [vmem:[#allocation2 + $0x38] sm:$0xff] }
  0x4d   :  { %4990 = vmatprep.subr.bf16.mxu0 %v4989_v3  ;;  %v4997_v8 = vpack.c.bf16 %v156_v7, %v155_v6  ;;  %v149_v11 = vld [vmem:[%s6472_s0] sm:$0xff]  ;;  %v250_v13 = vld [vmem:[#allocation5 + $0x8] sm:$0xff]  ;;  %v251_v14 = vld [vmem:[#allocation5 + $0x10] sm:$0xff]  ;;  %v5001_v20 = vpack.c.bf16 %v158_v10, %v157_v9 }
  0x4e   :  { %4992 = vmatpush3.bf16.msra.mxu0 %v4989_v3  ;;  %4223 = vmatprep.mubr.f32.mxu0 %v149_v11  ;;  %v249_v12 = vld [vmem:[#allocation5] sm:$0xff]  ;;  %v252_v16 = vld [vmem:[#allocation5 + $0x18] sm:$0xff]  ;;  %v254_v19 = vld [vmem:[#allocation5 + $0x28] sm:$0xff] }
  0x4f   :  { %4994 = vmatprep.subr.bf16.mxu0 %v4993_v5  ;;  %v5021_v15 = vpack.c.bf16 %v250_v13, %v249_v12  ;;  %v5025_v17 = vpack.c.bf16 %v252_v16, %v251_v14  ;;  %v253_v18 = vld [vmem:[#allocation5 + $0x20] sm:$0xff]  ;;  %v160_v22 = vld [vmem:[#allocation2 + $0x48] sm:$0xff]  ;;  %v255_v24 = vld [vmem:[#allocation5 + $0x30] sm:$0xff] }
  0x50   :  { %v159_v21 = vld [vmem:[#allocation2 + $0x40] sm:$0xff]  ;;  %v5029_v23 = vpack.c.bf16 %v254_v19, %v253_v18  ;;  %v256_v25 = vld [vmem:[#allocation5 + $0x38] sm:$0xff]  ;;  %v161_v27 = vld [vmem:[#allocation2 + $0x50] sm:$0xff] }
  0x51   :  { %5022 = vmatprep.subr.bf16.mxu1 %v5021_v15  ;;  %v5005_v26 = vpack.c.bf16 %v160_v22, %v159_v21  ;;  %v162_v28 = vld [vmem:[#allocation2 + $0x58] sm:$0xff]  ;;  %v5033_v29 = vpack.c.bf16 %v256_v25, %v255_v24  ;;  %v257_v30 = vld [vmem:[#allocation5 + $0x40] sm:$0xff]  ;;  %v258_v31 = vld [vmem:[#allocation5 + $0x48] sm:$0xff] }
  0x52   :  { %4996 = vmatpush3.bf16.msra.mxu0 %v4993_v5  ;;  %5024 = vmatpush3.bf16.msra.mxu1 %v5021_v15  ;;  %v5009_v32 = vpack.c.bf16 %v162_v28, %v161_v27  ;;  %v163_v33 = vld [vmem:[#allocation2 + $0x60] sm:$0xff]  ;;  %v164_v34 = vld [vmem:[#allocation2 + $0x68] sm:$0xff]  ;;  %v5037_v35 = vpack.c.bf16 %v258_v31, %v257_v30  ;;  %v259_v36 = vld [vmem:[#allocation5 + $0x50] sm:$0xff] }
  0x53   :  { %4998 = vmatprep.subr.bf16.mxu0 %v4997_v8  ;;  %5026 = vmatprep.subr.bf16.mxu1 %v5025_v17  ;;  %v260_v37 = vld [vmem:[#allocation5 + $0x58] sm:$0xff]  ;;  %v5013_v38 = vpack.c.bf16 %v164_v34, %v163_v33  ;;  %v165_v39 = vld [vmem:[#allocation2 + $0x70] sm:$0xff]  ;;  %v261_v42 = vld [vmem:[#allocation5 + $0x60] sm:$0xff] }
  0x54   :  { %v166_v40 = vld [vmem:[#allocation2 + $0x78] sm:$0xff]  ;;  %v5041_v41 = vpack.c.bf16 %v260_v37, %v259_v36  ;;  %v262_v43 = vld [vmem:[#allocation5 + $0x68] sm:$0xff]  ;;  %v263_v47 = vld [vmem:[#allocation5 + $0x70] sm:$0xff] }
  0x55   :  { %v5017_v44 = vpack.c.bf16 %v166_v40, %v165_v39  ;;  %v5045_v45 = vpack.c.bf16 %v262_v43, %v261_v42  ;;  %v150_v46 = vld [vmem:[%s6472_s0 + $0x8] sm:$0xff]  ;;  %v264_v48 = vld [vmem:[#allocation5 + $0x78] sm:$0xff]  ;;  %v3682_v50 = vld [vmem:[%s6474_s2] ss:$0 sm:$0xff] }
  0x56   :  { %5000 = vmatpush3.bf16.msra.mxu0 %v4997_v8  ;;  %5028 = vmatpush3.bf16.msra.mxu1 %v5025_v17  ;;  %v5049_v49 = vpack.c.bf16 %v264_v48, %v263_v47  ;;  %v3683_v55 = vld [vmem:[%s6476_s4] ss:$0 sm:$0xff]  ;;  %v395_v61 = vld [vmem:[#allocation5 + $0x88] sm:$0xff]  ;;  %v396_v1 = vld [vmem:[#allocation5 + $0x90] sm:$0xff]  ;;  %v88_v8 = vlaneseq }
  0x57   :  { %5002 = vmatprep.subr.bf16.mxu0 %v5001_v20  ;;  %5030 = vmatprep.subr.bf16.mxu1 %v5029_v23  ;;  %v394_v60 = vld [vmem:[#allocation5 + $0x80] sm:$0xff]  ;;  %v495_v0 = vld [vmem:[#allocation5 + $0x108] sm:$0xff]  ;;  %v397_v2 = vld [vmem:[#allocation5 + $0x98] sm:$0xff] }
  0x58   :  { %v494_v62 = vld [vmem:[#allocation5 + $0x100] sm:$0xff]  ;;  %v5053_v63 = vpack.c.bf16 %v395_v61, %v394_v60  ;;  %v5057_v4 = vpack.c.bf16 %v397_v2, %v396_v1  ;;  %v496_v5 = vld [vmem:[#allocation5 + $0x110] sm:$0xff]  ;;  %v497_v6 = vld [vmem:[#allocation5 + $0x118] sm:$0xff]  ;;  %v6102_v10 = vand.u32 127, %v88_v8 }
  0x59   :  { %v5085_v3 = vpack.c.bf16 %v495_v0, %v494_v62  ;;  %v5089_v7 = vpack.c.bf16 %v497_v6, %v496_v5  ;;  %v399_v21 = vld [vmem:[#allocation5 + $0xa8] sm:$0xff]  ;;  %v401_v27 = vld [vmem:[#allocation5 + $0xb8] sm:$0xff]  ;;  %v504_v40 = vld [vmem:[#allocation5 + $0x150] sm:$0xff] }
  0x5a   :  { %5004 = vmatpush3.bf16.msra.mxu0 %v5001_v20  ;;  %5032 = vmatpush3.bf16.msra.mxu1 %v5029_v23  ;;  %vm90_vm0 = vcmp.lt.s32.totalorder %v6102_v10, 80  ;;  %v398_v20 = vld [vmem:[#allocation5 + $0xa0] sm:$0xff]  ;;  %v499_v24 = vld [vmem:[#allocation5 + $0x128] sm:$0xff]  ;;  %v501_v30 = vld [vmem:[#allocation5 + $0x138] sm:$0xff] }
  0x5b   :  { %5006 = vmatprep.subr.bf16.mxu0 %v5005_v26  ;;  %5034 = vmatprep.subr.bf16.mxu1 %v5033_v29  ;;  %v5061_v22 = vpack.c.bf16 %v399_v21, %v398_v20  ;;  %v498_v23 = vld [vmem:[#allocation5 + $0x120] sm:$0xff]  ;;  %v403_v33 = vld [vmem:[#allocation5 + $0xc8] sm:$0xff]  ;;  %v405_v39 = vld [vmem:[#allocation5 + $0xd8] sm:$0xff] }
  0x5c   :  { %v5093_v25 = vpack.c.bf16 %v499_v24, %v498_v23  ;;  %v503_v36 = vld [vmem:[#allocation5 + $0x148] sm:$0xff]  ;;  %v505_v42 = vld [vmem:[#allocation5 + $0x158] sm:$0xff]  ;;  %v406_v43 = vld [vmem:[#allocation5 + $0xe0] sm:$0xff] }
  0x5d   :  { %v506_v47 = vld [vmem:[#allocation5 + $0x160] sm:$0xff]  ;;  %v507_v48 = vld [vmem:[#allocation5 + $0x168] sm:$0xff]  ;;  %v601_v23 = vld [vmem:[#allocation5 + $0x1b8] sm:$0xff] }
  0x5e   :  { %5008 = vmatpush3.bf16.msra.mxu0 %v5005_v26  ;;  %5036 = vmatpush3.bf16.msra.mxu1 %v5033_v29  ;;  %v400_v26 = vld [vmem:[#allocation5 + $0xb0] sm:$0xff]  ;;  %v3687_v6 = vld [vmem:[%s6476_s4 + $0x2] ss:$0 sm:$0xff]  ;;  %v599_v21 = vld [vmem:[#allocation5 + $0x1a8] sm:$0xff] }
  0x5f   :  { %5010 = vmatprep.subr.bf16.mxu0 %v5009_v32  ;;  %5038 = vmatprep.subr.bf16.mxu1 %v5037_v35  ;;  %v5065_v28 = vpack.c.bf16 %v401_v27, %v400_v26  ;;  %v500_v29 = vld [vmem:[#allocation5 + $0x130] sm:$0xff]  ;;  %v598_v20 = vld [vmem:[#allocation5 + $0x1a0] sm:$0xff] }
  0x60   :  { %v5097_v31 = vpack.c.bf16 %v501_v30, %v500_v29  ;;  %v602_v24 = vld [vmem:[#allocation5 + $0x1c0] sm:$0xff]  ;;  %v604_v27 = vld [vmem:[#allocation5 + $0x1d0] sm:$0xff] }
  0x61   :  { %v606_v30 = vld [vmem:[#allocation5 + $0x1e0] sm:$0xff] }
  0x62   :  { %5012 = vmatpush3.bf16.msra.mxu0 %v5009_v32  ;;  %5040 = vmatpush3.bf16.msra.mxu1 %v5037_v35  ;;  %v402_v32 = vld [vmem:[#allocation5 + $0xc0] sm:$0xff] }
  0x63   :  { %5014 = vmatprep.subr.bf16.mxu0 %v5013_v38  ;;  %5042 = vmatprep.subr.bf16.mxu1 %v5041_v41  ;;  %v5069_v34 = vpack.c.bf16 %v403_v33, %v402_v32  ;;  %v502_v35 = vld [vmem:[#allocation5 + $0x140] sm:$0xff]  ;;  %v608_v33 = vld [vmem:[#allocation5 + $0x1f0] sm:$0xff] }
  0x64   :  { %v5101_v37 = vpack.c.bf16 %v503_v36, %v502_v35  ;;  %v3691_v36 = vld [vmem:[%s6476_s4 + $0x4] ss:$0 sm:$0xff] }
  0x66   :  { %5016 = vmatpush3.bf16.msra.mxu0 %v5013_v38  ;;  %5044 = vmatpush3.bf16.msra.mxu1 %v5041_v41  ;;  %v404_v38 = vld [vmem:[#allocation5 + $0xd0] sm:$0xff] }
  0x67   :  { %5018 = vmatprep.subr.bf16.mxu0 %v5017_v44  ;;  %5046 = vmatprep.subr.bf16.mxu1 %v5045_v45  ;;  %v5073_v41 = vpack.c.bf16 %v405_v39, %v404_v38 }
  0x6a   :  { %5020 = vmatpush3.bf16.msra.mxu0 %v5017_v44  ;;  %5048 = vmatpush3.bf16.msra.mxu1 %v5045_v45  ;;  %v407_v44 = vld [vmem:[#allocation5 + $0xe8] sm:$0xff]  ;;  %v5105_v45 = vpack.c.bf16 %v505_v42, %v504_v40 }
  0x6b   :  { %5050 = vmatprep.subr.bf16.mxu1 %v5049_v49  ;;  %5054 = vmatprep.subr.bf16.mxu0 %v5053_v63 }
  0x6d   :  { %4224 = vmatmul.mubr.f32.vlgmr.msra.gmra.mrb[0].mxu0 %v150_v46  ;;  %v5077_v46 = vpack.c.bf16 %v407_v44, %v406_v43 }
  0x6e   :  { %5052 = vmatpush3.bf16.msra.mxu1 %v5049_v49  ;;  %5056 = vmatpush3.bf16.msra.mxu0 %v5053_v63  ;;  %v5109_v49 = vpack.c.bf16 %v507_v48, %v506_v47 }
  0x6f   :  { %5086 = vmatprep.subr.bf16.mxu1 %v5085_v3  ;;  %5058 = vmatprep.subr.bf16.mxu0 %v5057_v4 }
  0x72   :  { %5060 = vmatpush3.bf16.msra.mxu0 %v5057_v4  ;;  %v3686_v4 = vld [vmem:[%s6476_s4 + $0x1] ss:$0 sm:$0xff] }
  0x73   :  { %5062 = vmatprep.subr.bf16.mxu0 %v5061_v22 }
  0x76   :  { %5064 = vmatpush3.bf16.msra.mxu0 %v5061_v22  ;;  %v600_v22 = vld [vmem:[#allocation5 + $0x1b0] sm:$0xff] }
  0x77   :  { %5066 = vmatprep.subr.bf16.mxu0 %v5065_v28 }
  0x7a   :  { %5068 = vmatpush3.bf16.msra.mxu0 %v5065_v28  ;;  %v605_v28 = vld [vmem:[#allocation5 + $0x1d8] sm:$0xff] }
  0x7b   :  { %5070 = vmatprep.subr.bf16.mxu0 %v5069_v34  ;;  %v5137_v29 = vpack.c.bf16 %v605_v28, %v604_v27  ;;  %v881_v28 = vld [vmem:[#allocation5 + $0x220] sm:$0xff] }
  0x7e   :  { %5072 = vmatpush3.bf16.msra.mxu0 %v5069_v34  ;;  %v609_v34 = vld [vmem:[#allocation5 + $0x1f8] sm:$0xff] }
  0x7f   :  { %5074 = vmatprep.subr.bf16.mxu0 %v5073_v41  ;;  %v5145_v35 = vpack.c.bf16 %v609_v34, %v608_v33  ;;  %v885_v34 = vld [vmem:[#allocation5 + $0x240] sm:$0xff] }
  0x82   :  { %5076 = vmatpush3.bf16.msra.mxu0 %v5073_v41 }
  0x83   :  { %5078 = vmatprep.subr.bf16.mxu0 %v5077_v46 }
  0x86   :  { %5080 = vmatpush3.bf16.msra.mxu0 %v5077_v46 }
 0x140   :  { %v4225_v51 = vpop.f32.mrb[0].mxu0 }
 0x141   :  { %v240_v52 = vpop.f32.mrb[1].mxu0  ;;  %v246_v54 = vadd.f32 %v4225_v51, %v3682_v50  ;;  %v409_v51 = vld [vmem:[#allocation5 + $0xf8] sm:$0xff] }
 0x142   :  { %v241_v53 = vadd.f32 %v3682_v50, %v240_v52  ;;  %v408_v50 = vld [vmem:[#allocation5 + $0xf0] sm:$0xff] }
 0x143   :  { %v5081_v52 = vpack.c.bf16 %v409_v51, %v408_v50 }
 0x144   :  { %4258 = vmatprep.mubr.f32.mxu1 %v241_v53  ;;  %v508_v53 = vld [vmem:[#allocation5 + $0x170] sm:$0xff] }
 0x145   :  { %4259 = vmatmul.mubr.f32.vlgmr.msra.gmra.mrb[0].mxu1 %v246_v54  ;;  %5082 = vmatprep.subr.bf16.mxu0 %v5081_v52  ;;  %v509_v54 = vld [vmem:[#allocation5 + $0x178] sm:$0xff] }
 0x146   :  { %5088 = vmatpush3.bf16.msra.mxu1 %v5085_v3  ;;  %5084 = vmatpush3.bf16.msra.mxu0 %v5081_v52 }
 0x147   :  { %5090 = vmatprep.subr.bf16.mxu1 %v5089_v7 }
 0x14a   :  { %5092 = vmatpush3.bf16.msra.mxu1 %v5089_v7 }
 0x14b   :  { %5094 = vmatprep.subr.bf16.mxu1 %v5093_v25 }
 0x14e   :  { %5096 = vmatpush3.bf16.msra.mxu1 %v5093_v25  ;;  %v603_v25 = vld [vmem:[#allocation5 + $0x1c8] sm:$0xff] }
 0x14f   :  { %5098 = vmatprep.subr.bf16.mxu1 %v5097_v31  ;;  %v5133_v26 = vpack.c.bf16 %v603_v25, %v602_v24 }
 0x152   :  { %5100 = vmatpush3.bf16.msra.mxu1 %v5097_v31  ;;  %v607_v31 = vld [vmem:[#allocation5 + $0x1e8] sm:$0xff] }
 0x153   :  { %5102 = vmatprep.subr.bf16.mxu1 %v5101_v37  ;;  %v5141_v32 = vpack.c.bf16 %v607_v31, %v606_v30  ;;  %v883_v31 = vld [vmem:[#allocation5 + $0x230] sm:$0xff] }
 0x156   :  { %5104 = vmatpush3.bf16.msra.mxu1 %v5101_v37  ;;  %v3689_v37 = vld [vmem:[%s6476_s4 + $0x3] ss:$0 sm:$0xff] }
 0x157   :  { %5106 = vmatprep.subr.bf16.mxu1 %v5105_v45 }
 0x15a   :  { %5108 = vmatpush3.bf16.msra.mxu1 %v5105_v45 }
 0x15b   :  { %5110 = vmatprep.subr.bf16.mxu1 %v5109_v49 }
 0x15e   :  { %5112 = vmatpush3.bf16.msra.mxu1 %v5109_v49  ;;  %v3693_v49 = vld [vmem:[%s6476_s4 + $0x5] ss:$0 sm:$0xff] }
 0x218   :  { %v4260_v56 = vpop.f32.mrb[0].mxu1 }
 0x219   :  { %v338_v57 = vpop.f32.mrb[1].mxu1  ;;  %v6098_v59 = vadd.f32 %v4260_v56, %v3683_v55  ;;  %v594_v56 = vld [vmem:[#allocation5 + $0x180] sm:$0xff] }
 0x21a   :  { %v6095_v58 = vadd.f32 %v3683_v55, %v338_v57  ;;  %v5113_v55 = vpack.c.bf16 %v509_v54, %v508_v53  ;;  %v595_v57 = vld [vmem:[#allocation5 + $0x188] sm:$0xff] }
 0x21b   :  { %v5117_v60 = vpack.c.bf16 %v595_v57, %v594_v56 }
 0x21c   :  { %351 = vadd.xlane.f32.xlu0 %v6095_v58  ;;  %5114 = vmatprep.subr.bf16.mxu1 %v5113_v55 }
 0x21d   :  { %5116 = vmatpush3.bf16.msra.mxu1 %v5113_v55  ;;  %5118 = vmatprep.subr.bf16.mxu0 %v5117_v60  ;;  %v6137_v55 = vshrl.u32 %v88_v8, 7 }
 0x21f   :  { %v6140_v56 = vadd.s32 8, %v6137_v55  ;;  %vm106_vm10 = vcmp.eq.s32.totalorder %v6137_v55, 0 }
 0x220   :  { %353 = vadd.xlane.f32.xlu0 %v6098_v59  ;;  %vm120_vm13 = vmxor %vm106_vm10, %vm5956_vm12 }
 0x221   :  { %v6144_v57 = vsub.s32 %v6140_v56, %v6102_v10  ;;  %vm111_vm15 = vcmp.eq.s32.totalorder %v6140_v56, 8 }
 0x223   :  { %vm99_vm1 = vcmp.eq.s32.totalorder %v6144_v57, 8  ;;  %vm101_vm2 = vcmp.eq.s32.totalorder %v6144_v57, 4294967288  ;;  %vm97_vm3 = vcmp.eq.s32.totalorder %v6144_v57, 0 }
 0x224   :  { %vm103_vm4 = vmor %vm99_vm1, %vm101_vm2  ;;  %vm108_vm1 = vcmp.eq.s32.totalorder %v6137_v55, 7  ;;  %vm119_vm2 = vcmp.eq.s32.totalorder %v6144_v57, 1 }
 0x225   :  { %vm6155_vm7 = vmor %vm97_vm3, %vm103_vm4 }
 0x226   :  { %vm121_vm3 = vmxor %vm111_vm15, %vm5956_vm12 }
 0x227   :  { %vm127_vm10 = vmand %vm119_vm2, %vm121_vm3 }
 0x2a9   :  { %v352_v9 = vpop.xlane.xlu0 %351 }
 0x2aa   :  { %v355_v11 = vmul.f32 0.0125, %v352_v9 }
 0x2ac   :  { %v6105_v12 = vsub.f32 %v6095_v58, %v355_v11 }
 0x2ad   :  { %v354_v13 = vpop.xlane.xlu0 %353 }
 0x2ae   :  { %v356_v14 = vmul.f32 0.0125, %v354_v13  ;;  %v359_v15 = vmul.f32 %v6105_v12, %v6105_v12 }
 0x2b0   :  { %v6111_v16 = vsub.f32 %v6098_v59, %v356_v14  ;;  %v363_v17 = vsel %vm90_vm0, %v359_v15, 0.0  ;;  %v596_v14 = vld [vmem:[#allocation5 + $0x190] sm:$0xff]  ;;  %v597_v15 = vld [vmem:[#allocation5 + $0x198] sm:$0xff] }
 0x2b1   :  { %365 = vadd.xlane.f32.xlu1 %v363_v17 }
 0x2b2   :  { %v360_v18 = vmul.f32 %v6111_v16, %v6111_v16 }
 0x2b4   :  { %v364_v19 = vsel %vm90_vm0, %v360_v18, 0.0 }
 0x2b5   :  { %367 = vadd.xlane.f32.xlu1 %v364_v19  ;;  %v5121_v19 = vpack.c.bf16 %v597_v15, %v596_v14 }
 0x33e   :  { %v366_v61 = vpop.xlane.xlu1 %365 }
 0x33f   :  { %v369_v62 = vmul.f32 0.0125, %v366_v61 }
 0x341   :  { %v371_v63 = vadd.f32 1e-05, %v369_v62 }
 0x342   :  { %v368_v0 = vpop.xlane.xlu1 %367 }
 0x343   :  { %5758 = vrsqrt.f32 %v371_v63  ;;  %v370_v1 = vmul.f32 0.0125, %v368_v0 }
 0x345   :  { %v372_v2 = vadd.f32 1e-05, %v370_v1 }
 0x347   :  { %5760 = vrsqrt.f32 %v372_v2 }
 0x34d   :  { %v5759_v3 = vpop.eup %5758 }
 0x34e   :  { %v375_v5 = vmul.f32 %v5759_v3, %v6105_v12  ;;  %v5125_v12 = vpack.c.bf16 %v599_v21, %v598_v20 }
 0x350   :  { %v383_v7 = vmul.f32 %v3686_v4, %v375_v5 }
 0x351   :  { %v5761_v9 = vpop.eup %5760 }
 0x352   :  { %v376_v11 = vmul.f32 %v5761_v9, %v6111_v16  ;;  %v391_v13 = vadd.f32 %v3687_v6, %v383_v7  ;;  %v5129_v16 = vpack.c.bf16 %v601_v23, %v600_v22  ;;  %v879_v23 = vld [vmem:[#allocation5 + $0x210] sm:$0xff] }
 0x354   :  { %v384_v17 = vmul.f32 %v3686_v4, %v376_v11  ;;  %4293 = vmatprep.mubr.f32.mxu0 %v391_v13  ;;  %4328 = vmatprep.mubr.f32.mxu1 %v391_v13 }
 0x356   :  { %v392_v18 = vadd.f32 %v3687_v6, %v384_v17 }
 0x358   :  { %4294 = vmatmul.mubr.f32.vlgmr.msra.gmra.mrb[2].mxu0 %v392_v18  ;;  %4329 = vmatmul.mubr.f32.vlgmr.msra.gmra.mrb[2].mxu1 %v392_v18 }
 0x359   :  { %5120 = vmatpush3.bf16.msra.mxu0 %v5117_v60  ;;  %4363 = vmatprep.mubr.f32.mxu0 %v391_v13  ;;  %v6150_v60 = vsub.s32 %v6137_v55, %v6102_v10 }
 0x35a   :  { %5122 = vmatprep.subr.bf16.mxu0 %v5121_v19 }
 0x35b   :  { %vm96_vm5 = vcmp.eq.s32.totalorder %v6150_v60, 0  ;;  %vm100_vm6 = vcmp.eq.s32.totalorder %v6150_v60, 4294967288  ;;  %vm118_vm11 = vcmp.eq.s32.totalorder %v6150_v60, 1  ;;  %vm130_vm4 = vcmp.eq.s32.totalorder %v6150_v60, 4294967295 }
 0x35c   :  { %vm6159_vm8 = vmor %vm96_vm5, %vm100_vm6  ;;  %vm115_vm6 = vcmp.eq.s32.totalorder %v6140_v56, 15 }
 0x35d   :  { %5124 = vmatpush3.bf16.msra.mxu0 %v5121_v19  ;;  %v878_v19 = vld [vmem:[#allocation5 + $0x208] sm:$0xff]  ;;  %vm126_vm14 = vmand %vm118_vm11, %vm120_vm13  ;;  %vm131_vm13 = vcmp.eq.s32.totalorder %v6144_v57, 4294967295  ;;  %v1459_v57 = vld [vmem:[#allocation5 + $0x380] sm:$0xff] }
 0x35e   :  { %5126 = vmatprep.subr.bf16.mxu0 %v5125_v12  ;;  %vm132_vm5 = vmxor %vm108_vm1, %vm5956_vm12 }
 0x35f   :  { %vm138_vm11 = vmand %vm130_vm4, %vm132_vm5 }
 0x361   :  { %5128 = vmatpush3.bf16.msra.mxu0 %v5125_v12 }
 0x362   :  { %5130 = vmatprep.subr.bf16.mxu0 %v5129_v16 }
 0x365   :  { %5132 = vmatpush3.bf16.msra.mxu0 %v5129_v16  ;;  %v880_v16 = vld [vmem:[#allocation5 + $0x218] sm:$0xff] }
 0x366   :  { %5134 = vmatprep.subr.bf16.mxu0 %v5133_v26  ;;  %v5161_v27 = vpack.c.bf16 %v880_v16, %v879_v23 }
 0x369   :  { %5136 = vmatpush3.bf16.msra.mxu0 %v5133_v26 }
 0x36a   :  { %5138 = vmatprep.subr.bf16.mxu0 %v5137_v29 }
 0x36d   :  { %5140 = vmatpush3.bf16.msra.mxu0 %v5137_v29  ;;  %v882_v29 = vld [vmem:[#allocation5 + $0x228] sm:$0xff] }
 0x36e   :  { %5142 = vmatprep.subr.bf16.mxu0 %v5141_v32  ;;  %v5165_v30 = vpack.c.bf16 %v882_v29, %v881_v28  ;;  %v1131_v28 = vld [vmem:[#allocation5 + $0x330] sm:$0xff] }
 0x371   :  { %5144 = vmatpush3.bf16.msra.mxu0 %v5141_v32  ;;  %v884_v32 = vld [vmem:[#allocation5 + $0x238] sm:$0xff] }
 0x372   :  { %5146 = vmatprep.subr.bf16.mxu0 %v5145_v35  ;;  %v5169_v33 = vpack.c.bf16 %v884_v32, %v883_v31  ;;  %v1033_v32 = vld [vmem:[#allocation5 + $0x2c0] sm:$0xff] }
 0x375   :  { %5148 = vmatpush3.bf16.msra.mxu0 %v5145_v35  ;;  %v886_v35 = vld [vmem:[#allocation5 + $0x248] sm:$0xff] }
 0x378   :  { %4364 = vmatmul.mubr.f32.vlgmr.msra.gmra.mrb[4].mxu0 %v392_v18  ;;  %v877_v18 = vld [vmem:[#allocation5 + $0x200] sm:$0xff] }
 0x379   :  { %v5157_v20 = vpack.c.bf16 %v878_v19, %v877_v18 }
 0x42b   :  { %v4295_v38 = vpop.f32.mrb[2].mxu0  ;;  %v4330_v39 = vpop.f32.mrb[2].mxu1 }
 0x42c   :  { %v590_v40 = vadd.f32 %v4330_v39, %v3691_v36  ;;  %v484_v41 = vpop.f32.mrb[3].mxu0  ;;  %v584_v42 = vpop.f32.mrb[3].mxu1  ;;  %v490_v47 = vadd.f32 %v4295_v38, %v3689_v37  ;;  %v888_v38 = vld [vmem:[#allocation5 + $0x258] sm:$0xff] }
 0x42d   :  { %v485_v43 = vadd.f32 %v3689_v37, %v484_v41  ;;  %v585_v44 = vadd.f32 %v3691_v36, %v584_v42  ;;  %v5173_v36 = vpack.c.bf16 %v886_v35, %v885_v34  ;;  %v887_v37 = vld [vmem:[#allocation5 + $0x250] sm:$0xff]  ;;  %v890_v41 = vld [vmem:[#allocation5 + $0x268] sm:$0xff]  ;;  %v1133_v34 = vld [vmem:[#allocation5 + $0x340] sm:$0xff] }
 0x42e   :  { %v694_v48 = vmul.f32 0.1118034, %v490_v47  ;;  %v5177_v39 = vpack.c.bf16 %v888_v38, %v887_v37  ;;  %v1035_v37 = vld [vmem:[#allocation5 + $0x2d0] sm:$0xff]  ;;  %v1036_v38 = vld [vmem:[#allocation5 + $0x2d8] sm:$0xff] }
 0x42f   :  { %v693_v45 = vmul.f32 0.1118034, %v485_v43  ;;  %v5149_v46 = vpack.c.bf16 %v590_v40, %v585_v44  ;;  %v889_v40 = vld [vmem:[#allocation5 + $0x260] sm:$0xff]  ;;  %v891_v43 = vld [vmem:[#allocation5 + $0x270] sm:$0xff]  ;;  %v892_v44 = vld [vmem:[#allocation5 + $0x278] sm:$0xff] }
 0x430   :  { %v5181_v42 = vpack.c.bf16 %v890_v41, %v889_v40  ;;  %v5209_v40 = vpack.c.bf16 %v1036_v38, %v1035_v37  ;;  %v1135_v41 = vld [vmem:[#allocation5 + $0x350] sm:$0xff] }
 0x431   :  { %5150 = vmatprep.subr.bf16.mxu1 %v5149_v46  ;;  %4370 = vmatprep.mubr.f32.mxu1 %v693_v45  ;;  %v5185_v45 = vpack.c.bf16 %v892_v44, %v891_v43  ;;  %v1037_v43 = vld [vmem:[#allocation5 + $0x2e0] sm:$0xff] }
 0x432   :  { %5152 = vmatpush3.bf16.xpose.msra.mxu1 %v5149_v46 }
 0x439   :  { %4371 = vmatmul.mubr.f32.vlgmr.msra.gmra.mrb[4].mxu1 %v694_v48 }
 0x44b   :  { %v4365_v50 = vpop.f32.mrb[4].mxu0 }
 0x44c   :  { %v690_v51 = vadd.f32 %v4365_v50, %v3693_v49  ;;  %v684_v52 = vpop.f32.mrb[5].mxu0 }
 0x44d   :  { %v685_v53 = vadd.f32 %v3693_v49, %v684_v52  ;;  %v3697_v49 = vld [vmem:[%s6476_s4 + $0x6] ss:$0 sm:$0xff] }
 0x44f   :  { %v5153_v54 = vpack.c.bf16 %v690_v51, %v685_v53 }
 0x451   :  { %5154 = vmatprep.subr.bf16.mxu1 %v5153_v54 }
 0x452   :  { %5156 = vmatpush3.bf16.msra.mxu1 %v5153_v54 }
 0x453   :  { %5158 = vmatprep.subr.bf16.mxu1 %v5157_v20 }
 0x50c   :  { %v4372_v62 = vpop.f32.mrb[4].mxu1 }
 0x50d   :  { %v771_v63 = vsel %vm6155_vm7, %v4372_v62, -1e+30  ;;  %v761_v0 = vpop.f32.mrb[5].mxu1  ;;  %v1025_v62 = vld [vmem:[#allocation5 + $0x280] sm:$0xff] }
 0x50e   :  { %v770_v1 = vsel %vm6159_vm8, %v761_v0, -1e+30  ;;  %v776_v2 = vsel %vm772_vm9, %v771_v63, -inf  ;;  %v1125_v0 = vld [vmem:[#allocation5 + $0x300] sm:$0xff] }
 0x50f   :  { %777 = vmax.xlane.f32.xlu1 %v776_v2  ;;  %v773_v3 = vsel %vm772_vm9, %v770_v1, -inf  ;;  %v1126_v2 = vld [vmem:[#allocation5 + $0x308] sm:$0xff] }
 0x510   :  { %774 = vmax.xlane.f32.xlu0 %v773_v3  ;;  %v1027_v3 = vld [vmem:[#allocation5 + $0x290] sm:$0xff] }
 0x59c   :  { %v778_v4 = vpop.xlane.xlu1 %777 }
 0x59d   :  { %v780_v5 = vsub.f32 %v771_v63, %v778_v4  ;;  %v775_v6 = vpop.xlane.xlu0 %774  ;;  %v1026_v63 = vld [vmem:[#allocation5 + $0x288] sm:$0xff]  ;;  %v1028_v4 = vld [vmem:[#allocation5 + $0x298] sm:$0xff] }
 0x59e   :  { %v779_v7 = vsub.f32 %v770_v1, %v775_v6  ;;  %v5189_v1 = vpack.c.bf16 %v1026_v63, %v1025_v62  ;;  %v1127_v6 = vld [vmem:[#allocation5 + $0x310] sm:$0xff]  ;;  %v1140_v62 = vld [vmem:[#allocation5 + $0x378] sm:$0xff] }
 0x59f   :  { %v783_v9 = vmul.f32 1.442695, %v780_v5  ;;  %v5221_v5 = vpack.c.bf16 %v1126_v2, %v1125_v0 }
 0x5a0   :  { %v781_v11 = vmul.f32 1.442695, %v779_v7  ;;  %v1128_v7 = vld [vmem:[#allocation5 + $0x318] sm:$0xff]  ;;  %5190 = vmatprep.subr.bf16.mxu0 %v5189_v1 }
 0x5a1   :  { %5762 = vpow2.f32 %v783_v9  ;;  %v5225_v9 = vpack.c.bf16 %v1128_v7, %v1127_v6  ;;  %5192 = vmatpush3.bf16.msra.mxu0 %v5189_v1  ;;  %v3700_v7 = vld [vmem:[%s6476_s4 + $0x7] ss:$0 sm:$0xff] }
 0x5a2   :  { %5764 = vpow2.f32 %v781_v11  ;;  %v1030_v11 = vld [vmem:[#allocation5 + $0x2a8] sm:$0xff] }
 0x5ab   :  { %v5763_v13 = vpop.eup %5762 }
 0x5ac   :  { %v5765_v14 = vpop.eup %5764  ;;  %v788_v15 = vsel %vm772_vm9, %v5763_v13, 0.0 }
 0x5ad   :  { %789 = vadd.xlane.f32.xlu1 %v788_v15  ;;  %v785_v17 = vsel %vm772_vm9, %v5765_v14, 0.0 }
 0x5ae   :  { %786 = vadd.xlane.f32.xlu0 %v785_v17 }
 0x63a   :  { %v790_v21 = vpop.xlane.xlu1 %789 }
 0x63b   :  { %5766 = vrcp.f32 %v790_v21  ;;  %v787_v12 = vpop.xlane.xlu0 %786 }
 0x63c   :  { %5768 = vrcp.f32 %v787_v12 }
 0x645   :  { %v5767_v22 = vpop.eup %5766 }
 0x646   :  { %v5769_v24 = vpop.eup %5768  ;;  %v794_v26 = vmul.f32 %v5767_v22, %v5763_v13  ;;  %v1129_v13 = vld [vmem:[#allocation5 + $0x320] sm:$0xff] }
 0x647   :  { %v793_v25 = vmul.f32 %v5769_v24, %v5765_v14  ;;  %v1130_v14 = vld [vmem:[#allocation5 + $0x328] sm:$0xff] }
 0x648   :  { %v5229_v17 = vpack.c.bf16 %v1130_v14, %v1129_v13  ;;  %v3701_v13 = vld [vmem:[%s6476_s4 + $0x8] ss:$0 sm:$0xff] }
 0x649   :  { %4377 = vmatprep.mubr.msk.f32.mxu1 %vm772_vm9, %v793_v25 }
 0x64a   :  { %4378 = vmatmul.mubr.msk.f32.vlgmr.msra.gmra.mrb[6].mxu1 %vm772_vm9, %v794_v26  ;;  %v1031_v26 = vld [vmem:[#allocation5 + $0x2b0] sm:$0xff] }
 0x64b   :  { %5160 = vmatpush3.bf16.msra.mxu1 %v5157_v20 }
 0x64c   :  { %5162 = vmatprep.subr.bf16.mxu1 %v5161_v27 }
 0x64f   :  { %5164 = vmatpush3.bf16.msra.mxu1 %v5161_v27  ;;  %v1032_v27 = vld [vmem:[#allocation5 + $0x2b8] sm:$0xff] }
 0x650   :  { %5166 = vmatprep.subr.bf16.mxu1 %v5165_v30  ;;  %v5201_v29 = vpack.c.bf16 %v1032_v27, %v1031_v26 }
 0x653   :  { %5168 = vmatpush3.bf16.msra.mxu1 %v5165_v30  ;;  %v1132_v30 = vld [vmem:[#allocation5 + $0x338] sm:$0xff] }
 0x654   :  { %5170 = vmatprep.subr.bf16.mxu1 %v5169_v33  ;;  %v5233_v31 = vpack.c.bf16 %v1132_v30, %v1131_v28 }
 0x657   :  { %5172 = vmatpush3.bf16.msra.mxu1 %v5169_v33  ;;  %v1034_v33 = vld [vmem:[#allocation5 + $0x2c8] sm:$0xff] }
 0x658   :  { %5174 = vmatprep.subr.bf16.mxu1 %v5173_v36  ;;  %v5205_v35 = vpack.c.bf16 %v1034_v33, %v1033_v32  ;;  %v3703_v32 = vld [vmem:[%s6476_s4 + $0x9] ss:$0 sm:$0xff] }
 0x65b   :  { %5176 = vmatpush3.bf16.msra.mxu1 %v5173_v36  ;;  %v1134_v36 = vld [vmem:[#allocation5 + $0x348] sm:$0xff] }
 0x65c   :  { %5178 = vmatprep.subr.bf16.mxu1 %v5177_v39 }
 0x65f   :  { %5180 = vmatpush3.bf16.msra.mxu1 %v5177_v39  ;;  %v5237_v39 = vpack.c.bf16 %v1134_v36, %v1133_v34 }
 0x660   :  { %5182 = vmatprep.subr.bf16.mxu1 %v5181_v42 }
 0x663   :  { %5184 = vmatpush3.bf16.msra.mxu1 %v5181_v42  ;;  %v1136_v42 = vld [vmem:[#allocation5 + $0x358] sm:$0xff] }
 0x664   :  { %5186 = vmatprep.subr.bf16.mxu1 %v5185_v45  ;;  %v5241_v44 = vpack.c.bf16 %v1136_v42, %v1135_v41  ;;  %v1460_v41 = vld [vmem:[#allocation5 + $0x388] sm:$0xff] }
 0x665   :  { %v5261_v42 = vpack.c.bf16 %v1460_v41, %v1459_v57 }
 0x667   :  { %5188 = vmatpush3.bf16.msra.mxu1 %v5185_v45  ;;  %v1038_v45 = vld [vmem:[#allocation5 + $0x2e8] sm:$0xff] }
 0x668   :  { %5222 = vmatprep.subr.bf16.mxu1 %v5221_v5 }
 0x71d   :  { %v4379_v46 = vpop.f32.mrb[6].mxu1 }
 0x71e   :  { %v867_v47 = vpop.f32.mrb[7].mxu1 }
 0x71f   :  { %4412 = vmatprep.mubr.f32.mxu1 %v867_v47  ;;  %v1138_v47 = vld [vmem:[#allocation5 + $0x368] sm:$0xff] }
 0x720   :  { %4413 = vmatmul.mubr.f32.vlgmr.msra.gmra.mrb[8].mxu1 %v4379_v46  ;;  %v1137_v46 = vld [vmem:[#allocation5 + $0x360] sm:$0xff] }
 0x721   :  { %5224 = vmatpush3.bf16.msra.mxu1 %v5221_v5 }
 0x722   :  { %5226 = vmatprep.subr.bf16.mxu1 %v5225_v9 }
 0x725   :  { %5228 = vmatpush3.bf16.msra.mxu1 %v5225_v9 }
 0x726   :  { %5230 = vmatprep.subr.bf16.mxu1 %v5229_v17 }
 0x729   :  { %5232 = vmatpush3.bf16.msra.mxu1 %v5229_v17 }
 0x72a   :  { %5234 = vmatprep.subr.bf16.mxu1 %v5233_v31 }
 0x72d   :  { %5236 = vmatpush3.bf16.msra.mxu1 %v5233_v31 }
 0x72e   :  { %5238 = vmatprep.subr.bf16.mxu1 %v5237_v39 }
 0x731   :  { %5240 = vmatpush3.bf16.msra.mxu1 %v5237_v39 }
 0x732   :  { %5242 = vmatprep.subr.bf16.mxu1 %v5241_v44 }
 0x735   :  { %5244 = vmatpush3.bf16.msra.mxu1 %v5241_v44  ;;  %v1462_v44 = vld [vmem:[#allocation5 + $0x398] sm:$0xff] }
 0x7f3   :  { %v4414_v48 = vpop.f32.mrb[8].mxu1 }
 0x7f4   :  { %v969_v50 = vadd.f32 %v4414_v48, %v6098_v59  ;;  %v959_v51 = vpop.f32.mrb[9].mxu1  ;;  %v5193_v59 = vpack.c.bf16 %v1028_v4, %v1027_v3  ;;  %v5213_v48 = vpack.c.bf16 %v1038_v45, %v1037_v43  ;;  %v1461_v43 = vld [vmem:[#allocation5 + $0x390] sm:$0xff] }
 0x7f5   :  { %v968_v52 = vadd.f32 %v959_v51, %v6095_v58  ;;  %v1029_v58 = vld [vmem:[#allocation5 + $0x2a0] sm:$0xff]  ;;  %v1040_v51 = vld [vmem:[#allocation5 + $0x2f8] sm:$0xff]  ;;  %v5265_v45 = vpack.c.bf16 %v1462_v44, %v1461_v43 }
 0x7f6   :  { %v6178_v53 = vadd.f32 %v3697_v49, %v969_v50  ;;  %5194 = vmatprep.subr.bf16.mxu0 %v5193_v59  ;;  %v5197_v15 = vpack.c.bf16 %v1030_v11, %v1029_v58  ;;  %v1039_v50 = vld [vmem:[#allocation5 + $0x2f0] sm:$0xff] }
 0x7f7   :  { %v6180_v54 = vadd.f32 %v3697_v49, %v968_v52  ;;  %5196 = vmatpush3.bf16.msra.mxu0 %v5193_v59  ;;  %v5245_v49 = vpack.c.bf16 %v1138_v47, %v1137_v46  ;;  %v1139_v52 = vld [vmem:[#allocation5 + $0x370] sm:$0xff]  ;;  %v5217_v63 = vpack.c.bf16 %v1040_v51, %v1039_v50  ;;  %v1463_v46 = vld [vmem:[#allocation5 + $0x3a0] sm:$0xff]  ;;  %v1464_v47 = vld [vmem:[#allocation5 + $0x3a8] sm:$0xff] }
 0x7f8   :  { %986 = vadd.xlane.f32.xlu1 %v6178_v53  ;;  %5198 = vmatprep.subr.bf16.mxu0 %v5197_v15  ;;  %v5249_v0 = vpack.c.bf16 %v1140_v62, %v1139_v52  ;;  %v1466_v50 = vld [vmem:[#allocation5 + $0x3b8] sm:$0xff]  ;;  %v1467_v52 = vld [vmem:[#allocation5 + $0x3c0] sm:$0xff]  ;;  %v1468_v62 = vld [vmem:[#allocation5 + $0x3c8] sm:$0xff] }
 0x7f9   :  { %984 = vadd.xlane.f32.xlu0 %v6180_v54  ;;  %5246 = vmatprep.subr.bf16.mxu1 %v5245_v49 }
 0x7fa   :  { %5248 = vmatpush3.bf16.msra.mxu1 %v5245_v49  ;;  %v1465_v49 = vld [vmem:[#allocation5 + $0x3b0] sm:$0xff] }
 0x7fb   :  { %5200 = vmatpush3.bf16.msra.mxu0 %v5197_v15  ;;  %5250 = vmatprep.subr.bf16.mxu1 %v5249_v0  ;;  %v5273_v51 = vpack.c.bf16 %v1466_v50, %v1465_v49 }
 0x7fc   :  { %5202 = vmatprep.subr.bf16.mxu0 %v5201_v29 }
 0x7fe   :  { %5252 = vmatpush3.bf16.msra.mxu1 %v5249_v0  ;;  %v1469_v0 = vld [vmem:[#allocation5 + $0x3d0] sm:$0xff] }
 0x7ff   :  { %5204 = vmatpush3.bf16.msra.mxu0 %v5201_v29 }
 0x800   :  { %5206 = vmatprep.subr.bf16.mxu0 %v5205_v35 }
 0x803   :  { %5208 = vmatpush3.bf16.msra.mxu0 %v5205_v35 }
 0x804   :  { %5210 = vmatprep.subr.bf16.mxu0 %v5209_v40 }
 0x807   :  { %5212 = vmatpush3.bf16.msra.mxu0 %v5209_v40 }
 0x808   :  { %5214 = vmatprep.subr.bf16.mxu0 %v5213_v48 }
 0x80b   :  { %5216 = vmatpush3.bf16.msra.mxu0 %v5213_v48  ;;  %v5269_v48 = vpack.c.bf16 %v1464_v47, %v1463_v46 }
 0x80c   :  { %5218 = vmatprep.subr.bf16.mxu0 %v5217_v63 }
 0x80f   :  { %5220 = vmatpush3.bf16.msra.mxu0 %v5217_v63  ;;  %v5277_v63 = vpack.c.bf16 %v1468_v62, %v1467_v52 }
 0x885   :  { %v987_v18 = vpop.xlane.xlu1 %986 }
 0x886   :  { %v989_v19 = vmul.f32 0.0125, %v987_v18  ;;  %v985_v20 = vpop.xlane.xlu0 %984 }
 0x887   :  { %v988_v21 = vmul.f32 0.0125, %v985_v20 }
 0x888   :  { %v6185_v12 = vsub.f32 %v6178_v53, %v989_v19  ;;  %v5957_v19 = vmov 0.0  }
 0x889   :  { %v6188_v22 = vsub.f32 %v6180_v54, %v988_v21  ;;  %v6210_v20 = vsel %vm126_vm14, 1.0, %v5957_v19  ;;  %v3705_v21 = vld [vmem:[%s6476_s4 + $0xa] ss:$0 sm:$0xff]  ;;  %vm133_vm14 = vmxor %vm115_vm6, %vm5956_vm12  ;;  %v6236_v40 = vsel %vm127_vm10, 1.0, %v5957_v19  ;;  %v6239_v60 = vsel %vm138_vm11, 1.0, %v5957_v19 }
 0x88a   :  { %v993_v23 = vmul.f32 %v6185_v12, %v6185_v12  ;;  %vm139_vm15 = vmand %vm131_vm13, %vm133_vm14 }
 0x88b   :  { %v992_v16 = vmul.f32 %v6188_v22, %v6188_v22  ;;  %v6246_v56 = vsel %vm139_vm15, 1.0, %v5957_v19 }
 0x88c   :  { %v995_v24 = vsel %vm90_vm0, %v993_v23, 0.0 }
 0x88d   :  { %998 = vadd.xlane.f32.xlu1 %v995_v24  ;;  %v994_v25 = vsel %vm90_vm0, %v992_v16, 0.0 }
 0x88e   :  { %996 = vadd.xlane.f32.xlu0 %v994_v25 }
 0x91a   :  { %v999_v1 = vpop.xlane.xlu1 %998 }
 0x91b   :  { %v1001_v2 = vmul.f32 0.0125, %v999_v1  ;;  %v997_v3 = vpop.xlane.xlu0 %996  ;;  %v1470_v1 = vld [vmem:[#allocation5 + $0x3d8] sm:$0xff] }
 0x91c   :  { %v1000_v4 = vmul.f32 0.0125, %v997_v3  ;;  %v1471_v3 = vld [vmem:[#allocation5 + $0x3e0] sm:$0xff] }
 0x91d   :  { %v1003_v5 = vadd.f32 1e-05, %v1001_v2  ;;  %v5281_v2 = vpack.c.bf16 %v1470_v1, %v1469_v0 }
 0x91e   :  { %v1002_v59 = vadd.f32 1e-05, %v1000_v4  ;;  %v1472_v4 = vld [vmem:[#allocation5 + $0x3e8] sm:$0xff] }
 0x91f   :  { %5770 = vrsqrt.f32 %v1003_v5  ;;  %v5285_v5 = vpack.c.bf16 %v1472_v4, %v1471_v3 }
 0x920   :  { %5772 = vrsqrt.f32 %v1002_v59  ;;  %v1473_v59 = vld [vmem:[#allocation5 + $0x3f0] sm:$0xff] }
 0x929   :  { %v5771_v6 = vpop.eup %5770 }
 0x92a   :  { %v5773_v58 = vpop.eup %5772  ;;  %v1007_v9 = vmul.f32 %v5771_v6, %v6185_v12  ;;  %v1474_v6 = vld [vmem:[#allocation5 + $0x3f8] sm:$0xff] }
 0x92b   :  { %v1006_v11 = vmul.f32 %v5773_v58, %v6188_v22  ;;  %v1562_v58 = vld [vmem:[#allocation5] sm:$0xff] }
 0x92c   :  { %v1015_v14 = vmul.f32 %v3700_v7, %v1007_v9  ;;  %v1563_v9 = vld [vmem:[#allocation5 + $0x8] sm:$0xff] }
 0x92d   :  { %v1014_v15 = vmul.f32 %v3700_v7, %v1006_v11  ;;  %v5289_v7 = vpack.c.bf16 %v1474_v6, %v1473_v59  ;;  %v1564_v11 = vld [vmem:[#allocation5 + $0x10] sm:$0xff] }
 0x92e   :  { %v1023_v18 = vadd.f32 %v3701_v13, %v1015_v14  ;;  %v1565_v14 = vld [vmem:[#allocation5 + $0x18] sm:$0xff]  ;;  %v1576_v6 = vld [vmem:[#allocation5 + $0x70] sm:$0xff] }
 0x92f   :  { %v1022_v17 = vadd.f32 %v3701_v13, %v1014_v15  ;;  %v5293_v13 = vpack.c.bf16 %v1563_v9, %v1562_v58  ;;  %v5297_v15 = vpack.c.bf16 %v1565_v14, %v1564_v11 }
 0x931   :  { %4447 = vmatprep.mubr.f32.mxu0 %v1022_v17  ;;  %4482 = vmatprep.mubr.f32.mxu1 %v1022_v17  ;;  %v1566_v17 = vld [vmem:[#allocation5 + $0x20] sm:$0xff] }
 0x932   :  { %4448 = vmatmul.mubr.f32.vlgmr.msra.gmra.mrb[6].mxu0 %v1023_v18  ;;  %4483 = vmatmul.mubr.f32.vlgmr.msra.gmra.mrb[10].mxu1 %v1023_v18  ;;  %v1567_v18 = vld [vmem:[#allocation5 + $0x28] sm:$0xff] }
 0x933   :  { %4489 = vmatprep.mubr.msk.f32.mxu0 %vm772_vm9, %v6210_v20  ;;  %5294 = vmatprep.subr.bf16.mxu1 %v5293_v13 }
 0x934   :  { %5296 = vmatpush3.bf16.msra.mxu1 %v5293_v13  ;;  %v3723_v13 = vld [vmem:[%s6476_s4 + $0xf] ss:$0 sm:$0xff] }
 0x935   :  { %5298 = vmatprep.subr.bf16.mxu1 %v5297_v15 }
 0x938   :  { %5300 = vmatpush3.bf16.msra.mxu1 %v5297_v15 }
 0xa05   :  { %v4449_v12 = vpop.f32.mrb[6].mxu0  ;;  %v4484_v22 = vpop.f32.mrb[10].mxu1 }
 0xa06   :  { %v1221_v23 = vadd.f32 %v4484_v22, %v3705_v21  ;;  %v1115_v16 = vpop.f32.mrb[7].mxu0  ;;  %v1215_v24 = vpop.f32.mrb[11].mxu1  ;;  %v1121_v33 = vadd.f32 %v4449_v12, %v3703_v32  ;;  %v1568_v12 = vld [vmem:[#allocation5 + $0x30] sm:$0xff]  ;;  %v1569_v22 = vld [vmem:[#allocation5 + $0x38] sm:$0xff] }
 0xa07   :  { %v1216_v25 = vadd.f32 %v3705_v21, %v1215_v24  ;;  %v1116_v35 = vadd.f32 %v3703_v32, %v1115_v16  ;;  %v5301_v21 = vpack.c.bf16 %v1567_v18, %v1566_v17  ;;  %v1570_v16 = vld [vmem:[#allocation5 + $0x40] sm:$0xff]  ;;  %v1571_v24 = vld [vmem:[#allocation5 + $0x48] sm:$0xff] }
 0xa08   :  { %v3707_v26 = vmul.f32 -1.442695, %v1221_v23  ;;  %v5305_v23 = vpack.c.bf16 %v1569_v22, %v1568_v12  ;;  %v3713_v32 = vld [vmem:[%s6476_s4 + $0xb] ss:$0 sm:$0xff] }
 0xa09   :  { %v3706_v27 = vmul.f32 -1.442695, %v1216_v25  ;;  %5302 = vmatprep.subr.bf16.mxu1 %v5301_v21  ;;  %v5309_v25 = vpack.c.bf16 %v1571_v24, %v1570_v16  ;;  %v1706_v24 = vld [vmem:[#allocation5 + $0x408] sm:$0xff] }
 0xa0a   :  { %5774 = vpow2.f32 %v3707_v26  ;;  %5304 = vmatpush3.bf16.msra.mxu1 %v5301_v21  ;;  %v1572_v26 = vld [vmem:[#allocation5 + $0x50] sm:$0xff]  ;;  %v3724_v21 = vld [vmem:[%s6476_s4] ss:$0 sm:$0xff] }
 0xa0b   :  { %5776 = vpow2.f32 %v3706_v27  ;;  %5306 = vmatprep.subr.bf16.mxu1 %v5305_v23  ;;  %v1573_v27 = vld [vmem:[#allocation5 + $0x58] sm:$0xff] }
 0xa0e   :  { %5308 = vmatpush3.bf16.msra.mxu1 %v5305_v23 }
 0xa0f   :  { %5310 = vmatprep.subr.bf16.mxu1 %v5309_v25 }
 0xa12   :  { %5312 = vmatpush3.bf16.msra.mxu1 %v5309_v25  ;;  %v1707_v25 = vld [vmem:[#allocation5 + $0x410] sm:$0xff] }
 0xa14   :  { %v5775_v28 = vpop.eup %5774 }
 0xa15   :  { %v5777_v29 = vpop.eup %5776  ;;  %v1231_v30 = vadd.f32 1.0, %v5775_v28  ;;  %v5313_v28 = vpack.c.bf16 %v1573_v27, %v1572_v26  ;;  %v1708_v27 = vld [vmem:[#allocation5 + $0x418] sm:$0xff] }
 0xa16   :  { %v1230_v31 = vadd.f32 1.0, %v5777_v29  ;;  %v1574_v29 = vld [vmem:[#allocation5 + $0x60] sm:$0xff] }
 0xa17   :  { %5778 = vrcp.f32 %v1231_v30  ;;  %v1575_v30 = vld [vmem:[#allocation5 + $0x68] sm:$0xff]  ;;  %5314 = vmatprep.subr.bf16.mxu1 %v5313_v28 }
 0xa18   :  { %5780 = vrcp.f32 %v1230_v31  ;;  %v5317_v31 = vpack.c.bf16 %v1575_v30, %v1574_v29  ;;  %5316 = vmatpush3.bf16.msra.mxu1 %v5313_v28  ;;  %v1709_v28 = vld [vmem:[#allocation5 + $0x420] sm:$0xff]  ;;  %v1710_v29 = vld [vmem:[#allocation5 + $0x428] sm:$0xff] }
 0xa19   :  { %v5333_v30 = vpack.c.bf16 %v1710_v29, %v1709_v28  ;;  %v1852_v28 = vld [vmem:[#allocation5 + $0x498] sm:$0xff] }
 0xa1a   :  { %5318 = vmatprep.subr.bf16.mxu1 %v5317_v31 }
 0xa1c   :  { %5320 = vmatpush3.bf16.msra.mxu1 %v5317_v31 }
 0xa21   :  { %v5779_v34 = vpop.eup %5778 }
 0xa22   :  { %v5781_v36 = vpop.eup %5780  ;;  %v6224_v37 = vmul.f32 %v5779_v34, %v1121_v33  ;;  %v3715_v33 = vld [vmem:[%s6476_s4 + $0xc] ss:$0 sm:$0xff] }
 0xa23   :  { %v6228_v38 = vmul.f32 %v5781_v36, %v1116_v35 }
 0xa24   :  { %v1419_v36 = vmul.f32 %v3715_v33, %v6224_v37 }
 0xa25   :  { %v5253_v39 = vpack.c.bf16 %v6224_v37, %v6228_v38  ;;  %v1418_v41 = vmul.f32 %v3715_v33, %v6228_v38 }
 0xa27   :  { %5254 = vmatprep.subr.bf16.mxu0 %v5253_v39 }
 0xa28   :  { %5256 = vmatpush3.bf16.msra.mxu0 %v5253_v39 }
 0xa29   :  { %5258 = vmatprep.subr.bf16.mxu0 %v5253_v39 }
 0xa2b   :  { %4490 = vmatmul.mubr.msk.f32.vlgmr.msra.gmra.mrb[8].mxu0 %vm772_vm9, %v6236_v40 }
 0xa2c   :  { %5260 = vmatpush3.bf16.msra.mxu0 %v5253_v39  ;;  %4496 = vmatprep.mubr.msk.f32.mxu0 %vm772_vm9, %v6239_v60 }
 0xa2d   :  { %5262 = vmatprep.subr.bf16.mxu0 %v5261_v42 }
 0xa2f   :  { %4497 = vmatmul.mubr.msk.f32.vlgmr.msra.gmra.mrb[10].mxu0 %vm772_vm9, %v6246_v56 }
 0xa30   :  { %5264 = vmatpush3.bf16.msra.mxu0 %v5261_v42  ;;  %v3717_v42 = vld [vmem:[%s6476_s4 + $0xd] ss:$0 sm:$0xff] }
 0xa31   :  { %5266 = vmatprep.subr.bf16.mxu0 %v5265_v45 }
 0xa34   :  { %5268 = vmatpush3.bf16.msra.mxu0 %v5265_v45 }
 0xa35   :  { %5270 = vmatprep.subr.bf16.mxu0 %v5269_v48 }
 0xa38   :  { %5272 = vmatpush3.bf16.msra.mxu0 %v5269_v48  ;;  %v3719_v48 = vld [vmem:[%s6476_s4 + $0xe] ss:$0 sm:$0xff] }
 0xa39   :  { %5274 = vmatprep.subr.bf16.mxu0 %v5273_v51 }
 0xa3c   :  { %5276 = vmatpush3.bf16.msra.mxu0 %v5273_v51 }
 0xa3d   :  { %5278 = vmatprep.subr.bf16.mxu0 %v5277_v63 }
 0xa40   :  { %5280 = vmatpush3.bf16.msra.mxu0 %v5277_v63 }
 0xa41   :  { %5282 = vmatprep.subr.bf16.mxu0 %v5281_v2 }
 0xa44   :  { %5284 = vmatpush3.bf16.msra.mxu0 %v5281_v2 }
 0xa45   :  { %5286 = vmatprep.subr.bf16.mxu0 %v5285_v5 }
 0xa48   :  { %5288 = vmatpush3.bf16.msra.mxu0 %v5285_v5 }
 0xa49   :  { %5290 = vmatprep.subr.bf16.mxu0 %v5289_v7 }
 0xa4c   :  { %5292 = vmatpush3.bf16.msra.mxu0 %v5289_v7  ;;  %v1577_v7 = vld [vmem:[#allocation5 + $0x78] sm:$0xff] }
 0xa4d   :  { %v5321_v58 = vpack.c.bf16 %v1577_v7, %v1576_v6  ;;  %v3727_v7 = vld [vmem:[%s6476_s4 + $0x10] ss:$0 sm:$0xff] }
 0xa4f   :  { %5322 = vmatprep.subr.bf16.mxu1 %v5321_v58 }
 0xa50   :  { %5324 = vmatpush3.bf16.msra.mxu1 %v5321_v58 }
 0xafe   :  { %v4491_v34 = vpop.f32.mrb[8].mxu0 }
 0xaff   :  { %v1409_v35 = vmul.f32 %v4491_v34, %v3713_v32  ;;  %v1310_v39 = vpop.f32.mrb[9].mxu0 }
 0xb00   :  { %v1408_v57 = vmul.f32 %v3713_v32, %v1310_v39 }
 0xb01   :  { %v1421_v43 = vadd.f32 %v1419_v36, %v1409_v35 }
 0xb02   :  { %v1420_v44 = vadd.f32 %v1418_v41, %v1408_v57  ;;  %v4498_v45 = vpop.f32.mrb[10].mxu0 }
 0xb03   :  { %v1431_v46 = vmul.f32 %v4498_v45, %v3717_v42  ;;  %v1391_v47 = vpop.f32.mrb[11].mxu0 }
 0xb04   :  { %v1430_v49 = vmul.f32 %v3717_v42, %v1391_v47  ;;  %v1714_v47 = vld [vmem:[#allocation5 + $0x448] sm:$0xff] }
 0xb05   :  { %v1433_v50 = vadd.f32 %v1431_v46, %v1421_v43  ;;  %v1711_v43 = vld [vmem:[#allocation5 + $0x430] sm:$0xff]  ;;  %v1713_v46 = vld [vmem:[#allocation5 + $0x440] sm:$0xff] }
 0xb06   :  { %v1432_v37 = vadd.f32 %v1430_v49, %v1420_v44  ;;  %v1712_v44 = vld [vmem:[#allocation5 + $0x438] sm:$0xff]  ;;  %v5341_v49 = vpack.c.bf16 %v1714_v47, %v1713_v46 }
 0xb07   :  { %v1443_v51 = vadd.f32 %v3719_v48, %v1433_v50  ;;  %v5337_v45 = vpack.c.bf16 %v1712_v44, %v1711_v43  ;;  %v1716_v50 = vld [vmem:[#allocation5 + $0x458] sm:$0xff] }
 0xb08   :  { %v1442_v52 = vadd.f32 %v3719_v48, %v1432_v37  ;;  %v1715_v48 = vld [vmem:[#allocation5 + $0x450] sm:$0xff] }
 0xb09   :  { %v3721_v62 = vmul.f32 -1.442695, %v1443_v51  ;;  %v5345_v37 = vpack.c.bf16 %v1716_v50, %v1715_v48 }
 0xb0a   :  { %v3720_v38 = vmul.f32 -1.442695, %v1442_v52 }
 0xb0b   :  { %5782 = vpow2.f32 %v3721_v62 }
 0xb0c   :  { %5784 = vpow2.f32 %v3720_v38  ;;  %v1719_v38 = vld [vmem:[#allocation5 + $0x470] sm:$0xff] }
 0xb15   :  { %v5783_v63 = vpop.eup %5782 }
 0xb16   :  { %v5785_v0 = vpop.eup %5784  ;;  %v1451_v1 = vadd.f32 1.0, %v5783_v63  ;;  %v1720_v63 = vld [vmem:[#allocation5 + $0x478] sm:$0xff] }
 0xb17   :  { %v1450_v2 = vadd.f32 1.0, %v5785_v0  ;;  %v5353_v0 = vpack.c.bf16 %v1720_v63, %v1719_v38  ;;  %v1955_v38 = vld [vmem:[#allocation5 + $0x530] sm:$0xff]  ;;  %v1956_v63 = vld [vmem:[#allocation5 + $0x538] sm:$0xff] }
 0xb18   :  { %5786 = vrcp.f32 %v1451_v1 }
 0xb19   :  { %5788 = vrcp.f32 %v1450_v2 }
 0xb22   :  { %v5787_v3 = vpop.eup %5786 }
 0xb23   :  { %v5789_v4 = vpop.eup %5788  ;;  %v1457_v59 = vmul.f32 %v5787_v3, %v1443_v51  ;;  %v1717_v51 = vld [vmem:[#allocation5 + $0x460] sm:$0xff] }
 0xb24   :  { %v1456_v5 = vmul.f32 %v5789_v4, %v1442_v52  ;;  %v1718_v52 = vld [vmem:[#allocation5 + $0x468] sm:$0xff] }
 0xb25   :  { %v5349_v62 = vpack.c.bf16 %v1718_v52, %v1717_v51  ;;  %v1855_v51 = vld [vmem:[#allocation5 + $0x4b0] sm:$0xff]  ;;  %v1856_v52 = vld [vmem:[#allocation5 + $0x4b8] sm:$0xff] }
 0xb26   :  { %4531 = vmatprep.mubr.f32.mxu0 %v1456_v5 }
 0xb27   :  { %4532 = vmatmul.mubr.f32.vlgmr.msra.gmra.mrb[12].mxu0 %v1457_v59 }
 0xbfa   :  { %v4533_v9 = vpop.f32.mrb[12].mxu0 }
 0xbfb   :  { %v1551_v11 = vadd.f32 %v4533_v9, %v6178_v53  ;;  %v1541_v14 = vpop.f32.mrb[13].mxu0  ;;  %v1705_v53 = vld [vmem:[#allocation5 + $0x400] sm:$0xff] }
 0xbfc   :  { %v1550_v15 = vadd.f32 %v1541_v14, %v6180_v54  ;;  %v5325_v26 = vpack.c.bf16 %v1706_v24, %v1705_v53  ;;  %v5329_v54 = vpack.c.bf16 %v1708_v27, %v1707_v25  ;;  %v1849_v53 = vld [vmem:[#allocation5 + $0x480] sm:$0xff]  ;;  %v1850_v24 = vld [vmem:[#allocation5 + $0x488] sm:$0xff] }
 0xbfd   :  { %v1561_v18 = vadd.f32 %v3723_v13, %v1551_v11  ;;  %v1949_v25 = vld [vmem:[#allocation5 + $0x500] sm:$0xff]  ;;  %v1950_v27 = vld [vmem:[#allocation5 + $0x508] sm:$0xff] }
 0xbfe   :  { %v1560_v17 = vadd.f32 %v3723_v13, %v1550_v15  ;;  %5326 = vmatprep.subr.bf16.mxu0 %v5325_v26  ;;  %v3728_v13 = vld [vmem:[%s6476_s4 + $0x11] ss:$0 sm:$0xff]  ;;  %v5389_v29 = vpack.c.bf16 %v1950_v27, %v1949_v25  ;;  %v1964_v25 = vld [vmem:[#allocation5 + $0x578] sm:$0xff] }
 0xbff   :  { %5328 = vmatpush3.bf16.msra.mxu0 %v5325_v26  ;;  %v5357_v26 = vpack.c.bf16 %v1850_v24, %v1849_v53  ;;  %v1864_v53 = vld [vmem:[#allocation5 + $0x4f8] sm:$0xff]  ;;  %v1963_v24 = vld [vmem:[#allocation5 + $0x570] sm:$0xff] }
 0xc00   :  { %4566 = vmatprep.mubr.f32.mxu1 %v1560_v17  ;;  %5330 = vmatprep.subr.bf16.mxu0 %v5329_v54  ;;  %v5417_v27 = vpack.c.bf16 %v1964_v25, %v1963_v24 }
 0xc01   :  { %4567 = vmatmul.mubr.f32.vlgmr.msra.gmra.mrb[12].mxu1 %v1561_v18  ;;  %5358 = vmatprep.subr.bf16.mxu1 %v5357_v26 }
 0xc02   :  { %5360 = vmatpush3.bf16.msra.mxu1 %v5357_v26 }
 0xc03   :  { %5332 = vmatpush3.bf16.msra.mxu0 %v5329_v54  ;;  %v1851_v54 = vld [vmem:[#allocation5 + $0x490] sm:$0xff] }
 0xc04   :  { %5334 = vmatprep.subr.bf16.mxu0 %v5333_v30 }
 0xc07   :  { %5336 = vmatpush3.bf16.msra.mxu0 %v5333_v30  ;;  %v5361_v30 = vpack.c.bf16 %v1852_v28, %v1851_v54  ;;  %v2049_v54 = vld [vmem:[#allocation5 + $0x580] sm:$0xff]  ;;  %v2050_v28 = vld [vmem:[#allocation5 + $0x588] sm:$0xff] }
 0xc08   :  { %5338 = vmatprep.subr.bf16.mxu0 %v5337_v45 }
 0xc09   :  { %5362 = vmatprep.subr.bf16.mxu1 %v5361_v30 }
 0xc0a   :  { %5364 = vmatpush3.bf16.msra.mxu1 %v5361_v30 }
 0xc0b   :  { %5340 = vmatpush3.bf16.msra.mxu0 %v5337_v45 }
 0xc0c   :  { %5342 = vmatprep.subr.bf16.mxu0 %v5341_v49 }
 0xc0f   :  { %5344 = vmatpush3.bf16.msra.mxu0 %v5341_v49 }
 0xc10   :  { %5346 = vmatprep.subr.bf16.mxu0 %v5345_v37 }
 0xc13   :  { %5348 = vmatpush3.bf16.msra.mxu0 %v5345_v37 }
 0xc14   :  { %5350 = vmatprep.subr.bf16.mxu0 %v5349_v62 }
 0xc17   :  { %5352 = vmatpush3.bf16.msra.mxu0 %v5349_v62  ;;  %v5369_v62 = vpack.c.bf16 %v1856_v52, %v1855_v51  ;;  %v2053_v52 = vld [vmem:[#allocation5 + $0x5a0] sm:$0xff] }
 0xc18   :  { %5354 = vmatprep.subr.bf16.mxu0 %v5353_v0 }
 0xc1b   :  { %5356 = vmatpush3.bf16.msra.mxu0 %v5353_v0  ;;  %v5401_v0 = vpack.c.bf16 %v1956_v63, %v1955_v38  ;;  %v2056_v38 = vld [vmem:[#allocation5 + $0x5b8] sm:$0xff] }
 0xc1c   :  { %5390 = vmatprep.subr.bf16.mxu0 %v5389_v29 }
 0xcd4   :  { %v4568_v12 = vpop.f32.mrb[12].mxu1 }
 0xcd5   :  { %v1657_v22 = vadd.f32 %v4568_v12, %v3724_v21  ;;  %v1651_v23 = vpop.f32.mrb[13].mxu1 }
 0xcd6   :  { %v1652_v16 = vadd.f32 %v3724_v21, %v1651_v23  ;;  %v3730_v21 = vld [vmem:[%s6476_s4 + $0x12] ss:$0 sm:$0xff] }
 0xcd7   :  { %1666 = vadd.xlane.f32.xlu1 %v1657_v22 }
 0xcd8   :  { %1664 = vadd.xlane.f32.xlu0 %v1652_v16 }
 0xd64   :  { %v1667_v31 = vpop.xlane.xlu1 %1666 }
 0xd65   :  { %v1669_v32 = vmul.f32 0.0125, %v1667_v31  ;;  %v1665_v33 = vpop.xlane.xlu0 %1664  ;;  %v1951_v31 = vld [vmem:[#allocation5 + $0x510] sm:$0xff] }
 0xd66   :  { %v1668_v34 = vmul.f32 0.0125, %v1665_v33  ;;  %v1853_v33 = vld [vmem:[#allocation5 + $0x4a0] sm:$0xff] }
 0xd67   :  { %v1671_v35 = vsub.f32 %v1657_v22, %v1669_v32  ;;  %v1952_v32 = vld [vmem:[#allocation5 + $0x518] sm:$0xff] }
 0xd68   :  { %v1670_v36 = vsub.f32 %v1652_v16, %v1668_v34  ;;  %v5393_v34 = vpack.c.bf16 %v1952_v32, %v1951_v31 }
 0xd69   :  { %v1673_v39 = vmul.f32 %v1671_v35, %v1671_v35 }
 0xd6a   :  { %v1672_v57 = vmul.f32 %v1670_v36, %v1670_v36 }
 0xd6b   :  { %v1675_v41 = vsel %vm90_vm0, %v1673_v39, 0.0  ;;  %v1954_v39 = vld [vmem:[#allocation5 + $0x528] sm:$0xff] }
 0xd6c   :  { %1678 = vadd.xlane.f32.xlu1 %v1675_v41  ;;  %v1674_v42 = vsel %vm90_vm0, %v1672_v57, 0.0 }
 0xd6d   :  { %1676 = vadd.xlane.f32.xlu0 %v1674_v42 }
 0xdf9   :  { %v1679_v1 = vpop.xlane.xlu1 %1678 }
 0xdfa   :  { %v1681_v2 = vmul.f32 0.0125, %v1679_v1  ;;  %v1677_v3 = vpop.xlane.xlu0 %1676  ;;  %v1857_v1 = vld [vmem:[#allocation5 + $0x4c0] sm:$0xff] }
 0xdfb   :  { %v1680_v4 = vmul.f32 0.0125, %v1677_v3 }
 0xdfc   :  { %v1683_v5 = vadd.f32 1e-05, %v1681_v2  ;;  %v1858_v2 = vld [vmem:[#allocation5 + $0x4c8] sm:$0xff] }
 0xdfd   :  { %v1682_v59 = vadd.f32 1e-05, %v1680_v4  ;;  %v5373_v3 = vpack.c.bf16 %v1858_v2, %v1857_v1  ;;  %v1957_v4 = vld [vmem:[#allocation5 + $0x540] sm:$0xff]  ;;  %v2058_v1 = vld [vmem:[#allocation5 + $0x5c8] sm:$0xff] }
 0xdfe   :  { %5790 = vrsqrt.f32 %v1683_v5  ;;  %v1958_v5 = vld [vmem:[#allocation5 + $0x548] sm:$0xff] }
 0xdff   :  { %5792 = vrsqrt.f32 %v1682_v59  ;;  %v1859_v59 = vld [vmem:[#allocation5 + $0x4d0] sm:$0xff] }
 0xe08   :  { %v5791_v6 = vpop.eup %5790 }
 0xe09   :  { %v5793_v58 = vpop.eup %5792  ;;  %v1687_v9 = vmul.f32 %v5791_v6, %v1671_v35  ;;  %v1854_v35 = vld [vmem:[#allocation5 + $0x4a8] sm:$0xff]  ;;  %v5405_v6 = vpack.c.bf16 %v1958_v5, %v1957_v4  ;;  %v2060_v4 = vld [vmem:[#allocation5 + $0x5d8] sm:$0xff] }
 0xe0a   :  { %v1686_v11 = vmul.f32 %v5793_v58, %v1670_v36  ;;  %v1953_v36 = vld [vmem:[#allocation5 + $0x520] sm:$0xff]  ;;  %v5365_v57 = vpack.c.bf16 %v1854_v35, %v1853_v33  ;;  %v1959_v58 = vld [vmem:[#allocation5 + $0x550] sm:$0xff] }
 0xe0b   :  { %v1695_v14 = vmul.f32 %v3727_v7, %v1687_v9  ;;  %v5397_v41 = vpack.c.bf16 %v1954_v39, %v1953_v36  ;;  %v1960_v9 = vld [vmem:[#allocation5 + $0x558] sm:$0xff]  ;;  %v3733_v39 = vld [vmem:[%s6476_s4 + $0x13] ss:$0 sm:$0xff] }
 0xe0c   :  { %v1694_v15 = vmul.f32 %v3727_v7, %v1686_v11  ;;  %5366 = vmatprep.subr.bf16.mxu1 %v5365_v57  ;;  %v1860_v7 = vld [vmem:[#allocation5 + $0x4d8] sm:$0xff] }
 0xe0d   :  { %v1703_v18 = vadd.f32 %v3728_v13, %v1695_v14  ;;  %5368 = vmatpush3.bf16.msra.mxu1 %v5365_v57  ;;  %v5377_v11 = vpack.c.bf16 %v1860_v7, %v1859_v59  ;;  %v1861_v14 = vld [vmem:[#allocation5 + $0x4e0] sm:$0xff] }
 0xe0e   :  { %v1702_v17 = vadd.f32 %v3728_v13, %v1694_v15  ;;  %5370 = vmatprep.subr.bf16.mxu1 %v5369_v62  ;;  %v5409_v13 = vpack.c.bf16 %v1960_v9, %v1959_v58  ;;  %v1862_v15 = vld [vmem:[#allocation5 + $0x4e8] sm:$0xff]  ;;  %v2061_v59 = vld [vmem:[#allocation5 + $0x5e0] sm:$0xff]  ;;  %v2063_v58 = vld [vmem:[#allocation5 + $0x5f0] sm:$0xff] }
 0xe0f   :  { %v2064_v9 = vld [vmem:[#allocation5 + $0x5f8] sm:$0xff] }
 0xe10   :  { %4601 = vmatprep.mubr.f32.mxu0 %v1702_v17  ;;  %v1961_v17 = vld [vmem:[#allocation5 + $0x560] sm:$0xff] }
 0xe11   :  { %4602 = vmatmul.mubr.f32.vlgmr.msra.gmra.mrb[14].mxu0 %v1703_v18  ;;  %5372 = vmatpush3.bf16.msra.mxu1 %v5369_v62  ;;  %v1962_v18 = vld [vmem:[#allocation5 + $0x568] sm:$0xff] }
 0xe12   :  { %5392 = vmatpush3.bf16.msra.mxu0 %v5389_v29  ;;  %5374 = vmatprep.subr.bf16.mxu1 %v5373_v3  ;;  %v5421_v29 = vpack.c.bf16 %v2050_v28, %v2049_v54  ;;  %v2054_v62 = vld [vmem:[#allocation5 + $0x5a8] sm:$0xff]  ;;  %v3740_v54 = vld [vmem:[%s6476_s4 + $0x17] ss:$0 sm:$0xff] }
 0xe13   :  { %5394 = vmatprep.subr.bf16.mxu0 %v5393_v34 }
 0xe15   :  { %5376 = vmatpush3.bf16.msra.mxu1 %v5373_v3  ;;  %v2059_v3 = vld [vmem:[#allocation5 + $0x5d0] sm:$0xff] }
 0xe16   :  { %5396 = vmatpush3.bf16.msra.mxu0 %v5393_v34  ;;  %5378 = vmatprep.subr.bf16.mxu1 %v5377_v11  ;;  %v5441_v5 = vpack.c.bf16 %v2060_v4, %v2059_v3  ;;  %v2339_v4 = vld [vmem:[#allocation5 + $0x640] sm:$0xff] }
 0xe17   :  { %5398 = vmatprep.subr.bf16.mxu0 %v5397_v41 }
 0xe19   :  { %5380 = vmatpush3.bf16.msra.mxu1 %v5377_v11  ;;  %v5449_v11 = vpack.c.bf16 %v2064_v9, %v2063_v58  ;;  %v2343_v9 = vld [vmem:[#allocation5 + $0x660] sm:$0xff] }
 0xe1a   :  { %5400 = vmatpush3.bf16.msra.mxu0 %v5397_v41 }
 0xe1b   :  { %5402 = vmatprep.subr.bf16.mxu0 %v5401_v0 }
 0xe1e   :  { %5404 = vmatpush3.bf16.msra.mxu0 %v5401_v0  ;;  %v2057_v0 = vld [vmem:[#allocation5 + $0x5c0] sm:$0xff] }
 0xe1f   :  { %5406 = vmatprep.subr.bf16.mxu0 %v5405_v6  ;;  %v5437_v2 = vpack.c.bf16 %v2058_v1, %v2057_v0  ;;  %v2337_v1 = vld [vmem:[#allocation5 + $0x630] sm:$0xff] }
 0xe22   :  { %5408 = vmatpush3.bf16.msra.mxu0 %v5405_v6  ;;  %v2062_v6 = vld [vmem:[#allocation5 + $0x5e8] sm:$0xff] }
 0xe23   :  { %5410 = vmatprep.subr.bf16.mxu0 %v5409_v13  ;;  %v5445_v7 = vpack.c.bf16 %v2062_v6, %v2061_v59  ;;  %v2341_v6 = vld [vmem:[#allocation5 + $0x650] sm:$0xff] }
 0xe26   :  { %5412 = vmatpush3.bf16.msra.mxu0 %v5409_v13  ;;  %v3738_v13 = vld [vmem:[%s6476_s4 + $0x16] ss:$0 sm:$0xff] }
 0xee4   :  { %v4603_v12 = vpop.f32.mrb[14].mxu0 }
 0xee5   :  { %v6285_v22 = vadd.f32 %v4603_v12, %v3730_v21  ;;  %v1795_v23 = vpop.f32.mrb[15].mxu0  ;;  %v5413_v12 = vpack.c.bf16 %v1962_v18, %v1961_v17 }
 0xee6   :  { %v6287_v16 = vadd.f32 %v3730_v21, %v1795_v23  ;;  %v5381_v21 = vpack.c.bf16 %v1862_v15, %v1861_v14  ;;  %v1863_v23 = vld [vmem:[#allocation5 + $0x4f0] sm:$0xff] }
 0xee7   :  { %1810 = vadd.xlane.f32.xlu1 %v6285_v22  ;;  %v5385_v26 = vpack.c.bf16 %v1864_v53, %v1863_v23  ;;  %5414 = vmatprep.subr.bf16.mxu0 %v5413_v12  ;;  %v3736_v14 = vld [vmem:[%s6476_s4 + $0x15] ss:$0 sm:$0xff] }
 0xee8   :  { %1808 = vadd.xlane.f32.xlu0 %v6287_v16  ;;  %5382 = vmatprep.subr.bf16.mxu1 %v5381_v21 }
 0xee9   :  { %5384 = vmatpush3.bf16.msra.mxu1 %v5381_v21  ;;  %5416 = vmatpush3.bf16.msra.mxu0 %v5413_v12 }
 0xeea   :  { %5386 = vmatprep.subr.bf16.mxu1 %v5385_v26  ;;  %5418 = vmatprep.subr.bf16.mxu0 %v5417_v27 }
 0xeed   :  { %5388 = vmatpush3.bf16.msra.mxu1 %v5385_v26  ;;  %5420 = vmatpush3.bf16.msra.mxu0 %v5417_v27 }
 0xeee   :  { %5422 = vmatprep.subr.bf16.mxu1 %v5421_v29 }
 0xf74   :  { %v1811_v42 = vpop.xlane.xlu1 %1810 }
 0xf75   :  { %v1813_v43 = vmul.f32 0.0125, %v1811_v42  ;;  %v1809_v44 = vpop.xlane.xlu0 %1808 }
 0xf76   :  { %v1812_v45 = vmul.f32 0.0125, %v1809_v44 }
 0xf77   :  { %v6292_v46 = vsub.f32 %v6285_v22, %v1813_v43  ;;  %v3734_v43 = vld [vmem:[%s6476_s4 + $0x14] ss:$0 sm:$0xff] }
 0xf78   :  { %v6295_v47 = vsub.f32 %v6287_v16, %v1812_v45 }
 0xf79   :  { %v1817_v48 = vmul.f32 %v6292_v46, %v6292_v46 }
 0xf7a   :  { %v1816_v49 = vmul.f32 %v6295_v47, %v6295_v47 }
 0xf7b   :  { %v1819_v50 = vsel %vm90_vm0, %v1817_v48, 0.0  ;;  %v2051_v48 = vld [vmem:[#allocation5 + $0x590] sm:$0xff] }
 0xf7c   :  { %1822 = vadd.xlane.f32.xlu1 %v1819_v50  ;;  %v1818_v37 = vsel %vm90_vm0, %v1816_v49, 0.0  ;;  %v2052_v49 = vld [vmem:[#allocation5 + $0x598] sm:$0xff] }
 0xf7d   :  { %1820 = vadd.xlane.f32.xlu0 %v1818_v37  ;;  %v5425_v51 = vpack.c.bf16 %v2052_v49, %v2051_v48 }
0x1009   :  { %v1823_v30 = vpop.xlane.xlu1 %1822 }
0x100a   :  { %v1825_v31 = vmul.f32 0.0125, %v1823_v30  ;;  %v1821_v32 = vpop.xlane.xlu0 %1820 }
0x100b   :  { %v1824_v33 = vmul.f32 0.0125, %v1821_v32 }
0x100c   :  { %v1827_v34 = vadd.f32 1e-05, %v1825_v31 }
0x100d   :  { %v1826_v35 = vadd.f32 1e-05, %v1824_v33 }
0x100e   :  { %5794 = vrsqrt.f32 %v1827_v34 }
0x100f   :  { %5796 = vrsqrt.f32 %v1826_v35 }
0x1018   :  { %v5795_v36 = vpop.eup %5794 }
0x1019   :  { %v5797_v57 = vpop.eup %5796  ;;  %v1831_v41 = vmul.f32 %v5795_v36, %v6292_v46  ;;  %v5429_v46 = vpack.c.bf16 %v2054_v62, %v2053_v52  ;;  %v2333_v52 = vld [vmem:[#allocation5 + $0x610] sm:$0xff] }
0x101a   :  { %v1830_v42 = vmul.f32 %v5797_v57, %v6295_v47  ;;  %v2055_v47 = vld [vmem:[#allocation5 + $0x5b0] sm:$0xff] }
0x101b   :  { %v1839_v44 = vmul.f32 %v3733_v39, %v1831_v41  ;;  %v5433_v63 = vpack.c.bf16 %v2056_v38, %v2055_v47  ;;  %v2335_v38 = vld [vmem:[#allocation5 + $0x620] sm:$0xff] }
0x101c   :  { %v1838_v45 = vmul.f32 %v3733_v39, %v1830_v42 }
0x101d   :  { %v1847_v37 = vadd.f32 %v3734_v43, %v1839_v44 }
0x101e   :  { %v1846_v50 = vadd.f32 %v3734_v43, %v1838_v45 }
0x1020   :  { %4636 = vmatprep.mubr.f32.mxu1 %v1846_v50  ;;  %4671 = vmatprep.mubr.f32.mxu0 %v1846_v50 }
0x1021   :  { %4637 = vmatmul.mubr.f32.vlgmr.msra.gmra.mrb[14].mxu1 %v1847_v37  ;;  %4672 = vmatmul.mubr.f32.vlgmr.msra.gmra.mrb[16].mxu0 %v1847_v37 }
0x1022   :  { %5424 = vmatpush3.bf16.msra.mxu1 %v5421_v29  ;;  %4706 = vmatprep.mubr.f32.mxu1 %v1846_v50 }
0x1023   :  { %5426 = vmatprep.subr.bf16.mxu1 %v5425_v51 }
0x1026   :  { %5428 = vmatpush3.bf16.msra.mxu1 %v5425_v51  ;;  %v2332_v51 = vld [vmem:[#allocation5 + $0x608] sm:$0xff] }
0x1027   :  { %5430 = vmatprep.subr.bf16.mxu1 %v5429_v46 }
0x102a   :  { %5432 = vmatpush3.bf16.msra.mxu1 %v5429_v46  ;;  %v2334_v46 = vld [vmem:[#allocation5 + $0x618] sm:$0xff] }
0x102b   :  { %5434 = vmatprep.subr.bf16.mxu1 %v5433_v63  ;;  %v5465_v47 = vpack.c.bf16 %v2334_v46, %v2333_v52 }
0x102e   :  { %5436 = vmatpush3.bf16.msra.mxu1 %v5433_v63  ;;  %v2336_v63 = vld [vmem:[#allocation5 + $0x628] sm:$0xff] }
0x102f   :  { %5438 = vmatprep.subr.bf16.mxu1 %v5437_v2  ;;  %v5469_v0 = vpack.c.bf16 %v2336_v63, %v2335_v38 }
0x1032   :  { %5440 = vmatpush3.bf16.msra.mxu1 %v5437_v2  ;;  %v2338_v2 = vld [vmem:[#allocation5 + $0x638] sm:$0xff] }
0x1033   :  { %5442 = vmatprep.subr.bf16.mxu1 %v5441_v5  ;;  %v5473_v3 = vpack.c.bf16 %v2338_v2, %v2337_v1  ;;  %v2485_v2 = vld [vmem:[#allocation5 + $0x6b0] sm:$0xff] }
0x1036   :  { %5444 = vmatpush3.bf16.msra.mxu1 %v5441_v5  ;;  %v2340_v5 = vld [vmem:[#allocation5 + $0x648] sm:$0xff] }
0x1037   :  { %5446 = vmatprep.subr.bf16.mxu1 %v5445_v7  ;;  %v5477_v59 = vpack.c.bf16 %v2340_v5, %v2339_v4  ;;  %v2585_v4 = vld [vmem:[#allocation5 + $0x730] sm:$0xff] }
0x103a   :  { %5448 = vmatpush3.bf16.msra.mxu1 %v5445_v7  ;;  %v2342_v7 = vld [vmem:[#allocation5 + $0x658] sm:$0xff] }
0x103b   :  { %5450 = vmatprep.subr.bf16.mxu1 %v5449_v11  ;;  %v5481_v58 = vpack.c.bf16 %v2342_v7, %v2341_v6  ;;  %v2487_v7 = vld [vmem:[#allocation5 + $0x6c0] sm:$0xff] }
0x103e   :  { %5452 = vmatpush3.bf16.msra.mxu1 %v5449_v11  ;;  %v2344_v11 = vld [vmem:[#allocation5 + $0x668] sm:$0xff] }
0x1041   :  { %4707 = vmatmul.mubr.f32.vlgmr.msra.gmra.mrb[16].mxu1 %v1847_v37  ;;  %v2331_v37 = vld [vmem:[#allocation5 + $0x600] sm:$0xff] }
0x1042   :  { %v5461_v62 = vpack.c.bf16 %v2332_v51, %v2331_v37 }
0x1044   :  { %5462 = vmatprep.subr.bf16.mxu0 %v5461_v62 }
0x1045   :  { %5464 = vmatpush3.bf16.msra.mxu0 %v5461_v62 }
0x1046   :  { %5466 = vmatprep.subr.bf16.mxu0 %v5465_v47 }
0x1049   :  { %5468 = vmatpush3.bf16.msra.mxu0 %v5465_v47 }
0x104a   :  { %5470 = vmatprep.subr.bf16.mxu0 %v5469_v0 }
0x104d   :  { %5472 = vmatpush3.bf16.msra.mxu0 %v5469_v0 }
0x104e   :  { %5474 = vmatprep.subr.bf16.mxu0 %v5473_v3 }
0x1051   :  { %5476 = vmatpush3.bf16.msra.mxu0 %v5473_v3  ;;  %v2486_v3 = vld [vmem:[#allocation5 + $0x6b8] sm:$0xff] }
0x1052   :  { %5478 = vmatprep.subr.bf16.mxu0 %v5477_v59  ;;  %v5505_v5 = vpack.c.bf16 %v2486_v3, %v2485_v2 }
0x1055   :  { %5480 = vmatpush3.bf16.msra.mxu0 %v5477_v59  ;;  %v2586_v59 = vld [vmem:[#allocation5 + $0x738] sm:$0xff] }
0x1056   :  { %5482 = vmatprep.subr.bf16.mxu0 %v5481_v58  ;;  %v5537_v6 = vpack.c.bf16 %v2586_v59, %v2585_v4 }
0x1059   :  { %5484 = vmatpush3.bf16.msra.mxu0 %v5481_v58  ;;  %v2488_v58 = vld [vmem:[#allocation5 + $0x6c8] sm:$0xff] }
0x10f4   :  { %v4638_v15 = vpop.f32.mrb[14].mxu1  ;;  %v4673_v17 = vpop.f32.mrb[16].mxu0 }
0x10f5   :  { %v2045_v18 = vadd.f32 %v4673_v17, %v3738_v13  ;;  %v1939_v21 = vpop.f32.mrb[15].mxu1  ;;  %v2039_v12 = vpop.f32.mrb[17].mxu0  ;;  %v1945_v26 = vadd.f32 %v4638_v15, %v3736_v14  ;;  %v2346_v15 = vld [vmem:[#allocation5 + $0x678] sm:$0xff] }
0x10f6   :  { %v1940_v23 = vadd.f32 %v3736_v14, %v1939_v21  ;;  %v2040_v53 = vadd.f32 %v3738_v13, %v2039_v12  ;;  %v5485_v13 = vpack.c.bf16 %v2344_v11, %v2343_v9  ;;  %v2345_v14 = vld [vmem:[#allocation5 + $0x670] sm:$0xff]  ;;  %v2587_v9 = vld [vmem:[#allocation5 + $0x740] sm:$0xff]  ;;  %v5509_v11 = vpack.c.bf16 %v2488_v58, %v2487_v7 }
0x10f7   :  { %v2149_v27 = vmul.f32 0.1118034, %v1945_v26  ;;  %v5489_v17 = vpack.c.bf16 %v2346_v15, %v2345_v14  ;;  %v2489_v14 = vld [vmem:[#allocation5 + $0x6d0] sm:$0xff]  ;;  %v2490_v15 = vld [vmem:[#allocation5 + $0x6d8] sm:$0xff] }
0x10f8   :  { %v2148_v24 = vmul.f32 0.1118034, %v1940_v23  ;;  %v5453_v25 = vpack.c.bf16 %v2045_v18, %v2040_v53  ;;  %5486 = vmatprep.subr.bf16.mxu0 %v5485_v13 }
0x10f9   :  { %5488 = vmatpush3.bf16.msra.mxu0 %v5485_v13  ;;  %v2588_v13 = vld [vmem:[#allocation5 + $0x748] sm:$0xff] }
0x10fa   :  { %5454 = vmatprep.subr.bf16.mxu1 %v5453_v25  ;;  %4713 = vmatprep.mubr.f32.mxu1 %v2148_v24 }
0x10fb   :  { %5456 = vmatpush3.bf16.xpose.msra.mxu1 %v5453_v25  ;;  %5490 = vmatprep.subr.bf16.mxu0 %v5489_v17 }
0x10fd   :  { %5492 = vmatpush3.bf16.msra.mxu0 %v5489_v17  ;;  %v5541_v17 = vpack.c.bf16 %v2588_v13, %v2587_v9 }
0x1102   :  { %4714 = vmatmul.mubr.f32.vlgmr.msra.gmra.mrb[18].mxu1 %v2149_v27 }
0x1114   :  { %v4708_v28 = vpop.f32.mrb[16].mxu1 }
0x1115   :  { %v2145_v29 = vadd.f32 %v4708_v28, %v3740_v54  ;;  %v2139_v30 = vpop.f32.mrb[17].mxu1 }
0x1116   :  { %v2140_v31 = vadd.f32 %v3740_v54, %v2139_v30  ;;  %v3744_v54 = vld [vmem:[%s6476_s4 + $0x18] ss:$0 sm:$0xff] }
0x1118   :  { %v5457_v32 = vpack.c.bf16 %v2145_v29, %v2140_v31 }
0x111a   :  { %5458 = vmatprep.subr.bf16.mxu1 %v5457_v32 }
0x111b   :  { %5460 = vmatpush3.bf16.msra.mxu1 %v5457_v32 }
0x11d5   :  { %v4715_v33 = vpop.f32.mrb[18].mxu1 }
0x11d6   :  { %v2226_v34 = vsel %vm6155_vm7, %v4715_v33, -1e+30  ;;  %v2216_v35 = vpop.f32.mrb[19].mxu1  ;;  %v2479_v33 = vld [vmem:[#allocation5 + $0x680] sm:$0xff]  ;;  %vm5959_vm7 = vmmov 0  }
0x11d7   :  { %v2225_v36 = vsel %vm6159_vm8, %v2216_v35, -1e+30  ;;  %v2230_v39 = vsel %vm772_vm9, %v2226_v34, -inf  ;;  %v2579_v35 = vld [vmem:[#allocation5 + $0x700] sm:$0xff] }
0x11d8   :  { %2231 = vmax.xlane.f32.xlu1 %v2230_v39  ;;  %v2227_v57 = vsel %vm772_vm9, %v2225_v36, -inf  ;;  %v2580_v39 = vld [vmem:[#allocation5 + $0x708] sm:$0xff] }
0x11d9   :  { %2228 = vmax.xlane.f32.xlu0 %v2227_v57  ;;  %v2481_v57 = vld [vmem:[#allocation5 + $0x690] sm:$0xff] }
0x1265   :  { %v2232_v41 = vpop.xlane.xlu1 %2231 }
0x1266   :  { %v2234_v42 = vsub.f32 %v2226_v34, %v2232_v41  ;;  %v2229_v43 = vpop.xlane.xlu0 %2228  ;;  %v2480_v34 = vld [vmem:[#allocation5 + $0x688] sm:$0xff]  ;;  %v2482_v41 = vld [vmem:[#allocation5 + $0x698] sm:$0xff] }
0x1267   :  { %v2233_v44 = vsub.f32 %v2225_v36, %v2229_v43  ;;  %v5493_v36 = vpack.c.bf16 %v2480_v34, %v2479_v33  ;;  %v2581_v43 = vld [vmem:[#allocation5 + $0x710] sm:$0xff]  ;;  %v2594_v33 = vld [vmem:[#allocation5 + $0x778] sm:$0xff] }
0x1268   :  { %v2237_v45 = vmul.f32 1.442695, %v2234_v42  ;;  %v5525_v42 = vpack.c.bf16 %v2580_v39, %v2579_v35 }
0x1269   :  { %v2235_v48 = vmul.f32 1.442695, %v2233_v44  ;;  %v2582_v44 = vld [vmem:[#allocation5 + $0x718] sm:$0xff]  ;;  %5494 = vmatprep.subr.bf16.mxu1 %v5493_v36 }
0x126a   :  { %5798 = vpow2.f32 %v2237_v45  ;;  %v5529_v45 = vpack.c.bf16 %v2582_v44, %v2581_v43  ;;  %5526 = vmatprep.subr.bf16.mxu0 %v5525_v42  ;;  %v3747_v44 = vld [vmem:[%s6476_s4 + $0x19] ss:$0 sm:$0xff] }
0x126b   :  { %5800 = vpow2.f32 %v2235_v48  ;;  %v2484_v48 = vld [vmem:[#allocation5 + $0x6a8] sm:$0xff] }
0x1274   :  { %v5799_v8 = vpop.eup %5798 }
0x1275   :  { %v5801_v49 = vpop.eup %5800  ;;  %v2242_v50 = vsel %vm772_vm9, %v5799_v8, 0.0 }
0x1276   :  { %2243 = vadd.xlane.f32.xlu1 %v2242_v50  ;;  %v2239_v61 = vsel %vm772_vm9, %v5801_v49, 0.0 }
0x1277   :  { %2240 = vadd.xlane.f32.xlu0 %v2239_v61 }
0x1303   :  { %v2244_v18 = vpop.xlane.xlu1 %2243 }
0x1304   :  { %5802 = vrcp.f32 %v2244_v18  ;;  %v2241_v21 = vpop.xlane.xlu0 %2240  ;;  %v5513_v18 = vpack.c.bf16 %v2490_v15, %v2489_v14  ;;  %v2901_v14 = vld [vmem:[#allocation5 + $0x780] sm:$0xff]  ;;  %v2902_v15 = vld [vmem:[#allocation5 + $0x788] sm:$0xff] }
0x1305   :  { %5804 = vrcp.f32 %v2241_v21  ;;  %v2589_v21 = vld [vmem:[#allocation5 + $0x750] sm:$0xff] }
0x130e   :  { %v5803_v12 = vpop.eup %5802 }
0x130f   :  { %v5805_v23 = vpop.eup %5804  ;;  %v2248_v24 = vmul.f32 %v5803_v12, %v5799_v8  ;;  %v2583_v8 = vld [vmem:[#allocation5 + $0x720] sm:$0xff]  ;;  %v2590_v12 = vld [vmem:[#allocation5 + $0x758] sm:$0xff] }
0x1310   :  { %v2247_v53 = vmul.f32 %v5805_v23, %v5801_v49  ;;  %v2584_v49 = vld [vmem:[#allocation5 + $0x728] sm:$0xff]  ;;  %v2491_v23 = vld [vmem:[#allocation5 + $0x6e0] sm:$0xff] }
0x1311   :  { %v5533_v61 = vpack.c.bf16 %v2584_v49, %v2583_v8  ;;  %v3748_v8 = vld [vmem:[%s6476_s4 + $0x1a] ss:$0 sm:$0xff] }
0x1312   :  { %4720 = vmatprep.mubr.msk.f32.mxu1 %vm772_vm9, %v2247_v53  ;;  %v5545_v53 = vpack.c.bf16 %v2590_v12, %v2589_v21  ;;  %v2904_v21 = vld [vmem:[#allocation5 + $0x798] sm:$0xff] }
0x1313   :  { %4721 = vmatmul.mubr.msk.f32.vlgmr.msra.gmra.mrb[20].mxu1 %vm772_vm9, %v2248_v24  ;;  %v2492_v24 = vld [vmem:[#allocation5 + $0x6e8] sm:$0xff] }
0x1314   :  { %5496 = vmatpush3.bf16.msra.mxu1 %v5493_v36 }
0x13e6   :  { %v4722_v25 = vpop.f32.mrb[20].mxu1 }
0x13e7   :  { %v2321_v26 = vpop.f32.mrb[21].mxu1 }
0x13e8   :  { %4755 = vmatprep.mubr.f32.mxu0 %v2321_v26  ;;  %v2592_v26 = vld [vmem:[#allocation5 + $0x768] sm:$0xff] }
0x13e9   :  { %4756 = vmatmul.mubr.f32.vlgmr.msra.gmra.mrb[18].mxu0 %v4722_v25  ;;  %v2591_v25 = vld [vmem:[#allocation5 + $0x760] sm:$0xff] }
0x13ea   :  { %5528 = vmatpush3.bf16.msra.mxu0 %v5525_v42 }
0x13eb   :  { %5530 = vmatprep.subr.bf16.mxu0 %v5529_v45 }
0x13ee   :  { %5532 = vmatpush3.bf16.msra.mxu0 %v5529_v45 }
0x13ef   :  { %5534 = vmatprep.subr.bf16.mxu0 %v5533_v61 }
0x13f2   :  { %5536 = vmatpush3.bf16.msra.mxu0 %v5533_v61 }
0x13f3   :  { %5538 = vmatprep.subr.bf16.mxu0 %v5537_v6 }
0x13f6   :  { %5540 = vmatpush3.bf16.msra.mxu0 %v5537_v6 }
0x13f7   :  { %5542 = vmatprep.subr.bf16.mxu0 %v5541_v17 }
0x13fa   :  { %5544 = vmatpush3.bf16.msra.mxu0 %v5541_v17  ;;  %v5565_v17 = vpack.c.bf16 %v2902_v15, %v2901_v14 }
0x13fb   :  { %5546 = vmatprep.subr.bf16.mxu0 %v5545_v53 }
0x13fe   :  { %5548 = vmatpush3.bf16.msra.mxu0 %v5545_v53  ;;  %v2906_v53 = vld [vmem:[#allocation5 + $0x7a8] sm:$0xff] }
0x14bc   :  { %v4757_v27 = vpop.f32.mrb[18].mxu0 }
0x14bd   :  { %v2423_v28 = vadd.f32 %v4757_v27, %v6285_v22  ;;  %v2413_v29 = vpop.f32.mrb[19].mxu0  ;;  %v5497_v22 = vpack.c.bf16 %v2482_v41, %v2481_v57  ;;  %v5517_v27 = vpack.c.bf16 %v2492_v24, %v2491_v23  ;;  %v2905_v23 = vld [vmem:[#allocation5 + $0x7a0] sm:$0xff]  ;;  %v2907_v24 = vld [vmem:[#allocation5 + $0x7b0] sm:$0xff] }
0x14be   :  { %v2422_v30 = vadd.f32 %v2413_v29, %v6287_v16  ;;  %v2483_v16 = vld [vmem:[#allocation5 + $0x6a0] sm:$0xff]  ;;  %v2494_v29 = vld [vmem:[#allocation5 + $0x6f8] sm:$0xff] }
0x14bf   :  { %v6337_v31 = vadd.f32 %v3744_v54, %v2423_v28  ;;  %5498 = vmatprep.subr.bf16.mxu1 %v5497_v22  ;;  %v5501_v50 = vpack.c.bf16 %v2484_v48, %v2483_v16  ;;  %v2493_v28 = vld [vmem:[#allocation5 + $0x6f0] sm:$0xff] }
0x14c0   :  { %v6339_v32 = vadd.f32 %v3744_v54, %v2422_v30  ;;  %5500 = vmatpush3.bf16.msra.mxu1 %v5497_v22  ;;  %v5549_v54 = vpack.c.bf16 %v2592_v26, %v2591_v25  ;;  %v2593_v30 = vld [vmem:[#allocation5 + $0x770] sm:$0xff]  ;;  %v5521_v34 = vpack.c.bf16 %v2494_v29, %v2493_v28  ;;  %v2910_v26 = vld [vmem:[#allocation5 + $0x7c8] sm:$0xff]  ;;  %v2912_v28 = vld [vmem:[#allocation5 + $0x7d8] sm:$0xff] }
0x14c1   :  { %2440 = vadd.xlane.f32.xlu1 %v6337_v31  ;;  %5502 = vmatprep.subr.bf16.mxu1 %v5501_v50  ;;  %v5553_v35 = vpack.c.bf16 %v2594_v33, %v2593_v30  ;;  %v2913_v30 = vld [vmem:[#allocation5 + $0x7e0] sm:$0xff]  ;;  %v2914_v33 = vld [vmem:[#allocation5 + $0x7e8] sm:$0xff] }
0x14c2   :  { %2438 = vadd.xlane.f32.xlu0 %v6339_v32  ;;  %5550 = vmatprep.subr.bf16.mxu0 %v5549_v54 }
0x14c3   :  { %5552 = vmatpush3.bf16.msra.mxu0 %v5549_v54  ;;  %v2911_v54 = vld [vmem:[#allocation5 + $0x7d0] sm:$0xff] }
0x14c4   :  { %5504 = vmatpush3.bf16.msra.mxu1 %v5501_v50  ;;  %5554 = vmatprep.subr.bf16.mxu0 %v5553_v35  ;;  %v5585_v29 = vpack.c.bf16 %v2912_v28, %v2911_v54  ;;  %v3018_v28 = vld [vmem:[#allocation5 + $0x470] sm:$0xff] }
0x14c5   :  { %5506 = vmatprep.subr.bf16.mxu1 %v5505_v5 }
0x14c7   :  { %5556 = vmatpush3.bf16.msra.mxu0 %v5553_v35  ;;  %v2915_v35 = vld [vmem:[#allocation5 + $0x7f0] sm:$0xff] }
0x14c8   :  { %5508 = vmatpush3.bf16.msra.mxu1 %v5505_v5 }
0x14c9   :  { %5510 = vmatprep.subr.bf16.mxu1 %v5509_v11 }
0x14cc   :  { %5512 = vmatpush3.bf16.msra.mxu1 %v5509_v11 }
0x14cd   :  { %5514 = vmatprep.subr.bf16.mxu1 %v5513_v18 }
0x14d0   :  { %5516 = vmatpush3.bf16.msra.mxu1 %v5513_v18  ;;  %v2903_v18 = vld [vmem:[#allocation5 + $0x790] sm:$0xff] }
0x14d1   :  { %5518 = vmatprep.subr.bf16.mxu1 %v5517_v27  ;;  %v5569_v12 = vpack.c.bf16 %v2904_v21, %v2903_v18 }
0x14d4   :  { %5520 = vmatpush3.bf16.msra.mxu1 %v5517_v27 }
0x14d5   :  { %5522 = vmatprep.subr.bf16.mxu1 %v5521_v34 }
0x14d8   :  { %5524 = vmatpush3.bf16.msra.mxu1 %v5521_v34  ;;  %v5589_v34 = vpack.c.bf16 %v2914_v33, %v2913_v30 }
0x154e   :  { %v2441_v37 = vpop.xlane.xlu1 %2440 }
0x154f   :  { %v2443_v51 = vmul.f32 0.0125, %v2441_v37  ;;  %v2439_v52 = vpop.xlane.xlu0 %2438 }
0x1550   :  { %v2442_v62 = vmul.f32 0.0125, %v2439_v52 }
0x1551   :  { %v6344_v46 = vsub.f32 %v6337_v31, %v2443_v51  ;;  %v3752_v51 = vld [vmem:[%s6476_s4 + $0x1c] ss:$0 sm:$0xff] }
0x1552   :  { %v6347_v47 = vsub.f32 %v6339_v32, %v2442_v62 }
0x1553   :  { %v2447_v38 = vmul.f32 %v6344_v46, %v6344_v46 }
0x1554   :  { %v2446_v63 = vmul.f32 %v6347_v47, %v6347_v47 }
0x1555   :  { %v2449_v0 = vsel %vm90_vm0, %v2447_v38, 0.0 }
0x1556   :  { %2452 = vadd.xlane.f32.xlu1 %v2449_v0  ;;  %v2448_v1 = vsel %vm90_vm0, %v2446_v63, 0.0 }
0x1557   :  { %2450 = vadd.xlane.f32.xlu0 %v2448_v1 }
0x15e3   :  { %v2453_v36 = vpop.xlane.xlu1 %2452 }
0x15e4   :  { %v2455_v39 = vmul.f32 0.0125, %v2453_v36  ;;  %v2451_v57 = vpop.xlane.xlu0 %2450  ;;  %v2916_v36 = vld [vmem:[#allocation5 + $0x7f8] sm:$0xff] }
0x15e5   :  { %v2454_v41 = vmul.f32 0.0125, %v2451_v57  ;;  %v3004_v57 = vld [vmem:[#allocation5 + $0x400] sm:$0xff] }
0x15e6   :  { %v2457_v42 = vadd.f32 1e-05, %v2455_v39  ;;  %v5593_v39 = vpack.c.bf16 %v2916_v36, %v2915_v35  ;;  %v3770_v35 = vld [vmem:[%s6476_s4 + $0x21] ss:$0 sm:$0xff] }
0x15e7   :  { %v2456_v22 = vadd.f32 1e-05, %v2454_v41  ;;  %v3005_v41 = vld [vmem:[#allocation5 + $0x408] sm:$0xff] }
0x15e8   :  { %5806 = vrsqrt.f32 %v2457_v42  ;;  %v3006_v42 = vld [vmem:[#allocation5 + $0x410] sm:$0xff] }
0x15e9   :  { %5808 = vrsqrt.f32 %v2456_v22  ;;  %v5597_v22 = vpack.c.bf16 %v3005_v41, %v3004_v57 }
0x15eb   :  { %5598 = vmatprep.subr.bf16.mxu0 %v5597_v22 }
0x15f2   :  { %v5807_v43 = vpop.eup %5806 }
0x15f3   :  { %v5809_v16 = vpop.eup %5808  ;;  %v2461_v45 = vmul.f32 %v5807_v43, %v6344_v46  ;;  %v3007_v43 = vld [vmem:[#allocation5 + $0x418] sm:$0xff] }
0x15f4   :  { %v2460_v48 = vmul.f32 %v5809_v16, %v6347_v47  ;;  %v3008_v16 = vld [vmem:[#allocation5 + $0x420] sm:$0xff] }
0x15f5   :  { %v2469_v49 = vmul.f32 %v3747_v44, %v2461_v45  ;;  %v3009_v45 = vld [vmem:[#allocation5 + $0x428] sm:$0xff] }
0x15f6   :  { %v2468_v50 = vmul.f32 %v3747_v44, %v2460_v48  ;;  %v5601_v44 = vpack.c.bf16 %v3007_v43, %v3006_v42  ;;  %v5605_v48 = vpack.c.bf16 %v3009_v45, %v3008_v16  ;;  %v3772_v42 = vld [vmem:[%s6476_s4 + $0x12] ss:$0 sm:$0xff] }
0x15f7   :  { %v2477_v37 = vadd.f32 %v3748_v8, %v2469_v49  ;;  %v3011_v49 = vld [vmem:[#allocation5 + $0x438] sm:$0xff] }
0x15f8   :  { %v2476_v61 = vadd.f32 %v3748_v8, %v2468_v50  ;;  %v3010_v8 = vld [vmem:[#allocation5 + $0x430] sm:$0xff] }
0x15f9   :  { %v5609_v50 = vpack.c.bf16 %v3011_v49, %v3010_v8 }
0x15fa   :  { %4790 = vmatprep.mubr.f32.mxu1 %v2476_v61  ;;  %4825 = vmatprep.mubr.f32.mxu0 %v2476_v61  ;;  %v3012_v61 = vld [vmem:[#allocation5 + $0x440] sm:$0xff] }
0x15fb   :  { %4791 = vmatmul.mubr.f32.vlgmr.msra.gmra.mrb[22].mxu1 %v2477_v37  ;;  %4826 = vmatmul.mubr.f32.vlgmr.msra.gmra.mrb[20].mxu0 %v2477_v37  ;;  %v3013_v37 = vld [vmem:[#allocation5 + $0x448] sm:$0xff] }
0x15fc   :  { %4832 = vmatprep.mubr.msk.f32.mxu1 %vm772_vm9, %v6210_v20  ;;  %v3750_v20 = vld [vmem:[%s6476_s4 + $0x1b] ss:$0 sm:$0xff]  ;;  %5600 = vmatpush3.bf16.msra.mxu0 %v5597_v22 }
0x15fd   :  { %5602 = vmatprep.subr.bf16.mxu0 %v5601_v44 }
0x1600   :  { %5604 = vmatpush3.bf16.msra.mxu0 %v5601_v44 }
0x1601   :  { %5606 = vmatprep.subr.bf16.mxu0 %v5605_v48 }
0x1604   :  { %5608 = vmatpush3.bf16.msra.mxu0 %v5605_v48 }
0x1605   :  { %5610 = vmatprep.subr.bf16.mxu0 %v5609_v50 }
0x1608   :  { %5612 = vmatpush3.bf16.msra.mxu0 %v5609_v50 }
0x16ce   :  { %v4792_v52 = vpop.f32.mrb[22].mxu1  ;;  %v4827_v62 = vpop.f32.mrb[20].mxu0 }
0x16cf   :  { %v2675_v46 = vadd.f32 %v4827_v62, %v3752_v51  ;;  %v2569_v47 = vpop.f32.mrb[23].mxu1  ;;  %v2669_v38 = vpop.f32.mrb[21].mxu0  ;;  %v2575_v59 = vadd.f32 %v4792_v52, %v3750_v20  ;;  %v3014_v52 = vld [vmem:[#allocation5 + $0x450] sm:$0xff]  ;;  %v3015_v62 = vld [vmem:[#allocation5 + $0x458] sm:$0xff] }
0x16d0   :  { %v2670_v63 = vadd.f32 %v3752_v51, %v2669_v38  ;;  %v2570_v7 = vadd.f32 %v3750_v20, %v2569_v47  ;;  %v5613_v51 = vpack.c.bf16 %v3013_v37, %v3012_v61  ;;  %v3016_v47 = vld [vmem:[#allocation5 + $0x460] sm:$0xff]  ;;  %v3017_v38 = vld [vmem:[#allocation5 + $0x468] sm:$0xff] }
0x16d1   :  { %v3754_v0 = vmul.f32 -1.442695, %v2675_v46  ;;  %v5617_v46 = vpack.c.bf16 %v3015_v62, %v3014_v52  ;;  %v5958_v52 = vmov 0.0|0.0  }
0x16d2   :  { %v3753_v1 = vmul.f32 -1.442695, %v2670_v63  ;;  %5614 = vmatprep.subr.bf16.mxu0 %v5613_v51  ;;  %v5621_v63 = vpack.c.bf16 %v3017_v38, %v3016_v47 }
0x16d3   :  { %5810 = vpow2.f32 %v3754_v0  ;;  %5616 = vmatpush3.bf16.msra.mxu0 %v5613_v51  ;;  %v3760_v0 = vld [vmem:[%s6476_s4 + $0x1d] ss:$0 sm:$0xff] }
0x16d4   :  { %5812 = vpow2.f32 %v3753_v1  ;;  %5618 = vmatprep.subr.bf16.mxu0 %v5617_v46  ;;  %v3762_v1 = vld [vmem:[%s6476_s4 + $0x1e] ss:$0 sm:$0xff] }
0x16d7   :  { %5620 = vmatpush3.bf16.msra.mxu0 %v5617_v46 }
0x16d8   :  { %5622 = vmatprep.subr.bf16.mxu0 %v5621_v63 }
0x16db   :  { %5624 = vmatpush3.bf16.msra.mxu0 %v5621_v63 }
0x16dd   :  { %v5811_v2 = vpop.eup %5810 }
0x16de   :  { %v5813_v3 = vpop.eup %5812  ;;  %v2685_v4 = vadd.f32 1.0, %v5811_v2 }
0x16df   :  { %v2684_v5 = vadd.f32 1.0, %v5813_v3 }
0x16e0   :  { %5814 = vrcp.f32 %v2685_v4 }
0x16e1   :  { %5816 = vrcp.f32 %v2684_v5 }
0x16ea   :  { %v5815_v6 = vpop.eup %5814 }
0x16eb   :  { %v5817_v58 = vpop.eup %5816  ;;  %v6373_v9 = vmul.f32 %v5815_v6, %v2575_v59  ;;  %v3764_v6 = vld [vmem:[%s6476_s4 + $0x1f] ss:$0 sm:$0xff] }
0x16ec   :  { %v6375_v11 = vmul.f32 %v5817_v58, %v2570_v7 }
0x16ed   :  { %v2861_v4 = vmul.f32 %v3762_v1, %v6373_v9 }
0x16ee   :  { %v5557_v13 = vpack.c.bf16 %v6373_v9, %v6375_v11  ;;  %v2860_v59 = vmul.f32 %v3762_v1, %v6375_v11  ;;  %v144_v1 = vadd.s32 1, %v6137_v55 }
0x16f0   :  { %5558 = vmatprep.subr.bf16.mxu1 %v5557_v13 }
0x16f1   :  { %5560 = vmatpush3.bf16.msra.mxu1 %v5557_v13 }
0x16f2   :  { %5562 = vmatprep.subr.bf16.mxu1 %v5557_v13 }
0x16f4   :  { %4833 = vmatmul.mubr.msk.f32.vlgmr.msra.gmra.mrb[24].mxu1 %vm772_vm9, %v6236_v40  ;;  %v5573_v40 = vpack.c.bf16 %v2906_v53, %v2905_v23 }
0x16f5   :  { %5564 = vmatpush3.bf16.msra.mxu1 %v5557_v13  ;;  %4839 = vmatprep.mubr.msk.f32.mxu1 %vm772_vm9, %v6239_v60  ;;  %v2908_v60 = vld [vmem:[#allocation5 + $0x7b8] sm:$0xff] }
0x16f6   :  { %5566 = vmatprep.subr.bf16.mxu1 %v5565_v17  ;;  %v5577_v25 = vpack.c.bf16 %v2908_v60, %v2907_v24 }
0x16f8   :  { %4840 = vmatmul.mubr.msk.f32.vlgmr.msra.gmra.mrb[26].mxu1 %vm772_vm9, %v6246_v56  ;;  %v2909_v56 = vld [vmem:[#allocation5 + $0x7c0] sm:$0xff] }
0x16f9   :  { %5568 = vmatpush3.bf16.msra.mxu1 %v5565_v17  ;;  %v5581_v27 = vpack.c.bf16 %v2910_v26, %v2909_v56  ;;  %v3766_v17 = vld [vmem:[%s6476_s4 + $0x20] ss:$0 sm:$0xff] }
0x16fa   :  { %5570 = vmatprep.subr.bf16.mxu1 %v5569_v12 }
0x16fd   :  { %5572 = vmatpush3.bf16.msra.mxu1 %v5569_v12 }
0x16fe   :  { %5574 = vmatprep.subr.bf16.mxu1 %v5573_v40 }
0x1701   :  { %5576 = vmatpush3.bf16.msra.mxu1 %v5573_v40 }
0x1702   :  { %5578 = vmatprep.subr.bf16.mxu1 %v5577_v25 }
0x1705   :  { %5580 = vmatpush3.bf16.msra.mxu1 %v5577_v25 }
0x1706   :  { %5582 = vmatprep.subr.bf16.mxu1 %v5581_v27 }
0x1709   :  { %5584 = vmatpush3.bf16.msra.mxu1 %v5581_v27 }
0x170a   :  { %5586 = vmatprep.subr.bf16.mxu1 %v5585_v29 }
0x170d   :  { %5588 = vmatpush3.bf16.msra.mxu1 %v5585_v29  ;;  %v3019_v29 = vld [vmem:[#allocation5 + $0x478] sm:$0xff] }
0x170e   :  { %5590 = vmatprep.subr.bf16.mxu1 %v5589_v34  ;;  %v5625_v30 = vpack.c.bf16 %v3019_v29, %v3018_v28  ;;  %v3229_v28 = vld [vmem:[#allocation7 + $0x50] sm:$0xff]  ;;  %v3230_v29 = vld [vmem:[#allocation7 + $0x58] sm:$0xff] }
0x1710   :  { %5626 = vmatprep.subr.bf16.mxu0 %v5625_v30 }
0x1711   :  { %5592 = vmatpush3.bf16.msra.mxu1 %v5589_v34  ;;  %5628 = vmatpush3.bf16.msra.mxu0 %v5625_v30  ;;  %v5648_v30 = vpack.c.bf16 %v3230_v29, %v3229_v28  ;;  %v3330_v28 = vld [vmem:[#allocation8 + $0x88] sm:$0xff] }
0x1712   :  { %5594 = vmatprep.subr.bf16.mxu1 %v5593_v39 }
0x1715   :  { %5596 = vmatpush3.bf16.msra.mxu1 %v5593_v39 }
0x1716   :  { %5629 = vmatprep.subr.bf16.mxu1 %v5958_v52 }
0x17c7   :  { %v4834_v2 = vpop.f32.mrb[24].mxu1 }
0x17c8   :  { %v2851_v3 = vmul.f32 %v4834_v2, %v3760_v0  ;;  %v2758_v5 = vpop.f32.mrb[25].mxu1 }
0x17c9   :  { %v2850_v20 = vmul.f32 %v3760_v0, %v2758_v5  ;;  %v145_v5 = vmul.u32 8, %v144_v1  ;;  %v3349_v1 = vld [vmem:[#allocation8 + $0x120] sm:$0xff] }
0x17ca   :  { %v2863_v7 = vadd.f32 %v2861_v4, %v2851_v3  ;;  %v3775_v3 = vld [vmem:[%s6476_s4 + $0x22] ss:$0 sm:$0xff]  ;;  %v142_v4 = vmul.u32 8, %v6137_v55 }
0x17cb   :  { %v2862_v58 = vadd.f32 %v2860_v59, %v2850_v20  ;;  %v4841_v13 = vpop.f32.mrb[26].mxu1  ;;  %vm146_vm8 = vcmp.lt.s32.totalorder %v6102_v10, %v145_v5 }
0x17cc   :  { %v2873_v14 = vmul.f32 %v4841_v13, %v3764_v6  ;;  %v2833_v15 = vpop.f32.mrb[27].mxu1 }
0x17cd   :  { %v2872_v18 = vmul.f32 %v3764_v6, %v2833_v15 }
0x17ce   :  { %v2875_v21 = vadd.f32 %v2873_v14, %v2863_v7  ;;  %v3776_v7 = vld [vmem:[%s6476_s4 + $0x23] ss:$0 sm:$0xff] }
0x17cf   :  { %v2874_v9 = vadd.f32 %v2872_v18, %v2862_v58  ;;  %v3220_v18 = vld [vmem:[#allocation7 + $0x8] sm:$0xff] }
0x17d0   :  { %v2885_v12 = vadd.f32 %v3766_v17, %v2875_v21 }
0x17d1   :  { %v2884_v23 = vadd.f32 %v3766_v17, %v2874_v9  ;;  %v3219_v17 = vld [vmem:[#allocation7] sm:$0xff] }
0x17d2   :  { %v3768_v53 = vmul.f32 -1.442695, %v2885_v12 }
0x17d3   :  { %v3767_v11 = vmul.f32 -1.442695, %v2884_v23 }
0x17d4   :  { %5818 = vpow2.f32 %v3768_v53  ;;  %v3222_v53 = vld [vmem:[#allocation7 + $0x18] sm:$0xff] }
0x17d5   :  { %5820 = vpow2.f32 %v3767_v11 }
0x17de   :  { %v5819_v40 = vpop.eup %5818 }
0x17df   :  { %v5821_v24 = vpop.eup %5820  ;;  %v2893_v60 = vadd.f32 1.0, %v5819_v40  ;;  %v3224_v40 = vld [vmem:[#allocation7 + $0x28] sm:$0xff] }
0x17e0   :  { %v2892_v25 = vadd.f32 1.0, %v5821_v24 }
0x17e1   :  { %5822 = vrcp.f32 %v2893_v60  ;;  %v3225_v60 = vld [vmem:[#allocation7 + $0x30] sm:$0xff] }
0x17e2   :  { %5824 = vrcp.f32 %v2892_v25  ;;  %v3226_v25 = vld [vmem:[#allocation7 + $0x38] sm:$0xff] }
0x17eb   :  { %v5823_v56 = vpop.eup %5822 }
0x17ec   :  { %v5825_v26 = vpop.eup %5824  ;;  %v2899_v54 = vmul.f32 %v5823_v56, %v2885_v12  ;;  %v5633_v12 = vpack.c.bf16 %v3220_v18, %v3219_v17  ;;  %v5642_v56 = vpack.c.bf16 %v3226_v25, %v3225_v60  ;;  %v3363_v17 = vld [vmem:[#allocation8 + $0x190] sm:$0xff]  ;;  %v3320_v60 = vld [vmem:[#allocation8 + $0x38] sm:$0xff]  ;;  %v3326_v25 = vld [vmem:[#allocation8 + $0x68] sm:$0xff] }
0x17ed   :  { %v2898_v27 = vmul.f32 %v5825_v26, %v2884_v23  ;;  %v3221_v23 = vld [vmem:[#allocation7 + $0x10] sm:$0xff]  ;;  %v3227_v26 = vld [vmem:[#allocation7 + $0x40] sm:$0xff] }
0x17ee   :  { %v5636_v11 = vpack.c.bf16 %v3222_v53, %v3221_v23  ;;  %v3379_v23 = vld [vmem:[#allocation8 + $0x210] sm:$0xff]  ;;  %v3373_v53 = vld [vmem:[#allocation8 + $0x1e0] sm:$0xff] }
0x17ef   :  { %4874 = vmatprep.mubr.f32.mxu1 %v2898_v27  ;;  %v3228_v27 = vld [vmem:[#allocation7 + $0x48] sm:$0xff] }
0x17f0   :  { %4875 = vmatmul.mubr.f32.vlgmr.msra.gmra.mrb[28].mxu1 %v2899_v54  ;;  %v5645_v54 = vpack.c.bf16 %v3228_v27, %v3227_v26 }
0x17f1   :  { %4916 = vmatprep.mubr.msk.f32.mxu1 %vm5959_vm7, %v5957_v19 }
0x18c3   :  { %v4876_v33 = vpop.f32.mrb[28].mxu1 }
0x18c4   :  { %v2993_v34 = vadd.f32 %v4876_v33, %v6337_v31  ;;  %v2983_v36 = vpop.f32.mrb[29].mxu1  ;;  %v3231_v33 = vld [vmem:[#allocation7 + $0x60] sm:$0xff] }
0x18c5   :  { %v2992_v39 = vadd.f32 %v2983_v36, %v6339_v32  ;;  %v3233_v36 = vld [vmem:[#allocation7 + $0x70] sm:$0xff] }
0x18c6   :  { %v3003_v41 = vadd.f32 %v3770_v35, %v2993_v34  ;;  %v3232_v34 = vld [vmem:[#allocation7 + $0x68] sm:$0xff] }
0x18c7   :  { %v3002_v57 = vadd.f32 %v3770_v35, %v2992_v39  ;;  %v5651_v35 = vpack.c.bf16 %v3232_v34, %v3231_v33  ;;  %v3234_v39 = vld [vmem:[#allocation7 + $0x78] sm:$0xff]  ;;  %v3341_v33 = vld [vmem:[#allocation8 + $0xe0] sm:$0xff] }
0x18c9   :  { %4909 = vmatprep.mubr.f32.mxu0 %v3002_v57  ;;  %v5654_v57 = vpack.c.bf16 %v3234_v39, %v3233_v36  ;;  %v3335_v39 = vld [vmem:[#allocation8 + $0xb0] sm:$0xff] }
0x18ca   :  { %4910 = vmatmul.mubr.f32.vlgmr.msra.gmra.mrb[22].mxu0 %v3003_v41  ;;  %v3314_v41 = vld [vmem:[#allocation8 + $0x8] sm:$0xff] }
0x18cb   :  { %3484 = vmatprep.mubr.f32.mxu0 %v5957_v19 }
0x199d   :  { %v4911_v22 = vpop.f32.mrb[22].mxu0 }
0x199e   :  { %v3099_v43 = vadd.f32 %v4911_v22, %v3772_v42  ;;  %v3093_v31 = vpop.f32.mrb[23].mxu0  ;;  %v3313_v22 = vld [vmem:[#allocation8] sm:$0xff] }
0x199f   :  { %v3094_v44 = vadd.f32 %v3772_v42, %v3093_v31  ;;  %v3319_v42 = vld [vmem:[#allocation8 + $0x30] sm:$0xff]  ;;  %v3318_v31 = vld [vmem:[#allocation8 + $0x28] sm:$0xff] }
0x19a0   :  { %3108 = vadd.xlane.f32.xlu1 %v3099_v43 }
0x19a1   :  { %3106 = vadd.xlane.f32.xlu0 %v3094_v44 }
0x1a2d   :  { %v3109_v16 = vpop.xlane.xlu1 %3108 }
0x1a2e   :  { %v3111_v45 = vmul.f32 0.0125, %v3109_v16  ;;  %v3107_v48 = vpop.xlane.xlu0 %3106  ;;  %v3321_v16 = vld [vmem:[#allocation8 + $0x40] sm:$0xff] }
0x1a2f   :  { %v3110_v32 = vmul.f32 0.0125, %v3107_v48 }
0x1a30   :  { %v3113_v8 = vsub.f32 %v3099_v43, %v3111_v45  ;;  %v5656_v43 = vpack.c.bf16 %v3319_v42, %v3314_v41  ;;  %v5658_v45 = vpack.c.bf16 %v3318_v31, %v3313_v22  ;;  %v3346_v41 = vld [vmem:[#allocation8 + $0x108] sm:$0xff]  ;;  %v3351_v42 = vld [vmem:[#allocation8 + $0x130] sm:$0xff]  ;;  %v3345_v31 = vld [vmem:[#allocation8 + $0x100] sm:$0xff] }
0x1a31   :  { %v3112_v49 = vsub.f32 %v3094_v44, %v3110_v32  ;;  %v3316_v44 = vld [vmem:[#allocation8 + $0x18] sm:$0xff] }
0x1a32   :  { %v3115_v50 = vmul.f32 %v3113_v8, %v3113_v8  ;;  %v5688_v48 = vpack.c.bf16 %v3321_v16, %v3316_v44  ;;  %v3324_v32 = vld [vmem:[#allocation8 + $0x58] sm:$0xff]  ;;  %5657 = vmatprep.subr.bf16.mxu0 %v5656_v43  ;;  %v5700_v43 = vpack.c.bf16 %v3351_v42, %v3346_v41  ;;  %v3350_v44 = vld [vmem:[#allocation8 + $0x128] sm:$0xff]  ;;  %v3387_v42 = vld [vmem:[#allocation8 + $0x250] sm:$0xff] }
0x1a33   :  { %v3114_v61 = vmul.f32 %v3112_v49, %v3112_v49  ;;  %5659 = vmatpush1.bf16.msra.mxu0 %v5658_v45  ;;  %v3356_v16 = vld [vmem:[#allocation8 + $0x158] sm:$0xff]  ;;  %v3361_v45 = vld [vmem:[#allocation8 + $0x180] sm:$0xff] }
0x1a34   :  { %v3117_v37 = vsel %vm90_vm0, %v3115_v50, 0.0  ;;  %v3328_v50 = vld [vmem:[#allocation8 + $0x78] sm:$0xff] }
0x1a35   :  { %3120 = vadd.xlane.f32.xlu1 %v3117_v37  ;;  %v3116_v51 = vsel %vm90_vm0, %v3114_v61, 0.0  ;;  %vm143_vm0 = vcmp.ge.s32.totalorder %v6102_v10, %v142_v4  ;;  %v3223_v10 = vld [vmem:[#allocation7 + $0x20] sm:$0xff]  ;;  %v3348_v4 = vld [vmem:[#allocation8 + $0x118] sm:$0xff] }
0x1a36   :  { %3118 = vadd.xlane.f32.xlu0 %v3116_v51  ;;  %vm147_vm12 = vmand %vm143_vm0, %vm146_vm8  ;;  %v5639_v24 = vpack.c.bf16 %v3224_v40, %v3223_v10  ;;  %v3334_v51 = vld [vmem:[#allocation8 + $0xa8] sm:$0xff] }
0x1a37   :  { %v148_v9 = vsel %vm147_vm12, 0.125, %v5957_v19  ;;  %v3378_v10 = vld [vmem:[#allocation8 + $0x208] sm:$0xff] }
0x1a38   :  { %v5682_v40 = vpack.c.bf16 %v3378_v10, %v3373_v53 }
0x1ac2   :  { %v3121_v62 = vpop.xlane.xlu1 %3120 }
0x1ac3   :  { %v3123_v46 = vmul.f32 0.0125, %v3121_v62  ;;  %v3119_v47 = vpop.xlane.xlu0 %3118  ;;  %v3339_v62 = vld [vmem:[#allocation8 + $0xd0] sm:$0xff] }
0x1ac4   :  { %v3122_v38 = vmul.f32 0.0125, %v3119_v47  ;;  %v3333_v47 = vld [vmem:[#allocation8 + $0xa0] sm:$0xff] }
0x1ac5   :  { %v3125_v63 = vadd.f32 1e-05, %v3123_v46  ;;  %v5664_v46 = vpack.c.bf16 %v3339_v62, %v3334_v51  ;;  %v3365_v62 = vld [vmem:[#allocation8 + $0x1a0] sm:$0xff] }
0x1ac6   :  { %v3124_v0 = vadd.f32 1e-05, %v3122_v38  ;;  %v3338_v38 = vld [vmem:[#allocation8 + $0xc8] sm:$0xff] }
0x1ac7   :  { %5826 = vrsqrt.f32 %v3125_v63  ;;  %v5666_v63 = vpack.c.bf16 %v3338_v38, %v3333_v47  ;;  %v3376_v47 = vld [vmem:[#allocation8 + $0x1f8] sm:$0xff]  ;;  %v3381_v38 = vld [vmem:[#allocation8 + $0x220] sm:$0xff] }
0x1ac8   :  { %5828 = vrsqrt.f32 %v3124_v0  ;;  %v3344_v0 = vld [vmem:[#allocation8 + $0xf8] sm:$0xff] }
0x1ad1   :  { %v5827_v2 = vpop.eup %5826 }
0x1ad2   :  { %v5829_v20 = vpop.eup %5828  ;;  %v3129_v59 = vmul.f32 %v5827_v2, %v3113_v8  ;;  %v3329_v8 = vld [vmem:[#allocation8 + $0x80] sm:$0xff]  ;;  %v3343_v2 = vld [vmem:[#allocation8 + $0xf0] sm:$0xff] }
0x1ad3   :  { %v3128_v6 = vmul.f32 %v5829_v20, %v3112_v49  ;;  %v3323_v49 = vld [vmem:[#allocation8 + $0x50] sm:$0xff]  ;;  %v5660_v61 = vpack.c.bf16 %v3329_v8, %v3324_v32  ;;  %v5670_v5 = vpack.c.bf16 %v3348_v4, %v3343_v2  ;;  %v3354_v20 = vld [vmem:[#allocation8 + $0x148] sm:$0xff]  ;;  %v5704_v32 = vpack.c.bf16 %v3361_v45, %v3356_v16  ;;  %v3380_v2 = vld [vmem:[#allocation8 + $0x218] sm:$0xff] }
0x1ad4   :  { %v3137_v58 = vmul.f32 %v3775_v3, %v3129_v59  ;;  %v5662_v37 = vpack.c.bf16 %v3328_v50, %v3323_v49  ;;  %v3359_v59 = vld [vmem:[#allocation8 + $0x170] sm:$0xff]  ;;  %v3360_v49 = vld [vmem:[#allocation8 + $0x178] sm:$0xff]  ;;  %v3366_v50 = vld [vmem:[#allocation8 + $0x1a8] sm:$0xff]  ;;  %v3401_v45 = vsub.s32 1, %v6137_v55 }
0x1ad5   :  { %v3136_v13 = vmul.f32 %v3775_v3, %v3128_v6  ;;  %5661 = vmatprep.subr.bf16.mxu0 %v5660_v61  ;;  %v5668_v3 = vpack.c.bf16 %v3349_v1, %v3344_v0  ;;  %v3353_v6 = vld [vmem:[#allocation8 + $0x140] sm:$0xff]  ;;  %v3355_v8 = vld [vmem:[#allocation8 + $0x150] sm:$0xff]  ;;  %v5712_v0 = vpack.c.bf16 %v3381_v38, %v3376_v47  ;;  %v3384_v4 = vld [vmem:[#allocation8 + $0x238] sm:$0xff] }
0x1ad6   :  { %v3145_v14 = vadd.f32 %v3776_v7, %v3137_v58  ;;  %5663 = vmatpush1.bf16.msra.mxu0 %v5662_v37  ;;  %v3358_v58 = vld [vmem:[#allocation8 + $0x168] sm:$0xff]  ;;  %v3371_v61 = vld [vmem:[#allocation8 + $0x1d0] sm:$0xff]  ;;  %v5706_v37 = vpack.c.bf16 %v3360_v49, %v3355_v8  ;;  %v3393_v16 = vld [vmem:[%s6480_s8] sm:$0x1f]  ;;  %v3409_v8 = vsub.s32 3, %v6137_v55  ;;  %s5961_s8 = smov [#allocation10]  }
0x1ad7   :  { %v3144_v15 = vadd.f32 %v3776_v7, %v3136_v13  ;;  %5665 = vmatprep.subr.bf16.mxu0 %v5664_v46  ;;  %v5672_v7 = vpack.c.bf16 %v3359_v59, %v3354_v20  ;;  %v5674_v13 = vpack.c.bf16 %v3358_v58, %v3353_v6  ;;  %v5708_v51 = vpack.c.bf16 %v3371_v61, %v3366_v50  ;;  %v3370_v46 = vld [vmem:[#allocation8 + $0x1c8] sm:$0xff]  ;;  %v3375_v1 = vld [vmem:[#allocation8 + $0x1f0] sm:$0xff]  ;;  %v3388_v6 = vld [vmem:[#allocation8 + $0x258] sm:$0xff]  ;;  %s3671_s18 = sshll.u32 %s5961_s8, 4  ;;  %s3672_s18 = int_to_ptr.vmem [resolvable:$true] %s3671_s18 }
0x1ad8   :  { %v3383_v59 = vld [vmem:[#allocation8 + $0x230] sm:$0xff]  ;;  %v3402_v61 = vrot.slane %v3393_v16, %v3401_v45  ;;  %s5918_s19 = scalar_lea.vmem %s3672_s18, 160  ;;  %p5923_p5 = scmp.lt.s32.totalorder %s3672_s18, %s3672_s18 }
0x1ad9   :  { %v5630_v21 = vpack.c.bf16 %v3145_v14, %v3144_v15  ;;  %v3364_v14 = vld [vmem:[#allocation8 + $0x198] sm:$0xff]  ;;  %v3369_v15 = vld [vmem:[#allocation8 + $0x1c0] sm:$0xff]  ;;  %v5686_v58 = vpack.c.bf16 %v3388_v6, %v3383_v59  ;;  %v3413_v6 = vsub.s32 4, %v6137_v55  ;;  %p5919_p4 = scmp.ne.s32.totalorder %s3672_s18, %s5918_s19  ;;  %p5924_p6 = scmp.lt.s32.totalorder %s5918_s19, %s5918_s19 }
0x1ada   :  { %5667 = vmatpush1.bf16.msra.mxu0 %v5666_v63  ;;  %v5676_v18 = vpack.c.bf16 %v3369_v15, %v3364_v14  ;;  %v5710_v63 = vpack.c.bf16 %v3370_v46, %v3365_v62  ;;  %v3385_v14 = vld [vmem:[#allocation8 + $0x240] sm:$0xff]  ;;  %v3390_v15 = vld [vmem:[#allocation8 + $0x268] sm:$0xff] }
0x1adb   :  { %5631 = vmatpush3.bf16.msra.mxu1 %v5630_v21  ;;  %5669 = vmatprep.subr.bf16.mxu0 %v5668_v3  ;;  %v3368_v21 = vld [vmem:[#allocation8 + $0x1b8] sm:$0xff]  ;;  %v5714_v3 = vpack.c.bf16 %v3380_v2, %v3375_v1  ;;  %p5925_p7 = por %p5924_p6, %p5923_p5 }
0x1adc   :  { %5632 = vmatprep.subr.bf16.mxu1 %v5958_v52 }
0x1add   :  { %p5926_p8 = pnand %p5925_p7, %p5919_p4 }
0x1ade   :  { %4917 = vmatmul.mubr.msk.f32.vlgmr.msra.gmra.mrb[30].mxu1 %vm772_vm9, %v148_v9  ;;  %5671 = vmatpush1.bf16.msra.mxu0 %v5670_v5  ;;  %v5678_v9 = vpack.c.bf16 %v3368_v21, %v3363_v17  ;;  %v3389_v5 = vld [vmem:[#allocation8 + $0x260] sm:$0xff] }
0x1adf   :  { %5634 = vmatpush3.bf16.msra.mxu1 %v5633_v12  ;;  %4951 = vmatprep.mubr.msk.f32.mxu1 %vm5959_vm7, %v5957_v19  ;;  %v3374_v12 = vld [vmem:[#allocation8 + $0x1e8] sm:$0xff]  ;;  %v5684_v20 = vpack.c.bf16 %v3389_v5, %v3384_v4  ;;  %v3778_v21 = vld [vmem:[%s6478_s6] ss:$0 sm:$0xff] }
0x1ae0   :  { %5635 = vmatprep.subr.bf16.mxu1 %v5958_v52  ;;  %5673 = vmatprep.subr.bf16.mxu0 %v5672_v7  ;;  %v3386_v7 = vld [vmem:[#allocation8 + $0x248] sm:$0xff] }
0x1ae2   :  { %5675 = vmatpush1.bf16.msra.mxu0 %v5674_v13  ;;  %v3391_v13 = vld [vmem:[#allocation8 + $0x270] sm:$0xff] }
0x1ae3   :  { %5637 = vmatpush3.bf16.msra.mxu1 %v5636_v11  ;;  %5677 = vmatprep.subr.bf16.mxu0 %v5676_v18  ;;  %v5680_v11 = vpack.c.bf16 %v3379_v23, %v3374_v12  ;;  %v5716_v17 = vpack.c.bf16 %v3391_v13, %v3386_v7  ;;  %v5718_v18 = vpack.c.bf16 %v3390_v15, %v3385_v14  ;;  %v3322_v12 = vld [vmem:[#allocation8 + $0x48] sm:$0xff] }
0x1ae4   :  { %5638 = vmatprep.subr.bf16.mxu1 %v5958_v52  ;;  %v3414_v7 = vrot.slane %v3393_v16, %v3413_v6 }
0x1ae6   :  { %5679 = vmatpush1.bf16.msra.mxu0 %v5678_v9  ;;  %v3317_v9 = vld [vmem:[#allocation8 + $0x20] sm:$0xff] }
0x1ae7   :  { %5640 = vmatpush3.bf16.msra.mxu1 %v5639_v24  ;;  %5681 = vmatprep.subr.bf16.mxu0 %v5680_v11  ;;  %v3315_v24 = vld [vmem:[#allocation8 + $0x10] sm:$0xff]  ;;  %v5721_v10 = vpack.c.bf16 %v3322_v12, %v3317_v9 }
0x1ae8   :  { %5641 = vmatprep.subr.bf16.mxu1 %v5958_v52  ;;  %v5690_v26 = vpack.c.bf16 %v3320_v60, %v3315_v24  ;;  %v3327_v24 = vld [vmem:[#allocation8 + $0x70] sm:$0xff]  ;;  %v3332_v60 = vld [vmem:[#allocation8 + $0x98] sm:$0xff] }
0x1aea   :  { %5683 = vmatpush1.bf16.msra.mxu0 %v5682_v40 }
0x1aeb   :  { %5643 = vmatpush3.bf16.msra.mxu1 %v5642_v56  ;;  %v3331_v56 = vld [vmem:[#allocation8 + $0x90] sm:$0xff]  ;;  %5685 = vmatprep.subr.bf16.mxu0 %v5684_v20 }
0x1aec   :  { %5644 = vmatprep.subr.bf16.mxu1 %v5958_v52  ;;  %v5692_v27 = vpack.c.bf16 %v3331_v56, %v3326_v25  ;;  %v5724_v25 = vpack.c.bf16 %v3332_v60, %v3327_v24  ;;  %v3337_v56 = vld [vmem:[#allocation8 + $0xc0] sm:$0xff] }
0x1aee   :  { %5687 = vmatpush1.bf16.msra.mxu0 %v5686_v58 }
0x1aef   :  { %5646 = vmatpush3.bf16.msra.mxu1 %v5645_v54  ;;  %v3325_v54 = vld [vmem:[#allocation8 + $0x60] sm:$0xff]  ;;  %5720 = vmatprep.subr.bf16.mxu0 %v5958_v52 }
0x1af0   :  { %5647 = vmatprep.subr.bf16.mxu1 %v5958_v52 }
0x1af3   :  { %5649 = vmatpush3.bf16.msra.mxu1 %v5648_v30  ;;  %v3336_v30 = vld [vmem:[#allocation8 + $0xb8] sm:$0xff] }
0x1af4   :  { %5650 = vmatprep.subr.bf16.mxu1 %v5958_v52  ;;  %v5696_v36 = vpack.c.bf16 %v3341_v33, %v3336_v30  ;;  %v3357_v30 = vld [vmem:[#allocation8 + $0x160] sm:$0xff]  ;;  %v3362_v33 = vld [vmem:[#allocation8 + $0x188] sm:$0xff] }
0x1af7   :  { %5652 = vmatpush3.bf16.msra.mxu1 %v5651_v35  ;;  %v5694_v35 = vpack.c.bf16 %v3330_v28, %v3325_v54  ;;  %v3347_v54 = vld [vmem:[#allocation8 + $0x110] sm:$0xff]  ;;  %v3352_v28 = vld [vmem:[#allocation8 + $0x138] sm:$0xff] }
0x1af8   :  { %5653 = vmatprep.subr.bf16.mxu1 %v5958_v52 }
0x1afb   :  { %5655 = vmatpush3.bf16.msra.mxu1 %v5654_v57  ;;  %v3340_v57 = vld [vmem:[#allocation8 + $0xd8] sm:$0xff] }
0x1afc   :  { %5689 = vmatprep.subr.bf16.mxu1 %v5688_v48  ;;  %v5698_v22 = vpack.c.bf16 %v3340_v57, %v3335_v39  ;;  %v5702_v48 = vpack.c.bf16 %v3350_v44, %v3345_v31  ;;  %v3377_v39 = vld [vmem:[#allocation8 + $0x200] sm:$0xff]  ;;  %v3382_v57 = vld [vmem:[#allocation8 + $0x228] sm:$0xff]  ;;  %v3397_v31 = vsub.s32 0, %v6137_v55  ;;  %v3405_v44 = vsub.s32 2, %v6137_v55 }
0x1afd   :  { %v5739_v41 = vpack.c.bf16 %v3382_v57, %v3377_v39 }
0x1afe   :  { %v3398_v49 = vrot.slane %v3393_v16, %v3397_v31  ;;  %v3406_v50 = vrot.slane %v3393_v16, %v3405_v44 }
0x1bb1   :  { %v3215_v29 = vpop.f32.mrb[30].mxu1 }
0x1bb2   :  { %v4918_v34 = vpop.f32.mrb[31].mxu1  ;;  %4952 = vmatmul.mubr.f32.vlgmr.msra.gmra.mrb[32].mxu1 %v3215_v29  ;;  %v5730_v29 = vpack.c.bf16 %v3352_v28, %v3347_v54 }
0x1bb3   :  { %5691 = vmatpush1.bf16.msra.mxu1 %v5690_v26  ;;  %3555 = vmatprep.mubr.f32.mxu1 %v5957_v19  ;;  %v3342_v26 = vld [vmem:[#allocation8 + $0xe8] sm:$0xff]  ;;  %v5733_v34 = vpack.c.bf16 %v3362_v33, %v3357_v30 }
0x1bb4   :  { %5693 = vmatprep.subr.bf16.mxu1 %v5692_v27  ;;  %v5727_v27 = vpack.c.bf16 %v3342_v26, %v3337_v56 }
0x1bb7   :  { %5695 = vmatpush1.bf16.msra.mxu1 %v5694_v35  ;;  %v3372_v35 = vld [vmem:[#allocation8 + $0x1d8] sm:$0xff] }
0x1bb8   :  { %5697 = vmatprep.subr.bf16.mxu1 %v5696_v36 }
0x1bbb   :  { %5699 = vmatpush1.bf16.msra.mxu1 %v5698_v22  ;;  %v3392_v22 = vld [vmem:[#allocation8 + $0x278] sm:$0xff] }
0x1bbc   :  { %5701 = vmatprep.subr.bf16.mxu1 %v5700_v43  ;;  %v5742_v43 = vpack.c.bf16 %v3392_v22, %v3387_v42 }
0x1bbf   :  { %5703 = vmatpush1.bf16.msra.mxu1 %v5702_v48  ;;  %v5960_v48 = vmov 1983009808  }
0x1bc0   :  { %5705 = vmatprep.subr.bf16.mxu1 %v5704_v32  ;;  %v3640_v32 = vunpack.c.l.s4 %v5960_v48 }
0x1bc3   :  { %5707 = vmatpush1.bf16.msra.mxu1 %v5706_v37  ;;  %v3410_v37 = vrot.slane %v3393_v16, %v3409_v8 }
0x1bc4   :  { %5709 = vmatprep.subr.bf16.mxu1 %v5708_v51 }
0x1bc7   :  { %5711 = vmatpush1.bf16.msra.mxu1 %v5710_v63 }
0x1bc8   :  { %5713 = vmatprep.subr.bf16.mxu1 %v5712_v0 }
0x1bcb   :  { %5715 = vmatpush1.bf16.msra.mxu1 %v5714_v3 }
0x1bcc   :  { %5717 = vmatprep.subr.bf16.mxu1 %v5716_v17 }
0x1bcf   :  { %5719 = vmatpush1.bf16.msra.mxu1 %v5718_v18 }
0x1c85   :  { %v3308_v23 = vpop.f32.mrb[32].mxu1 }
0x1c86   :  { %v3309_v53 = vadd.f32 %v3778_v21, %v3308_v23  ;;  %v4953_v11 = vpop.f32.mrb[33].mxu1 }
0x1c88   :  { %v3312_v40 = vmax.f32 %v3309_v53, 0.0 }
0x1c8a   :  { %3485 = vmatmul.mubr.f32.vlgmr.msra.gmra.mrb[24].mxu0 %v3312_v40  ;;  %3556 = vmatmul.mubr.f32.vlgmr.msra.gmra.mrb[34].mxu1 %v3312_v40 }
0x1c8b   :  { %5722 = vmatpush3.bf16.msra.mxu0 %v5721_v10  ;;  %4986 = vmatprep.mubr.msk.f32.mxu0 %vm5959_vm7, %v5957_v19  ;;  %v3367_v19 = vld [vmem:[#allocation8 + $0x1b0] sm:$0xff] }
0x1c8c   :  { %5723 = vmatprep.subr.bf16.mxu0 %v5958_v52  ;;  %v5736_v36 = vpack.c.bf16 %v3372_v35, %v3367_v19 }
0x1c8f   :  { %5725 = vmatpush3.bf16.msra.mxu0 %v5724_v25 }
0x1c90   :  { %5726 = vmatprep.subr.bf16.mxu0 %v5958_v52 }
0x1c93   :  { %5728 = vmatpush3.bf16.msra.mxu0 %v5727_v27 }
0x1c94   :  { %5729 = vmatprep.subr.bf16.mxu0 %v5958_v52 }
0x1c97   :  { %5731 = vmatpush3.bf16.msra.mxu0 %v5730_v29 }
0x1c98   :  { %5732 = vmatprep.subr.bf16.mxu0 %v5958_v52 }
0x1c9b   :  { %5734 = vmatpush3.bf16.msra.mxu0 %v5733_v34 }
0x1c9c   :  { %5735 = vmatprep.subr.bf16.mxu0 %v5958_v52 }
0x1c9f   :  { %5737 = vmatpush3.bf16.msra.mxu0 %v5736_v36 }
0x1ca0   :  { %5738 = vmatprep.subr.bf16.mxu0 %v5958_v52 }
0x1ca3   :  { %5740 = vmatpush3.bf16.msra.mxu0 %v5739_v41 }
0x1ca4   :  { %5741 = vmatprep.subr.bf16.mxu0 %v5958_v52  ;;  %v3641_v52 = vunpack.c.0.s8 %v3640_v32 }
0x1ca6   :  { %v3644_v1 = vsub.s32 %v3641_v52, %v6137_v55 }
0x1ca7   :  { %5743 = vmatpush3.bf16.msra.mxu0 %v5742_v43 }
0x1caa   :  { %4987 = vmatmul.mubr.f32.vlgmr.msra.gmra.mrb[26].mxu0 %v3312_v40 }
0x1d5d   :  { %v3486_v51 = vpop.f32.mrb[24].mxu0  ;;  %v3557_v62 = vpop.f32.mrb[34].mxu1 }
0x1d5e   :  { %v3487_v46 = vadd.f32 %v3486_v51, %v3398_v49  ;;  %v3558_v47 = vadd.f32 %v3557_v62, %v3406_v50  ;;  %v3488_v38 = vpop.f32.mrb[25].mxu0  ;;  %v3559_v63 = vpop.f32.mrb[35].mxu1 }
0x1d5f   :  { %v3489_v0 = vadd.f32 %v3488_v38, %v3402_v61  ;;  %v3560_v2 = vadd.f32 %v3559_v63, %v3410_v37 }
0x1d61   :  { %v3637_v3 = vcombine.low %v3487_v46, %v3489_v0  ;;  %v3638_v4 = vcombine.low %v3558_v47, %v3560_v2 }
0x1d63   :  { %v3645_v5 = vrot.slane %v3637_v3, %v3644_v1  ;;  %v3652_v20 = vrot.slane %v3638_v4, %v3644_v1 }
0x1d65   :  { %v3653_v59 = vcombine.low %v3645_v5, %v3652_v20 }
0x1d67   :  { %3663 = vst [vmem:[#allocation10] sm:$0xff] %v3653_v59 }
0x1d7d   :  { %v3628_v58 = vpop.f32.mrb[26].mxu0 }
0x1d7e   :  { %v3629_v13 = vadd.f32 %v3628_v58, %v3414_v7  ;;  %v4988_v14 = vpop.f32.mrb[27].mxu0 }
0x1d80   :  { %3779 = vst.sshfl [vmem:[#allocation10 + $0x8] sm:$0x3 pattern:$0x76325410] %v3629_v13 }
0x1d81   :  { %5929 = shalt.err (!%p5926_p8)
}
0x1d82   :  { %s5930_s24 = scalar_lea.hbm %s6481_s9, 160 }
0x1d83   :  { %p5931_p9 = scmp.ne.s32.totalorder %s6481_s9, %s5930_s24  ;;  %p5934_p10 = scmp.lt.u32.totalorder %s5930_s24, %s6481_s9 }
0x1d85   :  { %p5936_p11 = pnand %p5934_p10, %p5931_p9 }
0x1d87   :  { %5939 = shalt.err (!%p5936_p11)
}
0x1d88   :  { %3674 = dma.vmem_to_hbm [thread:$0]  %s3672_s18, 160, %s6481_s9, [#allocation4]  }
0x1d89   :  { %5946 = dma.done.wait [#allocation4], 160  }
0x1d8a   :  { %5947 = vsyncadd [#allocation4], 4294967136 }
0x1d8b   :  { %3678 = vsyncpa [#allocation3], 1 }
0x1d8c   :  { %3679 = vsyncpa [#allocation6], 1 }
0x1d8d   :  { %3680 = vsyncpa [#allocation9], 1 }
0x1d8e   :  { %3681 = vsyncpa [#allocation4], 1 }

</bundles_post_ra>
